<compile_context>
chip_gen: v5e
topology: v5e:2x2
jax: 0.10.0
libtpu: 0.0.40
codegen_flags: <defaults>
</compile_context>

<pallas_src>
import functools

import jax
import jax.numpy as jnp
from jax.experimental import pallas as pl
from jax.experimental.pallas import tpu as pltpu


# ------------------------------ fused kernel --------------------------------

def _fused_forward_kernel(num_layers, *refs):
    """Entire SoftPoolingGcnEncoder forward for the whole batch, in VMEM."""
    L = num_layers
    out_ref = refs[-1]
    x_ref, adj_ref, mask_ref = refs[0], refs[1], refs[2]

    # ---- unpack parameter refs (ordering fixed by the host wrapper) --------
    idx = 3

    def take(n):
        nonlocal idx
        vals = refs[idx:idx + n]
        idx += n
        return vals

    def take_stack():
        stack = []
        for _ in range(L):
            w1, b1, w2, b2 = take(4)
            stack.append((w1[...], b1[...], w2[...], b2[...]))
        return stack

    gc1 = take_stack()                       # pre-pool embedding stack
    agc = take_stack()                       # assignment stack
    gc2 = take_stack()                       # post-pool embedding stack
    apw_ref, apb_ref, pw1_ref, pb1_ref, pw2_ref, pb2_ref = take(6)

    B, N, _ = x_ref.shape
    f32, bf16 = jnp.float32, jnp.bfloat16

    x = x_ref[...]                           # (B, N, Fin)  f32
    adj = adj_ref[...]                       # (B, N, N)    bf16 (0/1 -> exact)
    mask = mask_ref[...]                     # (B, N, 1)    f32

    # ---- helpers ------------------------------------------------------------
    def bmm(a, b):
        # Batched matmul: bf16 MXU operands, f32 accumulation.
        return jnp.einsum('bij,bjk->bik', a.astype(bf16), b.astype(bf16),
                          preferred_element_type=f32)

    def bdot(h, w):
        # (B, M, D) @ (D, H): broadcast the weight over the batch so the dot
        # stays a rank-3 x rank-3 batched matmul (avoids a tile-unfriendly
        # reshape when M < 8, i.e. for the pooled graph with K clusters).
        wb = jnp.broadcast_to(w.astype(bf16), (h.shape[0],) + w.shape)
        return jnp.einsum('bmd,bdh->bmh', h.astype(bf16), wb,
                          preferred_element_type=f32)

    def mlp_flat(h, w1, b1, w2, b2):
        # GraphConv's 2-layer MLP on node features, flattened to (B*N, D) rows
        # (N % 8 == 0 makes the reshape a layout no-op).  Elementwise math in
        # f32; matmul operands bf16 with f32 accumulation.
        Bq, Nq, Din = h.shape
        h2 = h.reshape(Bq * Nq, Din)
        z = jnp.dot(h2.astype(bf16), w1, preferred_element_type=f32) + b1
        z = jnp.maximum(z, 0.0)
        o = jnp.dot(z.astype(bf16), w2, preferred_element_type=f32) + b2
        return o.reshape(Bq, Nq, o.shape[-1])

    def mlp_bcast(h, w1, b1, w2, b2):
        # Same MLP for the pooled graph (cluster count K < 8 sublanes).
        z = jnp.maximum(bdot(h, w1) + b1, 0.0)
        return bdot(z, w2) + b2

    def norm_emb(p):
        # GraphConv.normalize_embedding: (p - mean_batch) / std_batch with
        # torch's unbiased std (ddof=1).  Requires B >= 2, same as reference.
        mean = jnp.mean(p, axis=0, keepdims=True)
        var = jnp.sum((p - mean) ** 2, axis=0, keepdims=True) / (B - 1)
        return (p - mean) / jnp.sqrt(var)

    def apply_bn(p):
        # Fresh nn.BatchNorm1d(p.shape[1]) in training mode: per-node/cluster
        # stats over (batch, feature), biased variance, eps=1e-5, affine=Id.
        m = jnp.mean(p, axis=(0, 2), keepdims=True)
        v = jnp.mean((p - m) ** 2, axis=(0, 2), keepdims=True)
        return (p - m) * jax.lax.rsqrt(v + 1e-5)

    def run_node_stack(stack, agg0):
        # gcn_forward on the original graph.  Returns the masked per-layer
        # outputs, i.e. the pieces of torch.cat(x_all, dim=2); the concat is
        # never materialized (downstream consumers are applied piecewise).
        pieces, h = [], None
        for li, (w1, b1, w2, b2) in enumerate(stack):
            agg = agg0 if li == 0 else bmm(adj, h)
            p = norm_emb(mlp_flat(agg, w1, b1, w2, b2))
            if li < L - 1:                       # ReLU + BN on all but last
                p = apply_bn(jnp.maximum(p, 0.0))
            pieces.append(p)
            h = p
        return [p * mask for p in pieces]

    # ---- pre-pool stacks: adj loaded once, layer-0 aggregation shared -------
    agg0 = bmm(adj, x)                                        # (B, N, Fin)
    emb_pieces = run_node_stack(gc1, agg0)                    # widths hid,hid,emb
    asn_pieces = run_node_stack(agc, agg0)                    # widths ahid,ahid,adim

    out_pieces = [jnp.max(p, axis=1) for p in emb_pieces]     # readout, (B, d_i)

    # ---- assignment head: Linear over the (virtual) concat == sum over
    # row-blocks of the head weight, then softmax over clusters, then mask.
    BN = B * N
    K = apw_ref.shape[-1]
    logits = jnp.zeros((BN, K), f32)
    off = 0
    for p in asn_pieces:
        d = p.shape[-1]
        logits = logits + jnp.dot(p.reshape(BN, d), apw_ref[off:off + d, :],
                                  preferred_element_type=f32)
        off += d
    logits = (logits + apb_ref[...]).reshape(B, N, K)
    lmax = jnp.max(logits, axis=-1, keepdims=True)
    e = jnp.exp(logits - lmax)
    assign = (e / jnp.sum(e, axis=-1, keepdims=True)) * mask  # (B, N, K)

    # ---- soft pooling: transpose the assignment ONCE and reuse it for both
    # S^T @ E and S^T @ A @ S.
    at = jnp.swapaxes(assign, 1, 2)                           # (B, K, N)
    xp_pieces = [bmm(at, p) for p in emb_pieces]              # each (B, K, d_i)
    adj_pool = bmm(bmm(at, adj), assign)                      # (B, K, K)

    # ---- post-pool stack (no mask).  Layer 0 consumes the pooled features
    # piecewise: its first linear is a sum over row-blocks of w1.
    w1, b1, w2, b2 = gc2[0]
    z, off = None, 0
    for xp in xp_pieces:
        d = xp.shape[-1]
        c = bdot(bmm(adj_pool, xp), w1[off:off + d, :])
        z = c if z is None else z + c
        off += d
    z = jnp.maximum(z + b1, 0.0)
    p = norm_emb(bdot(z, w2) + b2)
    if L > 1:
        p = apply_bn(jnp.maximum(p, 0.0))
    gc2_pieces, h = [p], p
    for li in range(1, L):
        w1, b1, w2, b2 = gc2[li]
        p = norm_emb(mlp_bcast(bmm(adj_pool, h), w1, b1, w2, b2))
        if li < L - 1:
            p = apply_bn(jnp.maximum(p, 0.0))
        gc2_pieces.append(p)
        h = p

    out_pieces += [jnp.max(p, axis=1) for p in gc2_pieces]

    # ---- prediction head, folded into the same kernel (only B rows): the
    # concat of the max-readouts is again applied as weight row-blocks.
    ph = jnp.zeros((B, pb1_ref.shape[-1]), f32)
    off = 0
    for o in out_pieces:
        d = o.shape[-1]
        ph = ph + jnp.dot(o, pw1_ref[off:off + d, :],
                          preferred_element_type=f32)
        off += d
    ph = jnp.maximum(ph + pb1_ref[...], 0.0)
    out_ref[...] = (jnp.dot(ph, pw2_ref[...], preferred_element_type=f32)
                    + pb2_ref[...])


# ------------------------------ host wrapper ---------------------------------

def forward(params, x, adj, batch_num_nodes):
    """Builds the node mask, flattens/casts params, runs the fused kernel."""
    B, N, _ = adj.shape
    num_layers = len(params["gc1"])
    label_dim = params["pred_w2"].shape[-1]

    mask = (jnp.arange(N)[None, :] < batch_num_nodes[:, None]).astype(
        jnp.float32)[..., None]                                   # (B, N, 1)

    bf16 = jnp.bfloat16
    # GraphConv weights feed the MXU -> bf16; biases and the small heads
    # (assignment linear, prediction MLP) stay f32.
    flat = [x.astype(jnp.float32), adj.astype(bf16), mask]
    for name in ("gc1", "assign_gc", "gc2"):
        for layer in params[name]:
            flat += [layer["w1"].astype(bf16), layer["b1"],
                     layer["w2"].astype(bf16), layer["b2"]]
    flat += [params["assign_pred_w"], params["assign_pred_b"],
             params["pred_w1"], params["pred_b1"],
             params["pred_w2"], params["pred_b2"]]

    kernel = functools.partial(_fused_forward_kernel, num_layers)
    # No grid / no BlockSpecs: every operand is tiny and lives whole in VMEM;
    # a single kernel invocation covers the full batch (the cross-batch
    # normalizations need the whole batch resident anyway).
    return pl.pallas_call(
        kernel,
        out_shape=jax.ShapeDtypeStruct((B, label_dim), jnp.float32),
        compiler_params=pltpu.CompilerParams(
            vmem_limit_bytes=32 * 1024 * 1024),
    )(*flat)


# ------------------------- deterministic parameters -------------------------

_GAIN_RELU = 2.0 ** 0.5


def _xavier_uniform(key, shape, gain):
    fan_in, fan_out = shape
    limit = gain * (6.0 / (fan_in + fan_out)) ** 0.5
    return jax.random.uniform(key, shape, jnp.float32, -limit, limit)


def _make_gc(key, din, h, dout):
    k1, k2 = jax.random.split(key)
    return {
        "w1": _xavier_uniform(k1, (din, h), _GAIN_RELU),
        "b1": jnp.zeros((1, h), jnp.float32),
        "w2": _xavier_uniform(k2, (h, dout), _GAIN_RELU),
        "b2": jnp.zeros((1, dout), jnp.float32),
    }


def _make_stack(key, dims):
    keys = jax.random.split(key, len(dims))
    return [_make_gc(k, *d) for k, d in zip(keys, dims)]


def init_params(key, input_dim, hidden_dim, embedding_dim, label_dim,
                num_layers, assign_hidden_dim, assign_dim, pred_hidden):
    pred_input_dim = hidden_dim * (num_layers - 1) + embedding_dim
    assign_pred_input_dim = assign_hidden_dim * (num_layers - 1) + assign_dim
    k = jax.random.split(key, 6)

    gc1_dims = ([(input_dim, hidden_dim, hidden_dim)]
                + [(hidden_dim, hidden_dim, hidden_dim)] * (num_layers - 2)
                + [(hidden_dim, hidden_dim, embedding_dim)])
    agc_dims = ([(input_dim, assign_hidden_dim, assign_hidden_dim)]
                + [(assign_hidden_dim, assign_hidden_dim, assign_hidden_dim)]
                * (num_layers - 2)
                + [(assign_hidden_dim, assign_hidden_dim, assign_dim)])
    gc2_dims = ([(pred_input_dim, hidden_dim, hidden_dim)]
                + [(hidden_dim, hidden_dim, hidden_dim)] * (num_layers - 2)
                + [(hidden_dim, hidden_dim, embedding_dim)])

    return {
        "gc1": _make_stack(k[0], gc1_dims),
        "assign_gc": _make_stack(k[1], agc_dims),
        "gc2": _make_stack(k[2], gc2_dims),
        "assign_pred_w": _xavier_uniform(k[3], (assign_pred_input_dim, assign_dim), 1.0),
        "assign_pred_b": jnp.zeros((1, assign_dim), jnp.float32),
        "pred_w1": _xavier_uniform(k[4], (pred_input_dim * 2, pred_hidden), 1.0),
        "pred_b1": jnp.zeros((1, pred_hidden), jnp.float32),
        "pred_w2": _xavier_uniform(k[5], (pred_hidden, label_dim), 1.0),
        "pred_b2": jnp.zeros((1, label_dim), jnp.float32),
    }


# ----------------------------------- main -----------------------------------

if __name__ == "__main__":
    B, N = 2, 16
    input_dim, hidden_dim, embedding_dim, label_dim = 8, 16, 24, 4
    num_layers = 3
    assign_hidden_dim = 16
    assign_ratio = 0.25
    assign_dim = int(N * assign_ratio)     # 4
    pred_hidden = 50                       # pred_hidden_dims=[50]

    root = jax.random.PRNGKey(0)
    kp, kx, ka = jax.random.split(root, 3)

    params = init_params(kp, input_dim, hidden_dim, embedding_dim, label_dim,
                         num_layers, assign_hidden_dim, assign_dim, pred_hidden)

    x = jax.random.normal(kx, (B, N, input_dim), jnp.float32)
    adj_r = jax.random.uniform(ka, (B, N, N), jnp.float32)
    adj = ((adj_r + jnp.swapaxes(adj_r, 1, 2)) > 1.0).astype(jnp.float32)
    batch_num_nodes = jnp.array([16, 12], dtype=jnp.int32)

    fwd = jax.jit(functools.partial(forward, params))
    ypred = fwd(x, adj, batch_num_nodes)
    jax.block_until_ready(ypred)

    assert ypred.shape == (B, label_dim), ypred.shape
    print("KERNEL_OK")
</pallas_src>

<mosaic_0001>
module attributes {stable_mosaic.version = 11 : i64} {
  func.func @_fused_forward_kernel(%arg0: memref<2x16x8xf32, #tpu.memory_space<vmem>>, %arg1: memref<2x16x16xbf16, #tpu.memory_space<vmem>>, %arg2: memref<2x16x1xf32, #tpu.memory_space<vmem>>, %arg3: memref<8x16xbf16, #tpu.memory_space<vmem>>, %arg4: memref<1x16xf32, #tpu.memory_space<vmem>>, %arg5: memref<16x16xbf16, #tpu.memory_space<vmem>>, %arg6: memref<1x16xf32, #tpu.memory_space<vmem>>, %arg7: memref<16x16xbf16, #tpu.memory_space<vmem>>, %arg8: memref<1x16xf32, #tpu.memory_space<vmem>>, %arg9: memref<16x16xbf16, #tpu.memory_space<vmem>>, %arg10: memref<1x16xf32, #tpu.memory_space<vmem>>, %arg11: memref<16x16xbf16, #tpu.memory_space<vmem>>, %arg12: memref<1x16xf32, #tpu.memory_space<vmem>>, %arg13: memref<16x24xbf16, #tpu.memory_space<vmem>>, %arg14: memref<1x24xf32, #tpu.memory_space<vmem>>, %arg15: memref<8x16xbf16, #tpu.memory_space<vmem>>, %arg16: memref<1x16xf32, #tpu.memory_space<vmem>>, %arg17: memref<16x16xbf16, #tpu.memory_space<vmem>>, %arg18: memref<1x16xf32, #tpu.memory_space<vmem>>, %arg19: memref<16x16xbf16, #tpu.memory_space<vmem>>, %arg20: memref<1x16xf32, #tpu.memory_space<vmem>>, %arg21: memref<16x16xbf16, #tpu.memory_space<vmem>>, %arg22: memref<1x16xf32, #tpu.memory_space<vmem>>, %arg23: memref<16x16xbf16, #tpu.memory_space<vmem>>, %arg24: memref<1x16xf32, #tpu.memory_space<vmem>>, %arg25: memref<16x4xbf16, #tpu.memory_space<vmem>>, %arg26: memref<1x4xf32, #tpu.memory_space<vmem>>, %arg27: memref<56x16xbf16, #tpu.memory_space<vmem>>, %arg28: memref<1x16xf32, #tpu.memory_space<vmem>>, %arg29: memref<16x16xbf16, #tpu.memory_space<vmem>>, %arg30: memref<1x16xf32, #tpu.memory_space<vmem>>, %arg31: memref<16x16xbf16, #tpu.memory_space<vmem>>, %arg32: memref<1x16xf32, #tpu.memory_space<vmem>>, %arg33: memref<16x16xbf16, #tpu.memory_space<vmem>>, %arg34: memref<1x16xf32, #tpu.memory_space<vmem>>, %arg35: memref<16x16xbf16, #tpu.memory_space<vmem>>, %arg36: memref<1x16xf32, #tpu.memory_space<vmem>>, %arg37: memref<16x24xbf16, #tpu.memory_space<vmem>>, %arg38: memref<1x24xf32, #tpu.memory_space<vmem>>, %arg39: memref<36x4xf32, #tpu.memory_space<vmem>>, %arg40: memref<1x4xf32, #tpu.memory_space<vmem>>, %arg41: memref<112x50xf32, #tpu.memory_space<vmem>>, %arg42: memref<1x50xf32, #tpu.memory_space<vmem>>, %arg43: memref<50x4xf32, #tpu.memory_space<vmem>>, %arg44: memref<1x4xf32, #tpu.memory_space<vmem>>, %arg45: memref<2x4xf32, #tpu.memory_space<vmem>>) attributes {dimension_semantics = [], scalar_prefetch = 0 : i64, scratch_operands = 0 : i64, tpu.core_type = #tpu.core_type<tc>} {
    %c0 = arith.constant 0 : index
    %c0_0 = arith.constant 0 : index
    %0 = vector.load %arg3[%c0, %c0_0] : memref<8x16xbf16, #tpu.memory_space<vmem>>, vector<8x16xbf16>
    %c0_1 = arith.constant 0 : index
    %c0_2 = arith.constant 0 : index
    %1 = vector.load %arg4[%c0_1, %c0_2] : memref<1x16xf32, #tpu.memory_space<vmem>>, vector<1x16xf32>
    %c0_3 = arith.constant 0 : index
    %c0_4 = arith.constant 0 : index
    %2 = vector.load %arg5[%c0_3, %c0_4] : memref<16x16xbf16, #tpu.memory_space<vmem>>, vector<16x16xbf16>
    %c0_5 = arith.constant 0 : index
    %c0_6 = arith.constant 0 : index
    %3 = vector.load %arg6[%c0_5, %c0_6] : memref<1x16xf32, #tpu.memory_space<vmem>>, vector<1x16xf32>
    %c0_7 = arith.constant 0 : index
    %c0_8 = arith.constant 0 : index
    %4 = vector.load %arg7[%c0_7, %c0_8] : memref<16x16xbf16, #tpu.memory_space<vmem>>, vector<16x16xbf16>
    %c0_9 = arith.constant 0 : index
    %c0_10 = arith.constant 0 : index
    %5 = vector.load %arg8[%c0_9, %c0_10] : memref<1x16xf32, #tpu.memory_space<vmem>>, vector<1x16xf32>
    %c0_11 = arith.constant 0 : index
    %c0_12 = arith.constant 0 : index
    %6 = vector.load %arg9[%c0_11, %c0_12] : memref<16x16xbf16, #tpu.memory_space<vmem>>, vector<16x16xbf16>
    %c0_13 = arith.constant 0 : index
    %c0_14 = arith.constant 0 : index
    %7 = vector.load %arg10[%c0_13, %c0_14] : memref<1x16xf32, #tpu.memory_space<vmem>>, vector<1x16xf32>
    %c0_15 = arith.constant 0 : index
    %c0_16 = arith.constant 0 : index
    %8 = vector.load %arg11[%c0_15, %c0_16] : memref<16x16xbf16, #tpu.memory_space<vmem>>, vector<16x16xbf16>
    %c0_17 = arith.constant 0 : index
    %c0_18 = arith.constant 0 : index
    %9 = vector.load %arg12[%c0_17, %c0_18] : memref<1x16xf32, #tpu.memory_space<vmem>>, vector<1x16xf32>
    %c0_19 = arith.constant 0 : index
    %c0_20 = arith.constant 0 : index
    %10 = vector.load %arg13[%c0_19, %c0_20] : memref<16x24xbf16, #tpu.memory_space<vmem>>, vector<16x24xbf16>
    %c0_21 = arith.constant 0 : index
    %c0_22 = arith.constant 0 : index
    %11 = vector.load %arg14[%c0_21, %c0_22] : memref<1x24xf32, #tpu.memory_space<vmem>>, vector<1x24xf32>
    %c0_23 = arith.constant 0 : index
    %c0_24 = arith.constant 0 : index
    %12 = vector.load %arg15[%c0_23, %c0_24] : memref<8x16xbf16, #tpu.memory_space<vmem>>, vector<8x16xbf16>
    %c0_25 = arith.constant 0 : index
    %c0_26 = arith.constant 0 : index
    %13 = vector.load %arg16[%c0_25, %c0_26] : memref<1x16xf32, #tpu.memory_space<vmem>>, vector<1x16xf32>
    %c0_27 = arith.constant 0 : index
    %c0_28 = arith.constant 0 : index
    %14 = vector.load %arg17[%c0_27, %c0_28] : memref<16x16xbf16, #tpu.memory_space<vmem>>, vector<16x16xbf16>
    %c0_29 = arith.constant 0 : index
    %c0_30 = arith.constant 0 : index
    %15 = vector.load %arg18[%c0_29, %c0_30] : memref<1x16xf32, #tpu.memory_space<vmem>>, vector<1x16xf32>
    %c0_31 = arith.constant 0 : index
    %c0_32 = arith.constant 0 : index
    %16 = vector.load %arg19[%c0_31, %c0_32] : memref<16x16xbf16, #tpu.memory_space<vmem>>, vector<16x16xbf16>
    %c0_33 = arith.constant 0 : index
    %c0_34 = arith.constant 0 : index
    %17 = vector.load %arg20[%c0_33, %c0_34] : memref<1x16xf32, #tpu.memory_space<vmem>>, vector<1x16xf32>
    %c0_35 = arith.constant 0 : index
    %c0_36 = arith.constant 0 : index
    %18 = vector.load %arg21[%c0_35, %c0_36] : memref<16x16xbf16, #tpu.memory_space<vmem>>, vector<16x16xbf16>
    %c0_37 = arith.constant 0 : index
    %c0_38 = arith.constant 0 : index
    %19 = vector.load %arg22[%c0_37, %c0_38] : memref<1x16xf32, #tpu.memory_space<vmem>>, vector<1x16xf32>
    %c0_39 = arith.constant 0 : index
    %c0_40 = arith.constant 0 : index
    %20 = vector.load %arg23[%c0_39, %c0_40] : memref<16x16xbf16, #tpu.memory_space<vmem>>, vector<16x16xbf16>
    %c0_41 = arith.constant 0 : index
    %c0_42 = arith.constant 0 : index
    %21 = vector.load %arg24[%c0_41, %c0_42] : memref<1x16xf32, #tpu.memory_space<vmem>>, vector<1x16xf32>
    %c0_43 = arith.constant 0 : index
    %c0_44 = arith.constant 0 : index
    %22 = vector.load %arg25[%c0_43, %c0_44] : memref<16x4xbf16, #tpu.memory_space<vmem>>, vector<16x4xbf16>
    %c0_45 = arith.constant 0 : index
    %c0_46 = arith.constant 0 : index
    %23 = vector.load %arg26[%c0_45, %c0_46] : memref<1x4xf32, #tpu.memory_space<vmem>>, vector<1x4xf32>
    %c0_47 = arith.constant 0 : index
    %c0_48 = arith.constant 0 : index
    %24 = vector.load %arg27[%c0_47, %c0_48] : memref<56x16xbf16, #tpu.memory_space<vmem>>, vector<56x16xbf16>
    %c0_49 = arith.constant 0 : index
    %c0_50 = arith.constant 0 : index
    %25 = vector.load %arg28[%c0_49, %c0_50] : memref<1x16xf32, #tpu.memory_space<vmem>>, vector<1x16xf32>
    %c0_51 = arith.constant 0 : index
    %c0_52 = arith.constant 0 : index
    %26 = vector.load %arg29[%c0_51, %c0_52] : memref<16x16xbf16, #tpu.memory_space<vmem>>, vector<16x16xbf16>
    %c0_53 = arith.constant 0 : index
    %c0_54 = arith.constant 0 : index
    %27 = vector.load %arg30[%c0_53, %c0_54] : memref<1x16xf32, #tpu.memory_space<vmem>>, vector<1x16xf32>
    %c0_55 = arith.constant 0 : index
    %c0_56 = arith.constant 0 : index
    %28 = vector.load %arg31[%c0_55, %c0_56] : memref<16x16xbf16, #tpu.memory_space<vmem>>, vector<16x16xbf16>
    %c0_57 = arith.constant 0 : index
    %c0_58 = arith.constant 0 : index
    %29 = vector.load %arg32[%c0_57, %c0_58] : memref<1x16xf32, #tpu.memory_space<vmem>>, vector<1x16xf32>
    %c0_59 = arith.constant 0 : index
    %c0_60 = arith.constant 0 : index
    %30 = vector.load %arg33[%c0_59, %c0_60] : memref<16x16xbf16, #tpu.memory_space<vmem>>, vector<16x16xbf16>
    %c0_61 = arith.constant 0 : index
    %c0_62 = arith.constant 0 : index
    %31 = vector.load %arg34[%c0_61, %c0_62] : memref<1x16xf32, #tpu.memory_space<vmem>>, vector<1x16xf32>
    %c0_63 = arith.constant 0 : index
    %c0_64 = arith.constant 0 : index
    %32 = vector.load %arg35[%c0_63, %c0_64] : memref<16x16xbf16, #tpu.memory_space<vmem>>, vector<16x16xbf16>
    %c0_65 = arith.constant 0 : index
    %c0_66 = arith.constant 0 : index
    %33 = vector.load %arg36[%c0_65, %c0_66] : memref<1x16xf32, #tpu.memory_space<vmem>>, vector<1x16xf32>
    %c0_67 = arith.constant 0 : index
    %c0_68 = arith.constant 0 : index
    %34 = vector.load %arg37[%c0_67, %c0_68] : memref<16x24xbf16, #tpu.memory_space<vmem>>, vector<16x24xbf16>
    %c0_69 = arith.constant 0 : index
    %c0_70 = arith.constant 0 : index
    %35 = vector.load %arg38[%c0_69, %c0_70] : memref<1x24xf32, #tpu.memory_space<vmem>>, vector<1x24xf32>
    %c0_71 = arith.constant 0 : index
    %c0_72 = arith.constant 0 : index
    %c0_73 = arith.constant 0 : index
    %36 = vector.load %arg0[%c0_71, %c0_72, %c0_73] : memref<2x16x8xf32, #tpu.memory_space<vmem>>, vector<2x16x8xf32>
    %c0_74 = arith.constant 0 : index
    %c0_75 = arith.constant 0 : index
    %c0_76 = arith.constant 0 : index
    %37 = vector.load %arg1[%c0_74, %c0_75, %c0_76] : memref<2x16x16xbf16, #tpu.memory_space<vmem>>, vector<2x16x16xbf16>
    %c0_77 = arith.constant 0 : index
    %c0_78 = arith.constant 0 : index
    %c0_79 = arith.constant 0 : index
    %38 = vector.load %arg2[%c0_77, %c0_78, %c0_79] : memref<2x16x1xf32, #tpu.memory_space<vmem>>, vector<2x16x1xf32>
    %39 = arith.truncf %36 : vector<2x16x8xf32> to vector<2x16x8xbf16>
    "tpu.trace_start"() <{level = 10 : i32, message = "bij,bjk->bik"}> : () -> ()
    %cst = arith.constant dense<0.000000e+00> : vector<2x16x8xf32>
    %40 = tpu.matmul %37, %39, %cst {dimension_numbers = #tpu.dot_dimension_numbers<[2], [1], [1], [2], [0, 0, 0, 1, 1, 2], [0], [0]>} : vector<2x16x16xbf16>, vector<2x16x8xbf16>, vector<2x16x8xf32> -> vector<2x16x8xf32>
    "tpu.trace_stop"() : () -> ()
    %41 = vector.shape_cast %40 : vector<2x16x8xf32> to vector<32x8xf32>
    %42 = arith.truncf %41 : vector<32x8xf32> to vector<32x8xbf16>
    %cst_80 = arith.constant dense<0.000000e+00> : vector<32x16xf32>
    %43 = tpu.matmul %42, %0, %cst_80 {dimension_numbers = #tpu.dot_dimension_numbers<[1], [0], [0], [1], [0, 0, 1, 1], [], []>} : vector<32x8xbf16>, vector<8x16xbf16>, vector<32x16xf32> -> vector<32x16xf32>
    %44 = vector.broadcast %1 : vector<1x16xf32> to vector<32x16xf32>
    %45 = arith.addf %43, %44 : vector<32x16xf32>
    %cst_81 = arith.constant 0.000000e+00 : f32
    %46 = vector.broadcast %cst_81 : f32 to vector<32x16xf32>
    %47 = arith.maximumf %45, %46 : vector<32x16xf32>
    %48 = arith.truncf %47 : vector<32x16xf32> to vector<32x16xbf16>
    %cst_82 = arith.constant dense<0.000000e+00> : vector<32x16xf32>
    %49 = tpu.matmul %48, %2, %cst_82 {dimension_numbers = #tpu.dot_dimension_numbers<[1], [0], [0], [1], [0, 0, 1, 1], [], []>} : vector<32x16xbf16>, vector<16x16xbf16>, vector<32x16xf32> -> vector<32x16xf32>
    %50 = vector.broadcast %3 : vector<1x16xf32> to vector<32x16xf32>
    %51 = arith.addf %49, %50 : vector<32x16xf32>
    %52 = vector.shape_cast %51 : vector<32x16xf32> to vector<2x16x16xf32>
    %cst_83 = arith.constant dense<0.000000e+00> : vector<16x16xf32>
    %53 = vector.multi_reduction <add>, %52, %cst_83 [0] : vector<2x16x16xf32> to vector<16x16xf32>
    %54 = vector.shape_cast %53 : vector<16x16xf32> to vector<1x16x16xf32>
    %cst_84 = arith.constant 2.000000e+00 : f32
    %55 = vector.broadcast %cst_84 : f32 to vector<1x16x16xf32>
    %56 = arith.divf %54, %55 : vector<1x16x16xf32>
    %57 = vector.broadcast %56 : vector<1x16x16xf32> to vector<2x16x16xf32>
    %58 = arith.subf %52, %57 : vector<2x16x16xf32>
    %59 = arith.mulf %58, %58 : vector<2x16x16xf32>
    %cst_85 = arith.constant dense<0.000000e+00> : vector<16x16xf32>
    %60 = vector.multi_reduction <add>, %59, %cst_85 [0] : vector<2x16x16xf32> to vector<16x16xf32>
    %61 = vector.shape_cast %60 : vector<16x16xf32> to vector<1x16x16xf32>
    %cst_86 = arith.constant 1.000000e+00 : f32
    %62 = vector.broadcast %cst_86 : f32 to vector<1x16x16xf32>
    %63 = arith.divf %61, %62 : vector<1x16x16xf32>
    %64 = vector.broadcast %56 : vector<1x16x16xf32> to vector<2x16x16xf32>
    %65 = arith.subf %52, %64 : vector<2x16x16xf32>
    %66 = math.sqrt %63 : vector<1x16x16xf32>
    %67 = vector.broadcast %66 : vector<1x16x16xf32> to vector<2x16x16xf32>
    %68 = arith.divf %65, %67 : vector<2x16x16xf32>
    %cst_87 = arith.constant 0.000000e+00 : f32
    %69 = vector.broadcast %cst_87 : f32 to vector<2x16x16xf32>
    %70 = arith.maximumf %68, %69 : vector<2x16x16xf32>
    %cst_88 = arith.constant dense<0.000000e+00> : vector<16xf32>
    %71 = vector.multi_reduction <add>, %70, %cst_88 [0, 2] : vector<2x16x16xf32> to vector<16xf32>
    %72 = vector.shape_cast %71 : vector<16xf32> to vector<1x16x1xf32>
    %cst_89 = arith.constant 3.200000e+01 : f32
    %73 = vector.broadcast %cst_89 : f32 to vector<1x16x1xf32>
    %74 = arith.divf %72, %73 : vector<1x16x1xf32>
    %75 = vector.broadcast %74 : vector<1x16x1xf32> to vector<2x16x16xf32>
    %76 = arith.subf %70, %75 : vector<2x16x16xf32>
    %77 = arith.mulf %76, %76 : vector<2x16x16xf32>
    %cst_90 = arith.constant dense<0.000000e+00> : vector<16xf32>
    %78 = vector.multi_reduction <add>, %77, %cst_90 [0, 2] : vector<2x16x16xf32> to vector<16xf32>
    %79 = vector.shape_cast %78 : vector<16xf32> to vector<1x16x1xf32>
    %cst_91 = arith.constant 3.200000e+01 : f32
    %80 = vector.broadcast %cst_91 : f32 to vector<1x16x1xf32>
    %81 = arith.divf %79, %80 : vector<1x16x1xf32>
    %82 = vector.broadcast %74 : vector<1x16x1xf32> to vector<2x16x16xf32>
    %83 = arith.subf %70, %82 : vector<2x16x16xf32>
    %cst_92 = arith.constant 9.99999974E-6 : f32
    %84 = vector.broadcast %cst_92 : f32 to vector<1x16x1xf32>
    %85 = arith.addf %81, %84 : vector<1x16x1xf32>
    %86 = math.rsqrt %85 : vector<1x16x1xf32>
    %87 = vector.broadcast %86 : vector<1x16x1xf32> to vector<2x16x16xf32>
    %88 = arith.mulf %83, %87 : vector<2x16x16xf32>
    %89 = arith.truncf %88 : vector<2x16x16xf32> to vector<2x16x16xbf16>
    "tpu.trace_start"() <{level = 10 : i32, message = "bij,bjk->bik"}> : () -> ()
    %cst_93 = arith.constant dense<0.000000e+00> : vector<2x16x16xf32>
    %90 = tpu.matmul %37, %89, %cst_93 {dimension_numbers = #tpu.dot_dimension_numbers<[2], [1], [1], [2], [0, 0, 0, 1, 1, 2], [0], [0]>} : vector<2x16x16xbf16>, vector<2x16x16xbf16>, vector<2x16x16xf32> -> vector<2x16x16xf32>
    "tpu.trace_stop"() : () -> ()
    %91 = vector.shape_cast %90 : vector<2x16x16xf32> to vector<32x16xf32>
    %92 = arith.truncf %91 : vector<32x16xf32> to vector<32x16xbf16>
    %cst_94 = arith.constant dense<0.000000e+00> : vector<32x16xf32>
    %93 = tpu.matmul %92, %4, %cst_94 {dimension_numbers = #tpu.dot_dimension_numbers<[1], [0], [0], [1], [0, 0, 1, 1], [], []>} : vector<32x16xbf16>, vector<16x16xbf16>, vector<32x16xf32> -> vector<32x16xf32>
    %94 = vector.broadcast %5 : vector<1x16xf32> to vector<32x16xf32>
    %95 = arith.addf %93, %94 : vector<32x16xf32>
    %cst_95 = arith.constant 0.000000e+00 : f32
    %96 = vector.broadcast %cst_95 : f32 to vector<32x16xf32>
    %97 = arith.maximumf %95, %96 : vector<32x16xf32>
    %98 = arith.truncf %97 : vector<32x16xf32> to vector<32x16xbf16>
    %cst_96 = arith.constant dense<0.000000e+00> : vector<32x16xf32>
    %99 = tpu.matmul %98, %6, %cst_96 {dimension_numbers = #tpu.dot_dimension_numbers<[1], [0], [0], [1], [0, 0, 1, 1], [], []>} : vector<32x16xbf16>, vector<16x16xbf16>, vector<32x16xf32> -> vector<32x16xf32>
    %100 = vector.broadcast %7 : vector<1x16xf32> to vector<32x16xf32>
    %101 = arith.addf %99, %100 : vector<32x16xf32>
    %102 = vector.shape_cast %101 : vector<32x16xf32> to vector<2x16x16xf32>
    %cst_97 = arith.constant dense<0.000000e+00> : vector<16x16xf32>
    %103 = vector.multi_reduction <add>, %102, %cst_97 [0] : vector<2x16x16xf32> to vector<16x16xf32>
    %104 = vector.shape_cast %103 : vector<16x16xf32> to vector<1x16x16xf32>
    %cst_98 = arith.constant 2.000000e+00 : f32
    %105 = vector.broadcast %cst_98 : f32 to vector<1x16x16xf32>
    %106 = arith.divf %104, %105 : vector<1x16x16xf32>
    %107 = vector.broadcast %106 : vector<1x16x16xf32> to vector<2x16x16xf32>
    %108 = arith.subf %102, %107 : vector<2x16x16xf32>
    %109 = arith.mulf %108, %108 : vector<2x16x16xf32>
    %cst_99 = arith.constant dense<0.000000e+00> : vector<16x16xf32>
    %110 = vector.multi_reduction <add>, %109, %cst_99 [0] : vector<2x16x16xf32> to vector<16x16xf32>
    %111 = vector.shape_cast %110 : vector<16x16xf32> to vector<1x16x16xf32>
    %cst_100 = arith.constant 1.000000e+00 : f32
    %112 = vector.broadcast %cst_100 : f32 to vector<1x16x16xf32>
    %113 = arith.divf %111, %112 : vector<1x16x16xf32>
    %114 = vector.broadcast %106 : vector<1x16x16xf32> to vector<2x16x16xf32>
    %115 = arith.subf %102, %114 : vector<2x16x16xf32>
    %116 = math.sqrt %113 : vector<1x16x16xf32>
    %117 = vector.broadcast %116 : vector<1x16x16xf32> to vector<2x16x16xf32>
    %118 = arith.divf %115, %117 : vector<2x16x16xf32>
    %cst_101 = arith.constant 0.000000e+00 : f32
    %119 = vector.broadcast %cst_101 : f32 to vector<2x16x16xf32>
    %120 = arith.maximumf %118, %119 : vector<2x16x16xf32>
    %cst_102 = arith.constant dense<0.000000e+00> : vector<16xf32>
    %121 = vector.multi_reduction <add>, %120, %cst_102 [0, 2] : vector<2x16x16xf32> to vector<16xf32>
    %122 = vector.shape_cast %121 : vector<16xf32> to vector<1x16x1xf32>
    %cst_103 = arith.constant 3.200000e+01 : f32
    %123 = vector.broadcast %cst_103 : f32 to vector<1x16x1xf32>
    %124 = arith.divf %122, %123 : vector<1x16x1xf32>
    %125 = vector.broadcast %124 : vector<1x16x1xf32> to vector<2x16x16xf32>
    %126 = arith.subf %120, %125 : vector<2x16x16xf32>
    %127 = arith.mulf %126, %126 : vector<2x16x16xf32>
    %cst_104 = arith.constant dense<0.000000e+00> : vector<16xf32>
    %128 = vector.multi_reduction <add>, %127, %cst_104 [0, 2] : vector<2x16x16xf32> to vector<16xf32>
    %129 = vector.shape_cast %128 : vector<16xf32> to vector<1x16x1xf32>
    %cst_105 = arith.constant 3.200000e+01 : f32
    %130 = vector.broadcast %cst_105 : f32 to vector<1x16x1xf32>
    %131 = arith.divf %129, %130 : vector<1x16x1xf32>
    %132 = vector.broadcast %124 : vector<1x16x1xf32> to vector<2x16x16xf32>
    %133 = arith.subf %120, %132 : vector<2x16x16xf32>
    %cst_106 = arith.constant 9.99999974E-6 : f32
    %134 = vector.broadcast %cst_106 : f32 to vector<1x16x1xf32>
    %135 = arith.addf %131, %134 : vector<1x16x1xf32>
    %136 = math.rsqrt %135 : vector<1x16x1xf32>
    %137 = vector.broadcast %136 : vector<1x16x1xf32> to vector<2x16x16xf32>
    %138 = arith.mulf %133, %137 : vector<2x16x16xf32>
    %139 = arith.truncf %138 : vector<2x16x16xf32> to vector<2x16x16xbf16>
    "tpu.trace_start"() <{level = 10 : i32, message = "bij,bjk->bik"}> : () -> ()
    %cst_107 = arith.constant dense<0.000000e+00> : vector<2x16x16xf32>
    %140 = tpu.matmul %37, %139, %cst_107 {dimension_numbers = #tpu.dot_dimension_numbers<[2], [1], [1], [2], [0, 0, 0, 1, 1, 2], [0], [0]>} : vector<2x16x16xbf16>, vector<2x16x16xbf16>, vector<2x16x16xf32> -> vector<2x16x16xf32>
    "tpu.trace_stop"() : () -> ()
    %141 = vector.shape_cast %140 : vector<2x16x16xf32> to vector<32x16xf32>
    %142 = arith.truncf %141 : vector<32x16xf32> to vector<32x16xbf16>
    %cst_108 = arith.constant dense<0.000000e+00> : vector<32x16xf32>
    %143 = tpu.matmul %142, %8, %cst_108 {dimension_numbers = #tpu.dot_dimension_numbers<[1], [0], [0], [1], [0, 0, 1, 1], [], []>} : vector<32x16xbf16>, vector<16x16xbf16>, vector<32x16xf32> -> vector<32x16xf32>
    %144 = vector.broadcast %9 : vector<1x16xf32> to vector<32x16xf32>
    %145 = arith.addf %143, %144 : vector<32x16xf32>
    %cst_109 = arith.constant 0.000000e+00 : f32
    %146 = vector.broadcast %cst_109 : f32 to vector<32x16xf32>
    %147 = arith.maximumf %145, %146 : vector<32x16xf32>
    %148 = arith.truncf %147 : vector<32x16xf32> to vector<32x16xbf16>
    %cst_110 = arith.constant dense<0.000000e+00> : vector<32x24xf32>
    %149 = tpu.matmul %148, %10, %cst_110 {dimension_numbers = #tpu.dot_dimension_numbers<[1], [0], [0], [1], [0, 0, 1, 1], [], []>} : vector<32x16xbf16>, vector<16x24xbf16>, vector<32x24xf32> -> vector<32x24xf32>
    %150 = vector.broadcast %11 : vector<1x24xf32> to vector<32x24xf32>
    %151 = arith.addf %149, %150 : vector<32x24xf32>
    %152 = vector.shape_cast %151 : vector<32x24xf32> to vector<2x16x24xf32>
    %cst_111 = arith.constant dense<0.000000e+00> : vector<16x24xf32>
    %153 = vector.multi_reduction <add>, %152, %cst_111 [0] : vector<2x16x24xf32> to vector<16x24xf32>
    %154 = vector.shape_cast %153 : vector<16x24xf32> to vector<1x16x24xf32>
    %cst_112 = arith.constant 2.000000e+00 : f32
    %155 = vector.broadcast %cst_112 : f32 to vector<1x16x24xf32>
    %156 = arith.divf %154, %155 : vector<1x16x24xf32>
    %157 = vector.broadcast %156 : vector<1x16x24xf32> to vector<2x16x24xf32>
    %158 = arith.subf %152, %157 : vector<2x16x24xf32>
    %159 = arith.mulf %158, %158 : vector<2x16x24xf32>
    %cst_113 = arith.constant dense<0.000000e+00> : vector<16x24xf32>
    %160 = vector.multi_reduction <add>, %159, %cst_113 [0] : vector<2x16x24xf32> to vector<16x24xf32>
    %161 = vector.shape_cast %160 : vector<16x24xf32> to vector<1x16x24xf32>
    %cst_114 = arith.constant 1.000000e+00 : f32
    %162 = vector.broadcast %cst_114 : f32 to vector<1x16x24xf32>
    %163 = arith.divf %161, %162 : vector<1x16x24xf32>
    %164 = vector.broadcast %156 : vector<1x16x24xf32> to vector<2x16x24xf32>
    %165 = arith.subf %152, %164 : vector<2x16x24xf32>
    %166 = math.sqrt %163 : vector<1x16x24xf32>
    %167 = vector.broadcast %166 : vector<1x16x24xf32> to vector<2x16x24xf32>
    %168 = arith.divf %165, %167 : vector<2x16x24xf32>
    %169 = vector.broadcast %38 : vector<2x16x1xf32> to vector<2x16x16xf32>
    %170 = arith.mulf %88, %169 : vector<2x16x16xf32>
    %171 = vector.broadcast %38 : vector<2x16x1xf32> to vector<2x16x16xf32>
    %172 = arith.mulf %138, %171 : vector<2x16x16xf32>
    %173 = vector.broadcast %38 : vector<2x16x1xf32> to vector<2x16x24xf32>
    %174 = arith.mulf %168, %173 : vector<2x16x24xf32>
    %175 = vector.shape_cast %40 : vector<2x16x8xf32> to vector<32x8xf32>
    %176 = arith.truncf %175 : vector<32x8xf32> to vector<32x8xbf16>
    %cst_115 = arith.constant dense<0.000000e+00> : vector<32x16xf32>
    %177 = tpu.matmul %176, %12, %cst_115 {dimension_numbers = #tpu.dot_dimension_numbers<[1], [0], [0], [1], [0, 0, 1, 1], [], []>} : vector<32x8xbf16>, vector<8x16xbf16>, vector<32x16xf32> -> vector<32x16xf32>
    %178 = vector.broadcast %13 : vector<1x16xf32> to vector<32x16xf32>
    %179 = arith.addf %177, %178 : vector<32x16xf32>
    %cst_116 = arith.constant 0.000000e+00 : f32
    %180 = vector.broadcast %cst_116 : f32 to vector<32x16xf32>
    %181 = arith.maximumf %179, %180 : vector<32x16xf32>
    %182 = arith.truncf %181 : vector<32x16xf32> to vector<32x16xbf16>
    %cst_117 = arith.constant dense<0.000000e+00> : vector<32x16xf32>
    %183 = tpu.matmul %182, %14, %cst_117 {dimension_numbers = #tpu.dot_dimension_numbers<[1], [0], [0], [1], [0, 0, 1, 1], [], []>} : vector<32x16xbf16>, vector<16x16xbf16>, vector<32x16xf32> -> vector<32x16xf32>
    %184 = vector.broadcast %15 : vector<1x16xf32> to vector<32x16xf32>
    %185 = arith.addf %183, %184 : vector<32x16xf32>
    %186 = vector.shape_cast %185 : vector<32x16xf32> to vector<2x16x16xf32>
    %cst_118 = arith.constant dense<0.000000e+00> : vector<16x16xf32>
    %187 = vector.multi_reduction <add>, %186, %cst_118 [0] : vector<2x16x16xf32> to vector<16x16xf32>
    %188 = vector.shape_cast %187 : vector<16x16xf32> to vector<1x16x16xf32>
    %cst_119 = arith.constant 2.000000e+00 : f32
    %189 = vector.broadcast %cst_119 : f32 to vector<1x16x16xf32>
    %190 = arith.divf %188, %189 : vector<1x16x16xf32>
    %191 = vector.broadcast %190 : vector<1x16x16xf32> to vector<2x16x16xf32>
    %192 = arith.subf %186, %191 : vector<2x16x16xf32>
    %193 = arith.mulf %192, %192 : vector<2x16x16xf32>
    %cst_120 = arith.constant dense<0.000000e+00> : vector<16x16xf32>
    %194 = vector.multi_reduction <add>, %193, %cst_120 [0] : vector<2x16x16xf32> to vector<16x16xf32>
    %195 = vector.shape_cast %194 : vector<16x16xf32> to vector<1x16x16xf32>
    %cst_121 = arith.constant 1.000000e+00 : f32
    %196 = vector.broadcast %cst_121 : f32 to vector<1x16x16xf32>
    %197 = arith.divf %195, %196 : vector<1x16x16xf32>
    %198 = vector.broadcast %190 : vector<1x16x16xf32> to vector<2x16x16xf32>
    %199 = arith.subf %186, %198 : vector<2x16x16xf32>
    %200 = math.sqrt %197 : vector<1x16x16xf32>
    %201 = vector.broadcast %200 : vector<1x16x16xf32> to vector<2x16x16xf32>
    %202 = arith.divf %199, %201 : vector<2x16x16xf32>
    %cst_122 = arith.constant 0.000000e+00 : f32
    %203 = vector.broadcast %cst_122 : f32 to vector<2x16x16xf32>
    %204 = arith.maximumf %202, %203 : vector<2x16x16xf32>
    %cst_123 = arith.constant dense<0.000000e+00> : vector<16xf32>
    %205 = vector.multi_reduction <add>, %204, %cst_123 [0, 2] : vector<2x16x16xf32> to vector<16xf32>
    %206 = vector.shape_cast %205 : vector<16xf32> to vector<1x16x1xf32>
    %cst_124 = arith.constant 3.200000e+01 : f32
    %207 = vector.broadcast %cst_124 : f32 to vector<1x16x1xf32>
    %208 = arith.divf %206, %207 : vector<1x16x1xf32>
    %209 = vector.broadcast %208 : vector<1x16x1xf32> to vector<2x16x16xf32>
    %210 = arith.subf %204, %209 : vector<2x16x16xf32>
    %211 = arith.mulf %210, %210 : vector<2x16x16xf32>
    %cst_125 = arith.constant dense<0.000000e+00> : vector<16xf32>
    %212 = vector.multi_reduction <add>, %211, %cst_125 [0, 2] : vector<2x16x16xf32> to vector<16xf32>
    %213 = vector.shape_cast %212 : vector<16xf32> to vector<1x16x1xf32>
    %cst_126 = arith.constant 3.200000e+01 : f32
    %214 = vector.broadcast %cst_126 : f32 to vector<1x16x1xf32>
    %215 = arith.divf %213, %214 : vector<1x16x1xf32>
    %216 = vector.broadcast %208 : vector<1x16x1xf32> to vector<2x16x16xf32>
    %217 = arith.subf %204, %216 : vector<2x16x16xf32>
    %cst_127 = arith.constant 9.99999974E-6 : f32
    %218 = vector.broadcast %cst_127 : f32 to vector<1x16x1xf32>
    %219 = arith.addf %215, %218 : vector<1x16x1xf32>
    %220 = math.rsqrt %219 : vector<1x16x1xf32>
    %221 = vector.broadcast %220 : vector<1x16x1xf32> to vector<2x16x16xf32>
    %222 = arith.mulf %217, %221 : vector<2x16x16xf32>
    %223 = arith.truncf %222 : vector<2x16x16xf32> to vector<2x16x16xbf16>
    "tpu.trace_start"() <{level = 10 : i32, message = "bij,bjk->bik"}> : () -> ()
    %cst_128 = arith.constant dense<0.000000e+00> : vector<2x16x16xf32>
    %224 = tpu.matmul %37, %223, %cst_128 {dimension_numbers = #tpu.dot_dimension_numbers<[2], [1], [1], [2], [0, 0, 0, 1, 1, 2], [0], [0]>} : vector<2x16x16xbf16>, vector<2x16x16xbf16>, vector<2x16x16xf32> -> vector<2x16x16xf32>
    "tpu.trace_stop"() : () -> ()
    %225 = vector.shape_cast %224 : vector<2x16x16xf32> to vector<32x16xf32>
    %226 = arith.truncf %225 : vector<32x16xf32> to vector<32x16xbf16>
    %cst_129 = arith.constant dense<0.000000e+00> : vector<32x16xf32>
    %227 = tpu.matmul %226, %16, %cst_129 {dimension_numbers = #tpu.dot_dimension_numbers<[1], [0], [0], [1], [0, 0, 1, 1], [], []>} : vector<32x16xbf16>, vector<16x16xbf16>, vector<32x16xf32> -> vector<32x16xf32>
    %228 = vector.broadcast %17 : vector<1x16xf32> to vector<32x16xf32>
    %229 = arith.addf %227, %228 : vector<32x16xf32>
    %cst_130 = arith.constant 0.000000e+00 : f32
    %230 = vector.broadcast %cst_130 : f32 to vector<32x16xf32>
    %231 = arith.maximumf %229, %230 : vector<32x16xf32>
    %232 = arith.truncf %231 : vector<32x16xf32> to vector<32x16xbf16>
    %cst_131 = arith.constant dense<0.000000e+00> : vector<32x16xf32>
    %233 = tpu.matmul %232, %18, %cst_131 {dimension_numbers = #tpu.dot_dimension_numbers<[1], [0], [0], [1], [0, 0, 1, 1], [], []>} : vector<32x16xbf16>, vector<16x16xbf16>, vector<32x16xf32> -> vector<32x16xf32>
    %234 = vector.broadcast %19 : vector<1x16xf32> to vector<32x16xf32>
    %235 = arith.addf %233, %234 : vector<32x16xf32>
    %236 = vector.shape_cast %235 : vector<32x16xf32> to vector<2x16x16xf32>
    %cst_132 = arith.constant dense<0.000000e+00> : vector<16x16xf32>
    %237 = vector.multi_reduction <add>, %236, %cst_132 [0] : vector<2x16x16xf32> to vector<16x16xf32>
    %238 = vector.shape_cast %237 : vector<16x16xf32> to vector<1x16x16xf32>
    %cst_133 = arith.constant 2.000000e+00 : f32
    %239 = vector.broadcast %cst_133 : f32 to vector<1x16x16xf32>
    %240 = arith.divf %238, %239 : vector<1x16x16xf32>
    %241 = vector.broadcast %240 : vector<1x16x16xf32> to vector<2x16x16xf32>
    %242 = arith.subf %236, %241 : vector<2x16x16xf32>
    %243 = arith.mulf %242, %242 : vector<2x16x16xf32>
    %cst_134 = arith.constant dense<0.000000e+00> : vector<16x16xf32>
    %244 = vector.multi_reduction <add>, %243, %cst_134 [0] : vector<2x16x16xf32> to vector<16x16xf32>
    %245 = vector.shape_cast %244 : vector<16x16xf32> to vector<1x16x16xf32>
    %cst_135 = arith.constant 1.000000e+00 : f32
    %246 = vector.broadcast %cst_135 : f32 to vector<1x16x16xf32>
    %247 = arith.divf %245, %246 : vector<1x16x16xf32>
    %248 = vector.broadcast %240 : vector<1x16x16xf32> to vector<2x16x16xf32>
    %249 = arith.subf %236, %248 : vector<2x16x16xf32>
    %250 = math.sqrt %247 : vector<1x16x16xf32>
    %251 = vector.broadcast %250 : vector<1x16x16xf32> to vector<2x16x16xf32>
    %252 = arith.divf %249, %251 : vector<2x16x16xf32>
    %cst_136 = arith.constant 0.000000e+00 : f32
    %253 = vector.broadcast %cst_136 : f32 to vector<2x16x16xf32>
    %254 = arith.maximumf %252, %253 : vector<2x16x16xf32>
    %cst_137 = arith.constant dense<0.000000e+00> : vector<16xf32>
    %255 = vector.multi_reduction <add>, %254, %cst_137 [0, 2] : vector<2x16x16xf32> to vector<16xf32>
    %256 = vector.shape_cast %255 : vector<16xf32> to vector<1x16x1xf32>
    %cst_138 = arith.constant 3.200000e+01 : f32
    %257 = vector.broadcast %cst_138 : f32 to vector<1x16x1xf32>
    %258 = arith.divf %256, %257 : vector<1x16x1xf32>
    %259 = vector.broadcast %258 : vector<1x16x1xf32> to vector<2x16x16xf32>
    %260 = arith.subf %254, %259 : vector<2x16x16xf32>
    %261 = arith.mulf %260, %260 : vector<2x16x16xf32>
    %cst_139 = arith.constant dense<0.000000e+00> : vector<16xf32>
    %262 = vector.multi_reduction <add>, %261, %cst_139 [0, 2] : vector<2x16x16xf32> to vector<16xf32>
    %263 = vector.shape_cast %262 : vector<16xf32> to vector<1x16x1xf32>
    %cst_140 = arith.constant 3.200000e+01 : f32
    %264 = vector.broadcast %cst_140 : f32 to vector<1x16x1xf32>
    %265 = arith.divf %263, %264 : vector<1x16x1xf32>
    %266 = vector.broadcast %258 : vector<1x16x1xf32> to vector<2x16x16xf32>
    %267 = arith.subf %254, %266 : vector<2x16x16xf32>
    %cst_141 = arith.constant 9.99999974E-6 : f32
    %268 = vector.broadcast %cst_141 : f32 to vector<1x16x1xf32>
    %269 = arith.addf %265, %268 : vector<1x16x1xf32>
    %270 = math.rsqrt %269 : vector<1x16x1xf32>
    %271 = vector.broadcast %270 : vector<1x16x1xf32> to vector<2x16x16xf32>
    %272 = arith.mulf %267, %271 : vector<2x16x16xf32>
    %273 = arith.truncf %272 : vector<2x16x16xf32> to vector<2x16x16xbf16>
    "tpu.trace_start"() <{level = 10 : i32, message = "bij,bjk->bik"}> : () -> ()
    %cst_142 = arith.constant dense<0.000000e+00> : vector<2x16x16xf32>
    %274 = tpu.matmul %37, %273, %cst_142 {dimension_numbers = #tpu.dot_dimension_numbers<[2], [1], [1], [2], [0, 0, 0, 1, 1, 2], [0], [0]>} : vector<2x16x16xbf16>, vector<2x16x16xbf16>, vector<2x16x16xf32> -> vector<2x16x16xf32>
    "tpu.trace_stop"() : () -> ()
    %275 = vector.shape_cast %274 : vector<2x16x16xf32> to vector<32x16xf32>
    %276 = arith.truncf %275 : vector<32x16xf32> to vector<32x16xbf16>
    %cst_143 = arith.constant dense<0.000000e+00> : vector<32x16xf32>
    %277 = tpu.matmul %276, %20, %cst_143 {dimension_numbers = #tpu.dot_dimension_numbers<[1], [0], [0], [1], [0, 0, 1, 1], [], []>} : vector<32x16xbf16>, vector<16x16xbf16>, vector<32x16xf32> -> vector<32x16xf32>
    %278 = vector.broadcast %21 : vector<1x16xf32> to vector<32x16xf32>
    %279 = arith.addf %277, %278 : vector<32x16xf32>
    %cst_144 = arith.constant 0.000000e+00 : f32
    %280 = vector.broadcast %cst_144 : f32 to vector<32x16xf32>
    %281 = arith.maximumf %279, %280 : vector<32x16xf32>
    %282 = arith.truncf %281 : vector<32x16xf32> to vector<32x16xbf16>
    %cst_145 = arith.constant dense<0.000000e+00> : vector<32x4xf32>
    %283 = tpu.matmul %282, %22, %cst_145 {dimension_numbers = #tpu.dot_dimension_numbers<[1], [0], [0], [1], [0, 0, 1, 1], [], []>} : vector<32x16xbf16>, vector<16x4xbf16>, vector<32x4xf32> -> vector<32x4xf32>
    %284 = vector.broadcast %23 : vector<1x4xf32> to vector<32x4xf32>
    %285 = arith.addf %283, %284 : vector<32x4xf32>
    %286 = vector.shape_cast %285 : vector<32x4xf32> to vector<2x16x4xf32>
    %cst_146 = arith.constant dense<0.000000e+00> : vector<16x4xf32>
    %287 = vector.multi_reduction <add>, %286, %cst_146 [0] : vector<2x16x4xf32> to vector<16x4xf32>
    %288 = vector.shape_cast %287 : vector<16x4xf32> to vector<1x16x4xf32>
    %cst_147 = arith.constant 2.000000e+00 : f32
    %289 = vector.broadcast %cst_147 : f32 to vector<1x16x4xf32>
    %290 = arith.divf %288, %289 : vector<1x16x4xf32>
    %291 = vector.broadcast %290 : vector<1x16x4xf32> to vector<2x16x4xf32>
    %292 = arith.subf %286, %291 : vector<2x16x4xf32>
    %293 = arith.mulf %292, %292 : vector<2x16x4xf32>
    %cst_148 = arith.constant dense<0.000000e+00> : vector<16x4xf32>
    %294 = vector.multi_reduction <add>, %293, %cst_148 [0] : vector<2x16x4xf32> to vector<16x4xf32>
    %295 = vector.shape_cast %294 : vector<16x4xf32> to vector<1x16x4xf32>
    %cst_149 = arith.constant 1.000000e+00 : f32
    %296 = vector.broadcast %cst_149 : f32 to vector<1x16x4xf32>
    %297 = arith.divf %295, %296 : vector<1x16x4xf32>
    %298 = vector.broadcast %290 : vector<1x16x4xf32> to vector<2x16x4xf32>
    %299 = arith.subf %286, %298 : vector<2x16x4xf32>
    %300 = math.sqrt %297 : vector<1x16x4xf32>
    %301 = vector.broadcast %300 : vector<1x16x4xf32> to vector<2x16x4xf32>
    %302 = arith.divf %299, %301 : vector<2x16x4xf32>
    %303 = vector.broadcast %38 : vector<2x16x1xf32> to vector<2x16x16xf32>
    %304 = arith.mulf %222, %303 : vector<2x16x16xf32>
    %305 = vector.broadcast %38 : vector<2x16x1xf32> to vector<2x16x16xf32>
    %306 = arith.mulf %272, %305 : vector<2x16x16xf32>
    %307 = vector.broadcast %38 : vector<2x16x1xf32> to vector<2x16x4xf32>
    %308 = arith.mulf %302, %307 : vector<2x16x4xf32>
    %cst_150 = arith.constant dense<0xFF800000> : vector<2x16xf32>
    %309 = vector.multi_reduction <maximumf>, %170, %cst_150 [1] : vector<2x16x16xf32> to vector<2x16xf32>
    %cst_151 = arith.constant dense<0xFF800000> : vector<2x16xf32>
    %310 = vector.multi_reduction <maximumf>, %172, %cst_151 [1] : vector<2x16x16xf32> to vector<2x16xf32>
    %cst_152 = arith.constant dense<0xFF800000> : vector<2x24xf32>
    %311 = vector.multi_reduction <maximumf>, %174, %cst_152 [1] : vector<2x16x24xf32> to vector<2x24xf32>
    %cst_153 = arith.constant 0.000000e+00 : f32
    %312 = vector.broadcast %cst_153 : f32 to vector<32x4xf32>
    %313 = vector.shape_cast %304 : vector<2x16x16xf32> to vector<32x16xf32>
    %c0_154 = arith.constant 0 : index
    %c0_155 = arith.constant 0 : index
    %314 = vector.load %arg39[%c0_154, %c0_155] : memref<36x4xf32, #tpu.memory_space<vmem>>, vector<16x4xf32>
    %cst_156 = arith.constant dense<0.000000e+00> : vector<32x4xf32>
    %315 = tpu.matmul %313, %314, %cst_156 {dimension_numbers = #tpu.dot_dimension_numbers<[1], [0], [0], [1], [0, 0, 1, 1], [], []>} : vector<32x16xf32>, vector<16x4xf32>, vector<32x4xf32> -> vector<32x4xf32>
    %316 = arith.addf %312, %315 : vector<32x4xf32>
    %317 = vector.shape_cast %306 : vector<2x16x16xf32> to vector<32x16xf32>
    %c16 = arith.constant 16 : index
    %c0_157 = arith.constant 0 : index
    %318 = vector.load %arg39[%c16, %c0_157] : memref<36x4xf32, #tpu.memory_space<vmem>>, vector<16x4xf32>
    %cst_158 = arith.constant dense<0.000000e+00> : vector<32x4xf32>
    %319 = tpu.matmul %317, %318, %cst_158 {dimension_numbers = #tpu.dot_dimension_numbers<[1], [0], [0], [1], [0, 0, 1, 1], [], []>} : vector<32x16xf32>, vector<16x4xf32>, vector<32x4xf32> -> vector<32x4xf32>
    %320 = arith.addf %316, %319 : vector<32x4xf32>
    %321 = vector.shape_cast %308 : vector<2x16x4xf32> to vector<32x4xf32>
    %c32 = arith.constant 32 : index
    %c0_159 = arith.constant 0 : index
    %322 = vector.load %arg39[%c32, %c0_159] : memref<36x4xf32, #tpu.memory_space<vmem>>, vector<4x4xf32>
    %cst_160 = arith.constant dense<0.000000e+00> : vector<32x4xf32>
    %323 = tpu.matmul %321, %322, %cst_160 {dimension_numbers = #tpu.dot_dimension_numbers<[1], [0], [0], [1], [0, 0, 1, 1], [], []>} : vector<32x4xf32>, vector<4x4xf32>, vector<32x4xf32> -> vector<32x4xf32>
    %324 = arith.addf %320, %323 : vector<32x4xf32>
    %c0_161 = arith.constant 0 : index
    %c0_162 = arith.constant 0 : index
    %325 = vector.load %arg40[%c0_161, %c0_162] : memref<1x4xf32, #tpu.memory_space<vmem>>, vector<1x4xf32>
    %326 = vector.broadcast %325 : vector<1x4xf32> to vector<32x4xf32>
    %327 = arith.addf %324, %326 : vector<32x4xf32>
    %328 = vector.shape_cast %327 : vector<32x4xf32> to vector<2x16x4xf32>
    %cst_163 = arith.constant dense<0xFF800000> : vector<2x16xf32>
    %329 = vector.multi_reduction <maximumf>, %328, %cst_163 [2] : vector<2x16x4xf32> to vector<2x16xf32>
    %330 = vector.shape_cast %329 : vector<2x16xf32> to vector<2x16x1xf32>
    %331 = vector.broadcast %330 : vector<2x16x1xf32> to vector<2x16x4xf32>
    %332 = arith.subf %328, %331 : vector<2x16x4xf32>
    %333 = math.exp %332 : vector<2x16x4xf32>
    %cst_164 = arith.constant dense<0.000000e+00> : vector<2x16xf32>
    %334 = vector.multi_reduction <add>, %333, %cst_164 [2] : vector<2x16x4xf32> to vector<2x16xf32>
    %335 = vector.shape_cast %334 : vector<2x16xf32> to vector<2x16x1xf32>
    %336 = vector.broadcast %335 : vector<2x16x1xf32> to vector<2x16x4xf32>
    %337 = arith.divf %333, %336 : vector<2x16x4xf32>
    %338 = vector.broadcast %38 : vector<2x16x1xf32> to vector<2x16x4xf32>
    %339 = arith.mulf %337, %338 : vector<2x16x4xf32>
    %340 = tpu.transpose %339, [0, 2, 1] : vector<2x16x4xf32> -> vector<2x4x16xf32>
    %341 = arith.truncf %340 : vector<2x4x16xf32> to vector<2x4x16xbf16>
    %342 = arith.truncf %170 : vector<2x16x16xf32> to vector<2x16x16xbf16>
    "tpu.trace_start"() <{level = 10 : i32, message = "bij,bjk->bik"}> : () -> ()
    %cst_165 = arith.constant dense<0.000000e+00> : vector<2x4x16xf32>
    %343 = tpu.matmul %341, %342, %cst_165 {dimension_numbers = #tpu.dot_dimension_numbers<[2], [1], [1], [2], [0, 0, 0, 1, 1, 2], [0], [0]>} : vector<2x4x16xbf16>, vector<2x16x16xbf16>, vector<2x4x16xf32> -> vector<2x4x16xf32>
    "tpu.trace_stop"() : () -> ()
    %344 = arith.truncf %340 : vector<2x4x16xf32> to vector<2x4x16xbf16>
    %345 = arith.truncf %172 : vector<2x16x16xf32> to vector<2x16x16xbf16>
    "tpu.trace_start"() <{level = 10 : i32, message = "bij,bjk->bik"}> : () -> ()
    %cst_166 = arith.constant dense<0.000000e+00> : vector<2x4x16xf32>
    %346 = tpu.matmul %344, %345, %cst_166 {dimension_numbers = #tpu.dot_dimension_numbers<[2], [1], [1], [2], [0, 0, 0, 1, 1, 2], [0], [0]>} : vector<2x4x16xbf16>, vector<2x16x16xbf16>, vector<2x4x16xf32> -> vector<2x4x16xf32>
    "tpu.trace_stop"() : () -> ()
    %347 = arith.truncf %340 : vector<2x4x16xf32> to vector<2x4x16xbf16>
    %348 = arith.truncf %174 : vector<2x16x24xf32> to vector<2x16x24xbf16>
    "tpu.trace_start"() <{level = 10 : i32, message = "bij,bjk->bik"}> : () -> ()
    %cst_167 = arith.constant dense<0.000000e+00> : vector<2x4x24xf32>
    %349 = tpu.matmul %347, %348, %cst_167 {dimension_numbers = #tpu.dot_dimension_numbers<[2], [1], [1], [2], [0, 0, 0, 1, 1, 2], [0], [0]>} : vector<2x4x16xbf16>, vector<2x16x24xbf16>, vector<2x4x24xf32> -> vector<2x4x24xf32>
    "tpu.trace_stop"() : () -> ()
    %350 = arith.truncf %340 : vector<2x4x16xf32> to vector<2x4x16xbf16>
    "tpu.trace_start"() <{level = 10 : i32, message = "bij,bjk->bik"}> : () -> ()
    %cst_168 = arith.constant dense<0.000000e+00> : vector<2x4x16xf32>
    %351 = tpu.matmul %350, %37, %cst_168 {dimension_numbers = #tpu.dot_dimension_numbers<[2], [1], [1], [2], [0, 0, 0, 1, 1, 2], [0], [0]>} : vector<2x4x16xbf16>, vector<2x16x16xbf16>, vector<2x4x16xf32> -> vector<2x4x16xf32>
    "tpu.trace_stop"() : () -> ()
    %352 = arith.truncf %351 : vector<2x4x16xf32> to vector<2x4x16xbf16>
    %353 = arith.truncf %339 : vector<2x16x4xf32> to vector<2x16x4xbf16>
    "tpu.trace_start"() <{level = 10 : i32, message = "bij,bjk->bik"}> : () -> ()
    %cst_169 = arith.constant dense<0.000000e+00> : vector<2x4x4xf32>
    %354 = tpu.matmul %352, %353, %cst_169 {dimension_numbers = #tpu.dot_dimension_numbers<[2], [1], [1], [2], [0, 0, 0, 1, 1, 2], [0], [0]>} : vector<2x4x16xbf16>, vector<2x16x4xbf16>, vector<2x4x4xf32> -> vector<2x4x4xf32>
    "tpu.trace_stop"() : () -> ()
    %355 = arith.truncf %354 : vector<2x4x4xf32> to vector<2x4x4xbf16>
    %356 = arith.truncf %343 : vector<2x4x16xf32> to vector<2x4x16xbf16>
    "tpu.trace_start"() <{level = 10 : i32, message = "bij,bjk->bik"}> : () -> ()
    %cst_170 = arith.constant dense<0.000000e+00> : vector<2x4x16xf32>
    %357 = tpu.matmul %355, %356, %cst_170 {dimension_numbers = #tpu.dot_dimension_numbers<[2], [1], [1], [2], [0, 0, 0, 1, 1, 2], [0], [0]>} : vector<2x4x4xbf16>, vector<2x4x16xbf16>, vector<2x4x16xf32> -> vector<2x4x16xf32>
    "tpu.trace_stop"() : () -> ()
    %358 = vector.extract_strided_slice %24 {offsets = [0, 0], sizes = [16, 16], strides = [1, 1]} : vector<56x16xbf16> to vector<16x16xbf16>
    %359 = vector.shape_cast %358 : vector<16x16xbf16> to vector<1x16x16xbf16>
    %360 = vector.broadcast %359 : vector<1x16x16xbf16> to vector<2x16x16xbf16>
    %361 = arith.truncf %357 : vector<2x4x16xf32> to vector<2x4x16xbf16>
    "tpu.trace_start"() <{level = 10 : i32, message = "bmd,bdh->bmh"}> : () -> ()
    %cst_171 = arith.constant dense<0.000000e+00> : vector<2x4x16xf32>
    %362 = tpu.matmul %361, %360, %cst_171 {dimension_numbers = #tpu.dot_dimension_numbers<[2], [1], [1], [2], [0, 0, 0, 1, 1, 2], [0], [0]>} : vector<2x4x16xbf16>, vector<2x16x16xbf16>, vector<2x4x16xf32> -> vector<2x4x16xf32>
    "tpu.trace_stop"() : () -> ()
    %363 = arith.truncf %354 : vector<2x4x4xf32> to vector<2x4x4xbf16>
    %364 = arith.truncf %346 : vector<2x4x16xf32> to vector<2x4x16xbf16>
    "tpu.trace_start"() <{level = 10 : i32, message = "bij,bjk->bik"}> : () -> ()
    %cst_172 = arith.constant dense<0.000000e+00> : vector<2x4x16xf32>
    %365 = tpu.matmul %363, %364, %cst_172 {dimension_numbers = #tpu.dot_dimension_numbers<[2], [1], [1], [2], [0, 0, 0, 1, 1, 2], [0], [0]>} : vector<2x4x4xbf16>, vector<2x4x16xbf16>, vector<2x4x16xf32> -> vector<2x4x16xf32>
    "tpu.trace_stop"() : () -> ()
    %366 = vector.extract_strided_slice %24 {offsets = [16, 0], sizes = [16, 16], strides = [1, 1]} : vector<56x16xbf16> to vector<16x16xbf16>
    %367 = vector.shape_cast %366 : vector<16x16xbf16> to vector<1x16x16xbf16>
    %368 = vector.broadcast %367 : vector<1x16x16xbf16> to vector<2x16x16xbf16>
    %369 = arith.truncf %365 : vector<2x4x16xf32> to vector<2x4x16xbf16>
    "tpu.trace_start"() <{level = 10 : i32, message = "bmd,bdh->bmh"}> : () -> ()
    %cst_173 = arith.constant dense<0.000000e+00> : vector<2x4x16xf32>
    %370 = tpu.matmul %369, %368, %cst_173 {dimension_numbers = #tpu.dot_dimension_numbers<[2], [1], [1], [2], [0, 0, 0, 1, 1, 2], [0], [0]>} : vector<2x4x16xbf16>, vector<2x16x16xbf16>, vector<2x4x16xf32> -> vector<2x4x16xf32>
    "tpu.trace_stop"() : () -> ()
    %371 = arith.addf %362, %370 : vector<2x4x16xf32>
    %372 = arith.truncf %354 : vector<2x4x4xf32> to vector<2x4x4xbf16>
    %373 = arith.truncf %349 : vector<2x4x24xf32> to vector<2x4x24xbf16>
    "tpu.trace_start"() <{level = 10 : i32, message = "bij,bjk->bik"}> : () -> ()
    %cst_174 = arith.constant dense<0.000000e+00> : vector<2x4x24xf32>
    %374 = tpu.matmul %372, %373, %cst_174 {dimension_numbers = #tpu.dot_dimension_numbers<[2], [1], [1], [2], [0, 0, 0, 1, 1, 2], [0], [0]>} : vector<2x4x4xbf16>, vector<2x4x24xbf16>, vector<2x4x24xf32> -> vector<2x4x24xf32>
    "tpu.trace_stop"() : () -> ()
    %375 = vector.extract_strided_slice %24 {offsets = [32, 0], sizes = [24, 16], strides = [1, 1]} : vector<56x16xbf16> to vector<24x16xbf16>
    %376 = vector.shape_cast %375 : vector<24x16xbf16> to vector<1x24x16xbf16>
    %377 = vector.broadcast %376 : vector<1x24x16xbf16> to vector<2x24x16xbf16>
    %378 = arith.truncf %374 : vector<2x4x24xf32> to vector<2x4x24xbf16>
    "tpu.trace_start"() <{level = 10 : i32, message = "bmd,bdh->bmh"}> : () -> ()
    %cst_175 = arith.constant dense<0.000000e+00> : vector<2x4x16xf32>
    %379 = tpu.matmul %378, %377, %cst_175 {dimension_numbers = #tpu.dot_dimension_numbers<[2], [1], [1], [2], [0, 0, 0, 1, 1, 2], [0], [0]>} : vector<2x4x24xbf16>, vector<2x24x16xbf16>, vector<2x4x16xf32> -> vector<2x4x16xf32>
    "tpu.trace_stop"() : () -> ()
    %380 = arith.addf %371, %379 : vector<2x4x16xf32>
    %381 = vector.shape_cast %25 : vector<1x16xf32> to vector<1x1x16xf32>
    %382 = vector.broadcast %381 : vector<1x1x16xf32> to vector<2x4x16xf32>
    %383 = arith.addf %380, %382 : vector<2x4x16xf32>
    %cst_176 = arith.constant 0.000000e+00 : f32
    %384 = vector.broadcast %cst_176 : f32 to vector<2x4x16xf32>
    %385 = arith.maximumf %383, %384 : vector<2x4x16xf32>
    %386 = vector.shape_cast %26 : vector<16x16xbf16> to vector<1x16x16xbf16>
    %387 = vector.broadcast %386 : vector<1x16x16xbf16> to vector<2x16x16xbf16>
    %388 = arith.truncf %385 : vector<2x4x16xf32> to vector<2x4x16xbf16>
    "tpu.trace_start"() <{level = 10 : i32, message = "bmd,bdh->bmh"}> : () -> ()
    %cst_177 = arith.constant dense<0.000000e+00> : vector<2x4x16xf32>
    %389 = tpu.matmul %388, %387, %cst_177 {dimension_numbers = #tpu.dot_dimension_numbers<[2], [1], [1], [2], [0, 0, 0, 1, 1, 2], [0], [0]>} : vector<2x4x16xbf16>, vector<2x16x16xbf16>, vector<2x4x16xf32> -> vector<2x4x16xf32>
    "tpu.trace_stop"() : () -> ()
    %390 = vector.shape_cast %27 : vector<1x16xf32> to vector<1x1x16xf32>
    %391 = vector.broadcast %390 : vector<1x1x16xf32> to vector<2x4x16xf32>
    %392 = arith.addf %389, %391 : vector<2x4x16xf32>
    %cst_178 = arith.constant dense<0.000000e+00> : vector<4x16xf32>
    %393 = vector.multi_reduction <add>, %392, %cst_178 [0] : vector<2x4x16xf32> to vector<4x16xf32>
    %394 = vector.shape_cast %393 : vector<4x16xf32> to vector<1x4x16xf32>
    %cst_179 = arith.constant 2.000000e+00 : f32
    %395 = vector.broadcast %cst_179 : f32 to vector<1x4x16xf32>
    %396 = arith.divf %394, %395 : vector<1x4x16xf32>
    %397 = vector.broadcast %396 : vector<1x4x16xf32> to vector<2x4x16xf32>
    %398 = arith.subf %392, %397 : vector<2x4x16xf32>
    %399 = arith.mulf %398, %398 : vector<2x4x16xf32>
    %cst_180 = arith.constant dense<0.000000e+00> : vector<4x16xf32>
    %400 = vector.multi_reduction <add>, %399, %cst_180 [0] : vector<2x4x16xf32> to vector<4x16xf32>
    %401 = vector.shape_cast %400 : vector<4x16xf32> to vector<1x4x16xf32>
    %cst_181 = arith.constant 1.000000e+00 : f32
    %402 = vector.broadcast %cst_181 : f32 to vector<1x4x16xf32>
    %403 = arith.divf %401, %402 : vector<1x4x16xf32>
    %404 = vector.broadcast %396 : vector<1x4x16xf32> to vector<2x4x16xf32>
    %405 = arith.subf %392, %404 : vector<2x4x16xf32>
    %406 = math.sqrt %403 : vector<1x4x16xf32>
    %407 = vector.broadcast %406 : vector<1x4x16xf32> to vector<2x4x16xf32>
    %408 = arith.divf %405, %407 : vector<2x4x16xf32>
    %cst_182 = arith.constant 0.000000e+00 : f32
    %409 = vector.broadcast %cst_182 : f32 to vector<2x4x16xf32>
    %410 = arith.maximumf %408, %409 : vector<2x4x16xf32>
    %cst_183 = arith.constant dense<0.000000e+00> : vector<4xf32>
    %411 = vector.multi_reduction <add>, %410, %cst_183 [0, 2] : vector<2x4x16xf32> to vector<4xf32>
    %412 = vector.shape_cast %411 : vector<4xf32> to vector<1x4x1xf32>
    %cst_184 = arith.constant 3.200000e+01 : f32
    %413 = vector.broadcast %cst_184 : f32 to vector<1x4x1xf32>
    %414 = arith.divf %412, %413 : vector<1x4x1xf32>
    %415 = vector.broadcast %414 : vector<1x4x1xf32> to vector<2x4x16xf32>
    %416 = arith.subf %410, %415 : vector<2x4x16xf32>
    %417 = arith.mulf %416, %416 : vector<2x4x16xf32>
    %cst_185 = arith.constant dense<0.000000e+00> : vector<4xf32>
    %418 = vector.multi_reduction <add>, %417, %cst_185 [0, 2] : vector<2x4x16xf32> to vector<4xf32>
    %419 = vector.shape_cast %418 : vector<4xf32> to vector<1x4x1xf32>
    %cst_186 = arith.constant 3.200000e+01 : f32
    %420 = vector.broadcast %cst_186 : f32 to vector<1x4x1xf32>
    %421 = arith.divf %419, %420 : vector<1x4x1xf32>
    %422 = vector.broadcast %414 : vector<1x4x1xf32> to vector<2x4x16xf32>
    %423 = arith.subf %410, %422 : vector<2x4x16xf32>
    %cst_187 = arith.constant 9.99999974E-6 : f32
    %424 = vector.broadcast %cst_187 : f32 to vector<1x4x1xf32>
    %425 = arith.addf %421, %424 : vector<1x4x1xf32>
    %426 = math.rsqrt %425 : vector<1x4x1xf32>
    %427 = vector.broadcast %426 : vector<1x4x1xf32> to vector<2x4x16xf32>
    %428 = arith.mulf %423, %427 : vector<2x4x16xf32>
    %429 = arith.truncf %354 : vector<2x4x4xf32> to vector<2x4x4xbf16>
    %430 = arith.truncf %428 : vector<2x4x16xf32> to vector<2x4x16xbf16>
    "tpu.trace_start"() <{level = 10 : i32, message = "bij,bjk->bik"}> : () -> ()
    %cst_188 = arith.constant dense<0.000000e+00> : vector<2x4x16xf32>
    %431 = tpu.matmul %429, %430, %cst_188 {dimension_numbers = #tpu.dot_dimension_numbers<[2], [1], [1], [2], [0, 0, 0, 1, 1, 2], [0], [0]>} : vector<2x4x4xbf16>, vector<2x4x16xbf16>, vector<2x4x16xf32> -> vector<2x4x16xf32>
    "tpu.trace_stop"() : () -> ()
    %432 = vector.shape_cast %28 : vector<16x16xbf16> to vector<1x16x16xbf16>
    %433 = vector.broadcast %432 : vector<1x16x16xbf16> to vector<2x16x16xbf16>
    %434 = arith.truncf %431 : vector<2x4x16xf32> to vector<2x4x16xbf16>
    "tpu.trace_start"() <{level = 10 : i32, message = "bmd,bdh->bmh"}> : () -> ()
    %cst_189 = arith.constant dense<0.000000e+00> : vector<2x4x16xf32>
    %435 = tpu.matmul %434, %433, %cst_189 {dimension_numbers = #tpu.dot_dimension_numbers<[2], [1], [1], [2], [0, 0, 0, 1, 1, 2], [0], [0]>} : vector<2x4x16xbf16>, vector<2x16x16xbf16>, vector<2x4x16xf32> -> vector<2x4x16xf32>
    "tpu.trace_stop"() : () -> ()
    %436 = vector.shape_cast %29 : vector<1x16xf32> to vector<1x1x16xf32>
    %437 = vector.broadcast %436 : vector<1x1x16xf32> to vector<2x4x16xf32>
    %438 = arith.addf %435, %437 : vector<2x4x16xf32>
    %cst_190 = arith.constant 0.000000e+00 : f32
    %439 = vector.broadcast %cst_190 : f32 to vector<2x4x16xf32>
    %440 = arith.maximumf %438, %439 : vector<2x4x16xf32>
    %441 = vector.shape_cast %30 : vector<16x16xbf16> to vector<1x16x16xbf16>
    %442 = vector.broadcast %441 : vector<1x16x16xbf16> to vector<2x16x16xbf16>
    %443 = arith.truncf %440 : vector<2x4x16xf32> to vector<2x4x16xbf16>
    "tpu.trace_start"() <{level = 10 : i32, message = "bmd,bdh->bmh"}> : () -> ()
    %cst_191 = arith.constant dense<0.000000e+00> : vector<2x4x16xf32>
    %444 = tpu.matmul %443, %442, %cst_191 {dimension_numbers = #tpu.dot_dimension_numbers<[2], [1], [1], [2], [0, 0, 0, 1, 1, 2], [0], [0]>} : vector<2x4x16xbf16>, vector<2x16x16xbf16>, vector<2x4x16xf32> -> vector<2x4x16xf32>
    "tpu.trace_stop"() : () -> ()
    %445 = vector.shape_cast %31 : vector<1x16xf32> to vector<1x1x16xf32>
    %446 = vector.broadcast %445 : vector<1x1x16xf32> to vector<2x4x16xf32>
    %447 = arith.addf %444, %446 : vector<2x4x16xf32>
    %cst_192 = arith.constant dense<0.000000e+00> : vector<4x16xf32>
    %448 = vector.multi_reduction <add>, %447, %cst_192 [0] : vector<2x4x16xf32> to vector<4x16xf32>
    %449 = vector.shape_cast %448 : vector<4x16xf32> to vector<1x4x16xf32>
    %cst_193 = arith.constant 2.000000e+00 : f32
    %450 = vector.broadcast %cst_193 : f32 to vector<1x4x16xf32>
    %451 = arith.divf %449, %450 : vector<1x4x16xf32>
    %452 = vector.broadcast %451 : vector<1x4x16xf32> to vector<2x4x16xf32>
    %453 = arith.subf %447, %452 : vector<2x4x16xf32>
    %454 = arith.mulf %453, %453 : vector<2x4x16xf32>
    %cst_194 = arith.constant dense<0.000000e+00> : vector<4x16xf32>
    %455 = vector.multi_reduction <add>, %454, %cst_194 [0] : vector<2x4x16xf32> to vector<4x16xf32>
    %456 = vector.shape_cast %455 : vector<4x16xf32> to vector<1x4x16xf32>
    %cst_195 = arith.constant 1.000000e+00 : f32
    %457 = vector.broadcast %cst_195 : f32 to vector<1x4x16xf32>
    %458 = arith.divf %456, %457 : vector<1x4x16xf32>
    %459 = vector.broadcast %451 : vector<1x4x16xf32> to vector<2x4x16xf32>
    %460 = arith.subf %447, %459 : vector<2x4x16xf32>
    %461 = math.sqrt %458 : vector<1x4x16xf32>
    %462 = vector.broadcast %461 : vector<1x4x16xf32> to vector<2x4x16xf32>
    %463 = arith.divf %460, %462 : vector<2x4x16xf32>
    %cst_196 = arith.constant 0.000000e+00 : f32
    %464 = vector.broadcast %cst_196 : f32 to vector<2x4x16xf32>
    %465 = arith.maximumf %463, %464 : vector<2x4x16xf32>
    %cst_197 = arith.constant dense<0.000000e+00> : vector<4xf32>
    %466 = vector.multi_reduction <add>, %465, %cst_197 [0, 2] : vector<2x4x16xf32> to vector<4xf32>
    %467 = vector.shape_cast %466 : vector<4xf32> to vector<1x4x1xf32>
    %cst_198 = arith.constant 3.200000e+01 : f32
    %468 = vector.broadcast %cst_198 : f32 to vector<1x4x1xf32>
    %469 = arith.divf %467, %468 : vector<1x4x1xf32>
    %470 = vector.broadcast %469 : vector<1x4x1xf32> to vector<2x4x16xf32>
    %471 = arith.subf %465, %470 : vector<2x4x16xf32>
    %472 = arith.mulf %471, %471 : vector<2x4x16xf32>
    %cst_199 = arith.constant dense<0.000000e+00> : vector<4xf32>
    %473 = vector.multi_reduction <add>, %472, %cst_199 [0, 2] : vector<2x4x16xf32> to vector<4xf32>
    %474 = vector.shape_cast %473 : vector<4xf32> to vector<1x4x1xf32>
    %cst_200 = arith.constant 3.200000e+01 : f32
    %475 = vector.broadcast %cst_200 : f32 to vector<1x4x1xf32>
    %476 = arith.divf %474, %475 : vector<1x4x1xf32>
    %477 = vector.broadcast %469 : vector<1x4x1xf32> to vector<2x4x16xf32>
    %478 = arith.subf %465, %477 : vector<2x4x16xf32>
    %cst_201 = arith.constant 9.99999974E-6 : f32
    %479 = vector.broadcast %cst_201 : f32 to vector<1x4x1xf32>
    %480 = arith.addf %476, %479 : vector<1x4x1xf32>
    %481 = math.rsqrt %480 : vector<1x4x1xf32>
    %482 = vector.broadcast %481 : vector<1x4x1xf32> to vector<2x4x16xf32>
    %483 = arith.mulf %478, %482 : vector<2x4x16xf32>
    %484 = arith.truncf %354 : vector<2x4x4xf32> to vector<2x4x4xbf16>
    %485 = arith.truncf %483 : vector<2x4x16xf32> to vector<2x4x16xbf16>
    "tpu.trace_start"() <{level = 10 : i32, message = "bij,bjk->bik"}> : () -> ()
    %cst_202 = arith.constant dense<0.000000e+00> : vector<2x4x16xf32>
    %486 = tpu.matmul %484, %485, %cst_202 {dimension_numbers = #tpu.dot_dimension_numbers<[2], [1], [1], [2], [0, 0, 0, 1, 1, 2], [0], [0]>} : vector<2x4x4xbf16>, vector<2x4x16xbf16>, vector<2x4x16xf32> -> vector<2x4x16xf32>
    "tpu.trace_stop"() : () -> ()
    %487 = vector.shape_cast %32 : vector<16x16xbf16> to vector<1x16x16xbf16>
    %488 = vector.broadcast %487 : vector<1x16x16xbf16> to vector<2x16x16xbf16>
    %489 = arith.truncf %486 : vector<2x4x16xf32> to vector<2x4x16xbf16>
    "tpu.trace_start"() <{level = 10 : i32, message = "bmd,bdh->bmh"}> : () -> ()
    %cst_203 = arith.constant dense<0.000000e+00> : vector<2x4x16xf32>
    %490 = tpu.matmul %489, %488, %cst_203 {dimension_numbers = #tpu.dot_dimension_numbers<[2], [1], [1], [2], [0, 0, 0, 1, 1, 2], [0], [0]>} : vector<2x4x16xbf16>, vector<2x16x16xbf16>, vector<2x4x16xf32> -> vector<2x4x16xf32>
    "tpu.trace_stop"() : () -> ()
    %491 = vector.shape_cast %33 : vector<1x16xf32> to vector<1x1x16xf32>
    %492 = vector.broadcast %491 : vector<1x1x16xf32> to vector<2x4x16xf32>
    %493 = arith.addf %490, %492 : vector<2x4x16xf32>
    %cst_204 = arith.constant 0.000000e+00 : f32
    %494 = vector.broadcast %cst_204 : f32 to vector<2x4x16xf32>
    %495 = arith.maximumf %493, %494 : vector<2x4x16xf32>
    %496 = vector.shape_cast %34 : vector<16x24xbf16> to vector<1x16x24xbf16>
    %497 = vector.broadcast %496 : vector<1x16x24xbf16> to vector<2x16x24xbf16>
    %498 = arith.truncf %495 : vector<2x4x16xf32> to vector<2x4x16xbf16>
    "tpu.trace_start"() <{level = 10 : i32, message = "bmd,bdh->bmh"}> : () -> ()
    %cst_205 = arith.constant dense<0.000000e+00> : vector<2x4x24xf32>
    %499 = tpu.matmul %498, %497, %cst_205 {dimension_numbers = #tpu.dot_dimension_numbers<[2], [1], [1], [2], [0, 0, 0, 1, 1, 2], [0], [0]>} : vector<2x4x16xbf16>, vector<2x16x24xbf16>, vector<2x4x24xf32> -> vector<2x4x24xf32>
    "tpu.trace_stop"() : () -> ()
    %500 = vector.shape_cast %35 : vector<1x24xf32> to vector<1x1x24xf32>
    %501 = vector.broadcast %500 : vector<1x1x24xf32> to vector<2x4x24xf32>
    %502 = arith.addf %499, %501 : vector<2x4x24xf32>
    %cst_206 = arith.constant dense<0.000000e+00> : vector<4x24xf32>
    %503 = vector.multi_reduction <add>, %502, %cst_206 [0] : vector<2x4x24xf32> to vector<4x24xf32>
    %504 = vector.shape_cast %503 : vector<4x24xf32> to vector<1x4x24xf32>
    %cst_207 = arith.constant 2.000000e+00 : f32
    %505 = vector.broadcast %cst_207 : f32 to vector<1x4x24xf32>
    %506 = arith.divf %504, %505 : vector<1x4x24xf32>
    %507 = vector.broadcast %506 : vector<1x4x24xf32> to vector<2x4x24xf32>
    %508 = arith.subf %502, %507 : vector<2x4x24xf32>
    %509 = arith.mulf %508, %508 : vector<2x4x24xf32>
    %cst_208 = arith.constant dense<0.000000e+00> : vector<4x24xf32>
    %510 = vector.multi_reduction <add>, %509, %cst_208 [0] : vector<2x4x24xf32> to vector<4x24xf32>
    %511 = vector.shape_cast %510 : vector<4x24xf32> to vector<1x4x24xf32>
    %cst_209 = arith.constant 1.000000e+00 : f32
    %512 = vector.broadcast %cst_209 : f32 to vector<1x4x24xf32>
    %513 = arith.divf %511, %512 : vector<1x4x24xf32>
    %514 = vector.broadcast %506 : vector<1x4x24xf32> to vector<2x4x24xf32>
    %515 = arith.subf %502, %514 : vector<2x4x24xf32>
    %516 = math.sqrt %513 : vector<1x4x24xf32>
    %517 = vector.broadcast %516 : vector<1x4x24xf32> to vector<2x4x24xf32>
    %518 = arith.divf %515, %517 : vector<2x4x24xf32>
    %cst_210 = arith.constant dense<0xFF800000> : vector<2x16xf32>
    %519 = vector.multi_reduction <maximumf>, %428, %cst_210 [1] : vector<2x4x16xf32> to vector<2x16xf32>
    %cst_211 = arith.constant dense<0xFF800000> : vector<2x16xf32>
    %520 = vector.multi_reduction <maximumf>, %483, %cst_211 [1] : vector<2x4x16xf32> to vector<2x16xf32>
    %cst_212 = arith.constant dense<0xFF800000> : vector<2x24xf32>
    %521 = vector.multi_reduction <maximumf>, %518, %cst_212 [1] : vector<2x4x24xf32> to vector<2x24xf32>
    %cst_213 = arith.constant 0.000000e+00 : f32
    %522 = vector.broadcast %cst_213 : f32 to vector<2x50xf32>
    %c0_214 = arith.constant 0 : index
    %c0_215 = arith.constant 0 : index
    %523 = vector.load %arg41[%c0_214, %c0_215] : memref<112x50xf32, #tpu.memory_space<vmem>>, vector<16x50xf32>
    %cst_216 = arith.constant dense<0.000000e+00> : vector<2x50xf32>
    %524 = tpu.matmul %309, %523, %cst_216 {dimension_numbers = #tpu.dot_dimension_numbers<[1], [0], [0], [1], [0, 0, 1, 1], [], []>} : vector<2x16xf32>, vector<16x50xf32>, vector<2x50xf32> -> vector<2x50xf32>
    %525 = arith.addf %522, %524 : vector<2x50xf32>
    %c16_217 = arith.constant 16 : index
    %c0_218 = arith.constant 0 : index
    %526 = vector.load %arg41[%c16_217, %c0_218] : memref<112x50xf32, #tpu.memory_space<vmem>>, vector<16x50xf32>
    %cst_219 = arith.constant dense<0.000000e+00> : vector<2x50xf32>
    %527 = tpu.matmul %310, %526, %cst_219 {dimension_numbers = #tpu.dot_dimension_numbers<[1], [0], [0], [1], [0, 0, 1, 1], [], []>} : vector<2x16xf32>, vector<16x50xf32>, vector<2x50xf32> -> vector<2x50xf32>
    %528 = arith.addf %525, %527 : vector<2x50xf32>
    %c32_220 = arith.constant 32 : index
    %c0_221 = arith.constant 0 : index
    %529 = vector.load %arg41[%c32_220, %c0_221] : memref<112x50xf32, #tpu.memory_space<vmem>>, vector<24x50xf32>
    %cst_222 = arith.constant dense<0.000000e+00> : vector<2x50xf32>
    %530 = tpu.matmul %311, %529, %cst_222 {dimension_numbers = #tpu.dot_dimension_numbers<[1], [0], [0], [1], [0, 0, 1, 1], [], []>} : vector<2x24xf32>, vector<24x50xf32>, vector<2x50xf32> -> vector<2x50xf32>
    %531 = arith.addf %528, %530 : vector<2x50xf32>
    %c56 = arith.constant 56 : index
    %c0_223 = arith.constant 0 : index
    %532 = vector.load %arg41[%c56, %c0_223] : memref<112x50xf32, #tpu.memory_space<vmem>>, vector<16x50xf32>
    %cst_224 = arith.constant dense<0.000000e+00> : vector<2x50xf32>
    %533 = tpu.matmul %519, %532, %cst_224 {dimension_numbers = #tpu.dot_dimension_numbers<[1], [0], [0], [1], [0, 0, 1, 1], [], []>} : vector<2x16xf32>, vector<16x50xf32>, vector<2x50xf32> -> vector<2x50xf32>
    %534 = arith.addf %531, %533 : vector<2x50xf32>
    %c72 = arith.constant 72 : index
    %c0_225 = arith.constant 0 : index
    %535 = vector.load %arg41[%c72, %c0_225] : memref<112x50xf32, #tpu.memory_space<vmem>>, vector<16x50xf32>
    %cst_226 = arith.constant dense<0.000000e+00> : vector<2x50xf32>
    %536 = tpu.matmul %520, %535, %cst_226 {dimension_numbers = #tpu.dot_dimension_numbers<[1], [0], [0], [1], [0, 0, 1, 1], [], []>} : vector<2x16xf32>, vector<16x50xf32>, vector<2x50xf32> -> vector<2x50xf32>
    %537 = arith.addf %534, %536 : vector<2x50xf32>
    %c88 = arith.constant 88 : index
    %c0_227 = arith.constant 0 : index
    %538 = vector.load %arg41[%c88, %c0_227] : memref<112x50xf32, #tpu.memory_space<vmem>>, vector<24x50xf32>
    %cst_228 = arith.constant dense<0.000000e+00> : vector<2x50xf32>
    %539 = tpu.matmul %521, %538, %cst_228 {dimension_numbers = #tpu.dot_dimension_numbers<[1], [0], [0], [1], [0, 0, 1, 1], [], []>} : vector<2x24xf32>, vector<24x50xf32>, vector<2x50xf32> -> vector<2x50xf32>
    %540 = arith.addf %537, %539 : vector<2x50xf32>
    %c0_229 = arith.constant 0 : index
    %c0_230 = arith.constant 0 : index
    %541 = vector.load %arg42[%c0_229, %c0_230] : memref<1x50xf32, #tpu.memory_space<vmem>>, vector<1x50xf32>
    %542 = vector.broadcast %541 : vector<1x50xf32> to vector<2x50xf32>
    %543 = arith.addf %540, %542 : vector<2x50xf32>
    %cst_231 = arith.constant 0.000000e+00 : f32
    %544 = vector.broadcast %cst_231 : f32 to vector<2x50xf32>
    %545 = arith.maximumf %543, %544 : vector<2x50xf32>
    %c0_232 = arith.constant 0 : index
    %c0_233 = arith.constant 0 : index
    %546 = vector.load %arg43[%c0_232, %c0_233] : memref<50x4xf32, #tpu.memory_space<vmem>>, vector<50x4xf32>
    %cst_234 = arith.constant dense<0.000000e+00> : vector<2x4xf32>
    %547 = tpu.matmul %545, %546, %cst_234 {dimension_numbers = #tpu.dot_dimension_numbers<[1], [0], [0], [1], [0, 0, 1, 1], [], []>} : vector<2x50xf32>, vector<50x4xf32>, vector<2x4xf32> -> vector<2x4xf32>
    %c0_235 = arith.constant 0 : index
    %c0_236 = arith.constant 0 : index
    %548 = vector.load %arg44[%c0_235, %c0_236] : memref<1x4xf32, #tpu.memory_space<vmem>>, vector<1x4xf32>
    %549 = vector.broadcast %548 : vector<1x4xf32> to vector<2x4xf32>
    %550 = arith.addf %547, %549 : vector<2x4xf32>
    %c0_237 = arith.constant 0 : index
    %c0_238 = arith.constant 0 : index
    %551 = vector.load %arg45[%c0_237, %c0_238] : memref<2x4xf32, #tpu.memory_space<vmem>>, vector<2x4xf32>
    tpu.vector_store %arg45[%c0_237, %c0_238], %550 {strides = array<i32>} : memref<2x4xf32, #tpu.memory_space<vmem>>, vector<2x4xf32>,
    return
  }
}

</mosaic_0001>

<bundles_post_ra>
// kernel: forward.1
= control target key start
LH: loop header
LB: loop body
LE: loop exit
PB: predicated region body
PF: predicated region fallthrough
CT: control target
= control target key end

     0   :  { %s4392_s6 = smov 1   ;;  %s4393_s10 = smov 2   ;;  %s5595_s0 = inlined_call_operand.smem [shape: u32[46], index: -1, kind: input, shape index: {}] }
   0x1   :  { %s4469_s5 = sld [smem:[%s5595_s0]]   ;;  %s4394_s14 = smov 3  }
   0x2   :  { %s4474_s9 = sld [smem:[%s5595_s0 + %s4392_s6]]   ;;  %s4395_s18 = smov 4  }
   0x3   :  { %s4479_s13 = sld [smem:[%s5595_s0 + %s4393_s10]]   ;;  %s4396_s22 = smov 5  }
   0x4   :  { %s4484_s17 = sld [smem:[%s5595_s0 + %s4394_s14]]   ;;  %s4397_s26 = smov 6  }
   0x5   :  { %s4489_s21 = sld [smem:[%s5595_s0 + %s4395_s18]]   ;;  %s4398_s30 = smov 7  }
   0x6   :  { %s4494_s25 = sld [smem:[%s5595_s0 + %s4396_s22]]   ;;  %s4399_s4 = smov 8  }
   0x7   :  { %5603 = sst [smem:[#allocation39_spill]] %s4469_s5  ;;  %s4400_s10 = smov 9  }
   0x8   :  { %5604 = sst [smem:[#allocation40_spill]] %s4474_s9  ;;  %s4401_s15 = smov 10  }
   0x9   :  { %5605 = sst [smem:[#allocation41_spill]] %s4479_s13  ;;  %s4402_s20 = smov 11  }
   0xa   :  { %5606 = sst [smem:[#allocation42_spill]] %s4484_s17  ;;  %s4404_s1 = smov 13  }
   0xb   :  { %5607 = sst [smem:[#allocation43_spill]] %s4489_s21  ;;  %s4405_s7 = smov 14  }
   0xc   :  { %5608 = sst [smem:[#allocation44_spill]] %s4494_s25  ;;  %s4407_s22 = smov 16  }
   0xd   :  { %s4499_s29 = sld [smem:[%s5595_s0 + %s4397_s26]]   ;;  %s4403_s26 = smov 12  }
   0xe   :  { %s4504_s3 = sld [smem:[%s5595_s0 + %s4398_s30]]   ;;  %s4408_s28 = smov 17  }
   0xf   :  { %s4509_s8 = sld [smem:[%s5595_s0 + %s4399_s4]]  }
  0x10   :  { %s4514_s14 = sld [smem:[%s5595_s0 + %s4400_s10]]  }
  0x11   :  { %s4519_s19 = sld [smem:[%s5595_s0 + %s4401_s15]]   ;;  %s4406_s15 = smov 15  }
  0x12   :  { %s4524_s24 = sld [smem:[%s5595_s0 + %s4402_s20]]  }
  0x13   :  { %5609 = sst [smem:[#allocation45_spill]] %s4499_s29 }
  0x14   :  { %s4529_s30 = sld [smem:[%s5595_s0 + %s4403_s26]]  }
  0x15   :  { %5610 = sst [smem:[#allocation46_spill]] %s4509_s8 }
  0x16   :  { %s4534_s6 = sld [smem:[%s5595_s0 + %s4404_s1]]  }
  0x17   :  { %5611 = sst [smem:[#allocation47_spill]] %s4519_s19 }
  0x18   :  { %s4539_s12 = sld [smem:[%s5595_s0 + %s4405_s7]]   ;;  %s4409_s7 = smov 18  }
  0x19   :  { %s4544_s20 = sld [smem:[%s5595_s0 + %s4406_s15]]   ;;  %s4410_s15 = smov 19  }
  0x1a   :  { %5612 = sst [smem:[#allocation48_spill]] %s4529_s30 }
  0x1b   :  { %s4549_s27 = sld [smem:[%s5595_s0 + %s4407_s22]]   ;;  %s4411_s22 = smov 20  }
  0x1c   :  { %s4554_s4 = sld [smem:[%s5595_s0 + %s4408_s28]]   ;;  %s4412_s28 = smov 21  }
  0x1d   :  { %s4559_s13 = sld [smem:[%s5595_s0 + %s4409_s7]]   ;;  %s4413_s7 = smov 22  }
  0x1e   :  { %5613 = sst [smem:[#allocation49_spill]] %s4539_s12 }
  0x1f   :  { %s4564_s12 = sld [smem:[%s5595_s0 + %s4410_s15]]   ;;  %s4414_s15 = smov 23  }
  0x20   :  { %s4569_s30 = sld [smem:[%s5595_s0 + %s4411_s22]]   ;;  %s4415_s22 = smov 24  }
  0x21   :  { %5614 = sst [smem:[#allocation50_spill]] %s4549_s27 }
  0x22   :  { %s4574_s19 = sld [smem:[%s5595_s0 + %s4412_s28]]   ;;  %s4416_s28 = smov 25  }
  0x23   :  { %5615 = sst [smem:[#allocation51_spill]] %s4559_s13 }
  0x24   :  { %s4579_s13 = sld [smem:[%s5595_s0 + %s4413_s7]]   ;;  %s4417_s7 = smov 26  }
  0x25   :  { %s4584_s27 = sld [smem:[%s5595_s0 + %s4414_s15]]   ;;  %s4418_s15 = smov 27  }
  0x26   :  { %5616 = sst [smem:[#allocation52_spill]] %s4569_s30 }
  0x27   :  { %s4589_s30 = sld [smem:[%s5595_s0 + %s4415_s22]]   ;;  %s4419_s22 = smov 28  }
  0x28   :  { %s4594_s8 = sld [smem:[%s5595_s0 + %s4416_s28]]   ;;  %s4420_s28 = smov 29  }
  0x29   :  { %s4604_s29 = sld [smem:[%s5595_s0 + %s4418_s15]]   ;;  %s4422_s15 = smov 31  }
  0x2a   :  { %5617 = sst [smem:[#allocation53_spill]] %s4579_s13 }
  0x2b   :  { %s4599_s13 = sld [smem:[%s5595_s0 + %s4417_s7]]   ;;  %s4421_s7 = smov 30  }
  0x2c   :  { %s4614_s21 = sld [smem:[%s5595_s0 + %s4420_s28]]   ;;  %s4424_s28 = smov 33  }
  0x2d   :  { %5618 = sst [smem:[#allocation54_spill]] %s4589_s30 }
  0x2e   :  { %s4609_s30 = sld [smem:[%s5595_s0 + %s4419_s22]]   ;;  %s4423_s22 = smov 32  }
  0x2f   :  { %5620 = sst [smem:[#allocation56_spill]] %s4604_s29 }
  0x30   :  { %s4624_s29 = sld [smem:[%s5595_s0 + %s4422_s15]]   ;;  %s4426_s15 = smov 35  }
  0x31   :  { %5619 = sst [smem:[#allocation55_spill]] %s4599_s13 }
  0x32   :  { %s4619_s13 = sld [smem:[%s5595_s0 + %s4421_s7]]   ;;  %s4425_s7 = smov 34  }
  0x33   :  { %s4634_s25 = sld [smem:[%s5595_s0 + %s4424_s28]]   ;;  %s4428_s28 = smov 37  }
  0x34   :  { %5621 = sst [smem:[#allocation57_spill]] %s4609_s30 }
  0x35   :  { %s4629_s30 = sld [smem:[%s5595_s0 + %s4423_s22]]   ;;  %s4427_s22 = smov 36  }
  0x36   :  { %s4644_s17 = sld [smem:[%s5595_s0 + %s4426_s15]]   ;;  %s4430_s15 = smov 39  }
  0x37   :  { %s4654_s9 = sld [smem:[%s5595_s0 + %s4428_s28]]   ;;  %s4432_s28 = smov 41  }
  0x38   :  { %5622 = sst [smem:[#allocation58_spill]] %s4619_s13 }
  0x39   :  { %s4639_s13 = sld [smem:[%s5595_s0 + %s4425_s7]]   ;;  %s4429_s7 = smov 38  }
  0x3a   :  { %s4664_s5 = sld [smem:[%s5595_s0 + %s4430_s15]]   ;;  %s4434_s15 = smov 43  }
  0x3b   :  { %5623 = sst [smem:[#allocation59_spill]] %s4629_s30 }
  0x3c   :  { %s4649_s30 = sld [smem:[%s5595_s0 + %s4427_s22]]   ;;  %s4431_s22 = smov 40  }
  0x3d   :  { %5626 = sst [smem:[#allocation62_spill]] %s4654_s9 }
  0x3e   :  { %s4674_s9 = sld [smem:[%s5595_s0 + %s4432_s28]]   ;;  %s4436_s28 = smov 45  }
  0x3f   :  { %5624 = sst [smem:[#allocation60_spill]] %s4639_s13 }
  0x40   :  { %s4659_s13 = sld [smem:[%s5595_s0 + %s4429_s7]]   ;;  %s4433_s7 = smov 42  }
  0x41   :  { %5628 = sst [smem:[#allocation64_spill]] %s4664_s5 }
  0x42   :  { %5625 = sst [smem:[#allocation61_spill]] %s4649_s30 }
  0x43   :  { %s4669_s30 = sld [smem:[%s5595_s0 + %s4431_s22]]   ;;  %s4435_s22 = smov 44  }
  0x44   :  { %5630 = sst [smem:[#allocation66_spill]] %s4674_s9 }
  0x45   :  { %s4684_s5 = sld [smem:[%s5595_s0 + %s4434_s15]]  }
  0x46   :  { %5627 = sst [smem:[#allocation63_spill]] %s4659_s13 }
  0x47   :  { %s4679_s13 = sld [smem:[%s5595_s0 + %s4433_s7]]  }
  0x48   :  { %s4694_s9 = sld [smem:[%s5595_s0 + %s4436_s28]]  }
  0x49   :  { %5629 = sst [smem:[#allocation65_spill]] %s4669_s30 }
  0x4a   :  { %s4689_s30 = sld [smem:[%s5595_s0 + %s4435_s22]]  }
  0x4b   :  { %96 = vsyncpa [#allocation3], 0 }
  0x4c   :  { %97 = vsyncpa [#allocation6], 0 }
  0x4d   :  { %98 = vsyncpa [#allocation9], 0 }
  0x4e   :  { %99 = vsyncpa [#allocation12], 0 }
  0x4f   :  { %100 = vsyncpa [#allocation15], 0 }
  0x50   :  { %101 = vsyncpa [#allocation18], 0 }
  0x51   :  { %102 = vsyncpa [#allocation21], 0 }
  0x52   :  { %103 = vsyncpa [#allocation24], 0 }
  0x53   :  { %104 = vsyncpa [#allocation27], 0 }
  0x54   :  { %105 = vsyncpa [#allocation4], 0  ;;  %s139_s7 = sshll.u32 %s4514_s14, 4  ;;  %s4437_s10 = smov [#allocation5]   ;;  %s140_s7 = int_to_ptr.hbm [resolvable:$true] %s139_s7 }
  0x55   :  { %s141_s11 = sshll.u32 %s4437_s10, 4  ;;  %s169_s0 = sshll.u32 %s4534_s6, 4  ;;  %s142_s11 = int_to_ptr.vmem [resolvable:$true] %s141_s11  ;;  %s170_s0 = int_to_ptr.hbm [resolvable:$true] %s169_s0 }
  0x56   :  { %s3964_s15 = sshra.s32 %s140_s7, 4  ;;  %s3968_s18 = scalar_lea.hbm %s4514_s14, 8  ;;  %s3965_s15 = int_to_ptr.hbm [resolvable:$true] %s3964_s15 }
  0x57   :  { %s3966_s16 = scalar_lea.hbm %s3965_s15, 8  ;;  %p3969_p1 = scmp.lt.s32.totalorder %s3965_s15, %s4514_s14 }
  0x58   :  { %p3967_p0 = scmp.ne.s32.totalorder %s3965_s15, %s3966_s16  ;;  %p3970_p2 = scmp.lt.s32.totalorder %s3968_s18, %s3966_s16 }
  0x5a   :  { %p3971_p3 = por %p3970_p2, %p3969_p1 }
  0x5c   :  { %p3972_p4 = pnand %p3971_p3, %p3967_p0 }
  0x5e   :  { %3975 = shalt.err (!%p3972_p4)
}
  0x5f   :  { %s4438_s22 = smov 64   ;;  %s4439_s23 = smov 4  }
  0x60   :  { %147 = dma.hbm_to_vmem [thread:$0]  %s140_s7, 128, %s142_s11, [#allocation6], %s4438_s22, %s4438_s22, %s4439_s23  }
  0x61   :  { %s4440_s26 = smov [#allocation8]   ;;  %s197_s1 = sshll.u32 %s4554_s4, 4  ;;  %s4704_s1 = int_to_ptr.hbm [resolvable:$true] %s197_s1 }
  0x62   :  { %s171_s28 = sshll.u32 %s4440_s26, 4  ;;  %s3988_s14 = sshra.s32 %s170_s0, 4  ;;  %s172_s28 = int_to_ptr.vmem [resolvable:$true] %s171_s28  ;;  %s3989_s14 = int_to_ptr.hbm [resolvable:$true] %s3988_s14 }
  0x63   :  { %s3990_s2 = scalar_lea.hbm %s3989_s14, 8  ;;  %s3992_s10 = scalar_lea.hbm %s4534_s6, 8 }
  0x64   :  { %p3991_p5 = scmp.ne.s32.totalorder %s3989_s14, %s3990_s2  ;;  %p3993_p6 = scmp.lt.s32.totalorder %s3989_s14, %s4534_s6 }
  0x65   :  { %p3994_p7 = scmp.lt.s32.totalorder %s3992_s10, %s3990_s2 }
  0x67   :  { %p3995_p8 = por %p3994_p7, %p3993_p6 }
  0x69   :  { %p3996_p9 = pnand %p3995_p8, %p3991_p5 }
  0x6b   :  { %3999 = shalt.err (!%p3996_p9)
}
  0x6c   :  { %177 = dma.hbm_to_vmem [thread:$0]  %s170_s0, 128, %s172_s28, [#allocation9], %s4438_s22, %s4438_s22, %s4439_s23  }
  0x6d   :  { %s227_s7 = sshll.u32 %s4574_s19, 4  ;;  %s4441_s11 = smov [#allocation11]   ;;  %s4712_s7 = int_to_ptr.hbm [resolvable:$true] %s227_s7 }
  0x6e   :  { %s199_s15 = sshll.u32 %s4441_s11, 4  ;;  %s4012_s16 = sshra.s32 %s4704_s1, 4  ;;  %s200_s15 = int_to_ptr.vmem [resolvable:$true] %s199_s15  ;;  %s4013_s16 = int_to_ptr.hbm [resolvable:$true] %s4012_s16 }
  0x6f   :  { %s4014_s6 = scalar_lea.hbm %s4013_s16, 8  ;;  %s4016_s18 = scalar_lea.hbm %s4554_s4, 8 }
  0x70   :  { %p4015_p10 = scmp.ne.s32.totalorder %s4013_s16, %s4014_s6  ;;  %p4017_p11 = scmp.lt.s32.totalorder %s4013_s16, %s4554_s4 }
  0x71   :  { %p4018_p12 = scmp.lt.s32.totalorder %s4016_s18, %s4014_s6 }
  0x73   :  { %p4019_p13 = por %p4018_p12, %p4017_p11 }
  0x75   :  { %p4020_p0 = pnand %p4019_p13, %p4015_p10 }
  0x77   :  { %4023 = shalt.err (!%p4020_p0)
}
  0x78   :  { %205 = dma.hbm_to_vmem [thread:$0]  %s4704_s1, 128, %s200_s15, [#allocation12], %s4438_s22, %s4438_s22, %s4439_s23  }
  0x79   :  { %s4442_s0 = smov [#allocation14]   ;;  %s257_s28 = sshll.u32 %s4594_s8, 4  ;;  %s4722_s28 = int_to_ptr.hbm [resolvable:$true] %s257_s28 }
  0x7a   :  { %s229_s26 = sshll.u32 %s4442_s0, 4  ;;  %s4036_s4 = sshra.s32 %s4712_s7, 4  ;;  %s230_s26 = int_to_ptr.vmem [resolvable:$true] %s229_s26  ;;  %s4037_s4 = int_to_ptr.hbm [resolvable:$true] %s4036_s4 }
  0x7b   :  { %s4038_s14 = scalar_lea.hbm %s4037_s4, 8  ;;  %s4040_s2 = scalar_lea.hbm %s4574_s19, 8 }
  0x7c   :  { %p4039_p1 = scmp.ne.s32.totalorder %s4037_s4, %s4038_s14  ;;  %p4041_p2 = scmp.lt.s32.totalorder %s4037_s4, %s4574_s19 }
  0x7d   :  { %p4042_p3 = scmp.lt.s32.totalorder %s4040_s2, %s4038_s14 }
  0x7f   :  { %p4043_p4 = por %p4042_p3, %p4041_p2 }
  0x81   :  { %p4044_p5 = pnand %p4043_p4, %p4039_p1 }
  0x83   :  { %4047 = shalt.err (!%p4044_p5)
}
  0x84   :  { %235 = dma.hbm_to_vmem [thread:$0]  %s4712_s7, 128, %s230_s26, [#allocation15], %s4438_s22, %s4438_s22, %s4439_s23  }
  0x85   :  { %s291_s1 = sshll.u32 %s4624_s29, 4  ;;  %s4443_s10 = smov [#allocation17]   ;;  %s4732_s1 = int_to_ptr.hbm [resolvable:$true] %s291_s1 }
  0x86   :  { %s259_s11 = sshll.u32 %s4443_s10, 4  ;;  %s4060_s19 = sshra.s32 %s4722_s28, 4  ;;  %s260_s11 = int_to_ptr.vmem [resolvable:$true] %s259_s11  ;;  %s4061_s19 = int_to_ptr.hbm [resolvable:$true] %s4060_s19 }
  0x87   :  { %s4062_s15 = scalar_lea.hbm %s4061_s19, 8  ;;  %s4064_s16 = scalar_lea.hbm %s4594_s8, 8 }
  0x88   :  { %p4063_p6 = scmp.ne.s32.totalorder %s4061_s19, %s4062_s15  ;;  %p4065_p7 = scmp.lt.s32.totalorder %s4061_s19, %s4594_s8 }
  0x89   :  { %p4066_p8 = scmp.lt.s32.totalorder %s4064_s16, %s4062_s15 }
  0x8b   :  { %p4067_p9 = por %p4066_p8, %p4065_p7 }
  0x8d   :  { %p4068_p10 = pnand %p4067_p9, %p4063_p6 }
  0x8f   :  { %4071 = shalt.err (!%p4068_p10)
}
  0x90   :  { %265 = dma.hbm_to_vmem [thread:$0]  %s4722_s28, 128, %s260_s11, [#allocation18], %s4438_s22, %s4438_s22, %s4439_s23  }
  0x91   :  { %s4444_s7 = smov [#allocation20]   ;;  %s321_s18 = sshll.u32 %s4644_s17, 4  ;;  %s4742_s18 = int_to_ptr.hbm [resolvable:$true] %s321_s18 }
  0x92   :  { %s293_s6 = sshll.u32 %s4444_s7, 4  ;;  %s4084_s8 = sshra.s32 %s4732_s1, 4  ;;  %s294_s6 = int_to_ptr.vmem [resolvable:$true] %s293_s6  ;;  %s4085_s8 = int_to_ptr.hbm [resolvable:$true] %s4084_s8 }
  0x93   :  { %s4086_s0 = scalar_lea.hbm %s4085_s8, 8  ;;  %s4088_s26 = scalar_lea.hbm %s4624_s29, 8 }
  0x94   :  { %p4087_p11 = scmp.ne.s32.totalorder %s4085_s8, %s4086_s0  ;;  %p4089_p12 = scmp.lt.s32.totalorder %s4085_s8, %s4624_s29 }
  0x95   :  { %p4090_p13 = scmp.lt.s32.totalorder %s4088_s26, %s4086_s0 }
  0x97   :  { %p4091_p0 = por %p4090_p13, %p4089_p12 }
  0x99   :  { %p4092_p1 = pnand %p4091_p0, %p4087_p11 }
  0x9b   :  { %4095 = shalt.err (!%p4092_p1)
}
  0x9c   :  { %299 = dma.hbm_to_vmem [thread:$0]  %s4732_s1, 128, %s294_s6, [#allocation21], %s4438_s22, %s4438_s22, %s4439_s23  }
  0x9d   :  { %s124_s28 = sshll.u32 %s4504_s3, 4  ;;  %s4445_s4 = smov [#allocation23]   ;;  %s4752_s28 = int_to_ptr.hbm [resolvable:$true] %s124_s28 }
  0x9e   :  { %s323_s14 = sshll.u32 %s4445_s4, 4  ;;  %s4108_s29 = sshra.s32 %s4742_s18, 4  ;;  %s324_s14 = int_to_ptr.vmem [resolvable:$true] %s323_s14  ;;  %s4109_s29 = int_to_ptr.hbm [resolvable:$true] %s4108_s29 }
  0x9f   :  { %s4110_s2 = scalar_lea.hbm %s4109_s29, 8  ;;  %s4112_s10 = scalar_lea.hbm %s4644_s17, 8 }
  0xa0   :  { %p4111_p2 = scmp.ne.s32.totalorder %s4109_s29, %s4110_s2  ;;  %p4113_p3 = scmp.lt.s32.totalorder %s4109_s29, %s4644_s17 }
  0xa1   :  { %p4114_p4 = scmp.lt.s32.totalorder %s4112_s10, %s4110_s2 }
  0xa3   :  { %p4115_p5 = por %p4114_p4, %p4113_p3 }
  0xa5   :  { %p4116_p6 = pnand %p4115_p5, %p4111_p2 }
  0xa7   :  { %4119 = shalt.err (!%p4116_p6)
}
  0xa8   :  { %329 = dma.hbm_to_vmem [thread:$0]  %s4742_s18, 128, %s324_s14, [#allocation24], %s4438_s22, %s4438_s22, %s4439_s23  }
  0xa9   :  { %s4446_s1 = smov [#allocation2]   ;;  %s154_s19 = sshll.u32 %s4524_s24, 4  ;;  %s4762_s19 = int_to_ptr.hbm [resolvable:$true] %s154_s19 }
  0xaa   :  { %s126_s11 = sshll.u32 %s4446_s1, 4  ;;  %s4132_s17 = sshra.s32 %s4752_s28, 4  ;;  %s127_s11 = int_to_ptr.vmem [resolvable:$true] %s126_s11  ;;  %s4133_s17 = int_to_ptr.hbm [resolvable:$true] %s4132_s17 }
  0xab   :  { %s4134_s15 = scalar_lea.hbm %s4133_s17, 8  ;;  %s4136_s16 = scalar_lea.hbm %s4504_s3, 8 }
  0xac   :  { %p4135_p7 = scmp.ne.s32.totalorder %s4133_s17, %s4134_s15  ;;  %p4137_p8 = scmp.lt.s32.totalorder %s4133_s17, %s4504_s3 }
  0xad   :  { %p4138_p9 = scmp.lt.s32.totalorder %s4136_s16, %s4134_s15 }
  0xaf   :  { %p4139_p10 = por %p4138_p9, %p4137_p8 }
  0xb1   :  { %p4140_p11 = pnand %p4139_p10, %p4135_p7 }
  0xb3   :  { %4143 = shalt.err (!%p4140_p11)
}
  0xb4   :  { %132 = dma.hbm_to_vmem [thread:$0]  %s4752_s28, 128, %s127_s11, [#allocation3], %s4438_s22, %s4438_s22, %s4439_s23  }
  0xb5   :  { %s185_s7 = sshll.u32 %s4544_s20, 4  ;;  %s4447_s6 = smov [#allocation7]   ;;  %s186_s7 = int_to_ptr.hbm [resolvable:$true] %s185_s7 }
  0xb6   :  { %s156_s18 = sshll.u32 %s4447_s6, 4  ;;  %s4156_s8 = sshra.s32 %s4762_s19, 4  ;;  %s157_s18 = int_to_ptr.vmem [resolvable:$true] %s156_s18  ;;  %s4157_s8 = int_to_ptr.hbm [resolvable:$true] %s4156_s8 }
  0xb7   :  { %s4158_s3 = scalar_lea.hbm %s4157_s8, 8  ;;  %s4160_s0 = scalar_lea.hbm %s4524_s24, 8 }
  0xb8   :  { %p4159_p12 = scmp.ne.s32.totalorder %s4157_s8, %s4158_s3  ;;  %p4161_p13 = scmp.lt.s32.totalorder %s4157_s8, %s4524_s24 }
  0xb9   :  { %p4162_p0 = scmp.lt.s32.totalorder %s4160_s0, %s4158_s3 }
  0xbb   :  { %p4163_p1 = por %p4162_p0, %p4161_p13 }
  0xbd   :  { %p4164_p2 = pnand %p4163_p1, %p4159_p12 }
  0xbf   :  { %4167 = shalt.err (!%p4164_p2)
}
  0xc0   :  { %162 = dma.hbm_to_vmem [thread:$0]  %s4762_s19, 128, %s157_s18, [#allocation6], %s4438_s22, %s4438_s22, %s4439_s23  }
  0xc1   :  { %s4448_s26 = smov [#allocation10]   ;;  %s212_s4 = sshll.u32 %s4564_s12, 4  ;;  %s4780_s4 = int_to_ptr.hbm [resolvable:$true] %s212_s4 }
  0xc2   :  { %s187_s28 = sshll.u32 %s4448_s26, 4  ;;  %s4180_s14 = sshra.s32 %s186_s7, 4  ;;  %s188_s28 = int_to_ptr.vmem [resolvable:$true] %s187_s28  ;;  %s4181_s14 = int_to_ptr.hbm [resolvable:$true] %s4180_s14 }
  0xc3   :  { %s4182_s24 = scalar_lea.hbm %s4181_s14, 4  ;;  %s4184_s29 = scalar_lea.hbm %s4544_s20, 4 }
  0xc4   :  { %p4183_p3 = scmp.ne.s32.totalorder %s4181_s14, %s4182_s24  ;;  %p4185_p4 = scmp.lt.s32.totalorder %s4181_s14, %s4544_s20 }
  0xc5   :  { %p4186_p5 = scmp.lt.s32.totalorder %s4184_s29, %s4182_s24 }
  0xc7   :  { %p4187_p6 = por %p4186_p5, %p4185_p4 }
  0xc9   :  { %p4188_p7 = pnand %p4187_p6, %p4183_p3 }
  0xcb   :  { %4191 = shalt.err (!%p4188_p7)
}
  0xcc   :  { %190 = dma.hbm_to_vmem [thread:$0]  %s186_s7, 64, %s188_s28, [#allocation9]  }
  0xcd   :  { %s242_s2 = sshll.u32 %s4584_s27, 4  ;;  %s4449_s10 = smov [#allocation13]   ;;  %s4785_s2 = int_to_ptr.hbm [resolvable:$true] %s242_s2 }
  0xce   :  { %s214_s1 = sshll.u32 %s4449_s10, 4  ;;  %s4204_s11 = sshra.s32 %s4780_s4, 4  ;;  %s215_s1 = int_to_ptr.vmem [resolvable:$true] %s214_s1  ;;  %s4205_s11 = int_to_ptr.hbm [resolvable:$true] %s4204_s11 }
  0xcf   :  { %s4206_s19 = scalar_lea.hbm %s4205_s11, 8  ;;  %s4208_s20 = scalar_lea.hbm %s4564_s12, 8 }
  0xd0   :  { %p4207_p8 = scmp.ne.s32.totalorder %s4205_s11, %s4206_s19  ;;  %p4209_p9 = scmp.lt.s32.totalorder %s4205_s11, %s4564_s12 }
  0xd1   :  { %p4210_p10 = scmp.lt.s32.totalorder %s4208_s20, %s4206_s19 }
  0xd3   :  { %p4211_p11 = por %p4210_p10, %p4209_p9 }
  0xd5   :  { %p4212_p12 = pnand %p4211_p11, %p4207_p8 }
  0xd7   :  { %4215 = shalt.err (!%p4212_p12)
}
  0xd8   :  { %220 = dma.hbm_to_vmem [thread:$0]  %s4780_s4, 128, %s215_s1, [#allocation12], %s4438_s22, %s4438_s22, %s4439_s23  }
  0xd9   :  { %s4450_s17 = smov [#allocation16]   ;;  %s276_s16 = sshll.u32 %s4614_s21, 4  ;;  %s4795_s16 = int_to_ptr.hbm [resolvable:$true] %s276_s16 }
  0xda   :  { %s244_s15 = sshll.u32 %s4450_s17, 4  ;;  %s4228_s12 = sshra.s32 %s4785_s2, 4  ;;  %s245_s15 = int_to_ptr.vmem [resolvable:$true] %s244_s15  ;;  %s4229_s12 = int_to_ptr.hbm [resolvable:$true] %s4228_s12 }
  0xdb   :  { %s4230_s7 = scalar_lea.hbm %s4229_s12, 8  ;;  %s4232_s6 = scalar_lea.hbm %s4584_s27, 8 }
  0xdc   :  { %p4231_p13 = scmp.ne.s32.totalorder %s4229_s12, %s4230_s7  ;;  %p4233_p0 = scmp.lt.s32.totalorder %s4229_s12, %s4584_s27 }
  0xdd   :  { %p4234_p1 = scmp.lt.s32.totalorder %s4232_s6, %s4230_s7 }
  0xdf   :  { %p4235_p2 = por %p4234_p1, %p4233_p0 }
  0xe1   :  { %p4236_p3 = pnand %p4235_p2, %p4231_p13 }
  0xe3   :  { %4239 = shalt.err (!%p4236_p3)
}
  0xe4   :  { %250 = dma.hbm_to_vmem [thread:$0]  %s4785_s2, 128, %s245_s15, [#allocation15], %s4438_s22, %s4438_s22, %s4439_s23  }
  0xe5   :  { %s306_s18 = sshll.u32 %s4634_s25, 4  ;;  %s4451_s8 = smov [#allocation19]   ;;  %s4805_s18 = int_to_ptr.hbm [resolvable:$true] %s306_s18 }
  0xe6   :  { %s278_s3 = sshll.u32 %s4451_s8, 4  ;;  %s4252_s27 = sshra.s32 %s4795_s16, 4  ;;  %s279_s3 = int_to_ptr.vmem [resolvable:$true] %s278_s3  ;;  %s4253_s27 = int_to_ptr.hbm [resolvable:$true] %s4252_s27 }
  0xe7   :  { %s4254_s0 = scalar_lea.hbm %s4253_s27, 8  ;;  %s4256_s26 = scalar_lea.hbm %s4614_s21, 8 }
  0xe8   :  { %p4255_p4 = scmp.ne.s32.totalorder %s4253_s27, %s4254_s0  ;;  %p4257_p5 = scmp.lt.s32.totalorder %s4253_s27, %s4614_s21 }
  0xe9   :  { %p4258_p6 = scmp.lt.s32.totalorder %s4256_s26, %s4254_s0 }
  0xeb   :  { %p4259_p7 = por %p4258_p6, %p4257_p5 }
  0xed   :  { %p4260_p8 = pnand %p4259_p7, %p4255_p4 }
  0xef   :  { %4263 = shalt.err (!%p4260_p8)
}
  0xf0   :  { %s5631_s28 = sld [smem:[#allocation62_spill]]  ;;  %s4452_s4 = smov [#allocation22]  }
  0xf1   :  { %284 = dma.hbm_to_vmem [thread:$0]  %s4795_s16, 128, %s279_s3, [#allocation18], %s4438_s22, %s4438_s22, %s4439_s23  }
  0xf2   :  { %s308_s14 = sshll.u32 %s4452_s4, 4  ;;  %s4276_s21 = sshra.s32 %s4805_s18, 4  ;;  %s309_s14 = int_to_ptr.vmem [resolvable:$true] %s308_s14  ;;  %s4277_s21 = int_to_ptr.hbm [resolvable:$true] %s4276_s21 }
  0xf3   :  { %s4278_s29 = scalar_lea.hbm %s4277_s21, 8  ;;  %s4280_s2 = scalar_lea.hbm %s4634_s25, 8 }
  0xf4   :  { %p4279_p9 = scmp.ne.s32.totalorder %s4277_s21, %s4278_s29  ;;  %p4281_p10 = scmp.lt.s32.totalorder %s4277_s21, %s4634_s25 }
  0xf5   :  { %p4282_p11 = scmp.lt.s32.totalorder %s4280_s2, %s4278_s29 }
  0xf6   :  { %s336_s24 = sshll.u32 %s5631_s28, 4  ;;  %s4815_s24 = int_to_ptr.hbm [resolvable:$true] %s336_s24 }
  0xf7   :  { %p4283_p12 = por %p4282_p11, %p4281_p10 }
  0xf9   :  { %p4284_p13 = pnand %p4283_p12, %p4279_p9 }
  0xfb   :  { %4287 = shalt.err (!%p4284_p13)
}
  0xfc   :  { %s5632_s10 = sld [smem:[#allocation66_spill]]  ;;  %s4453_s11 = smov [#allocation25]  }
  0xfd   :  { %314 = dma.hbm_to_vmem [thread:$0]  %s4805_s18, 128, %s309_s14, [#allocation21], %s4438_s22, %s4438_s22, %s4439_s23  }
  0xfe   :  { %s338_s19 = sshll.u32 %s4453_s11, 4  ;;  %s4300_s25 = sshra.s32 %s4815_s24, 4  ;;  %s339_s19 = int_to_ptr.vmem [resolvable:$true] %s338_s19  ;;  %s4301_s25 = int_to_ptr.hbm [resolvable:$true] %s4300_s25 }
  0xff   :  { %s4302_s20 = scalar_lea.hbm %s4301_s25, 8  ;;  %s4304_s17 = scalar_lea.hbm %s5631_s28, 8 }
 0x100   :  { %p4303_p0 = scmp.ne.s32.totalorder %s4301_s25, %s4302_s20  ;;  %p4305_p1 = scmp.lt.s32.totalorder %s4301_s25, %s5631_s28 }
 0x101   :  { %p4306_p2 = scmp.lt.s32.totalorder %s4304_s17, %s4302_s20 }
 0x102   :  { %s355_s1 = sshll.u32 %s5632_s10, 4  ;;  %s4825_s1 = int_to_ptr.hbm [resolvable:$true] %s355_s1 }
 0x103   :  { %p4307_p3 = por %p4306_p2, %p4305_p1 }
 0x105   :  { %p4308_p4 = pnand %p4307_p3, %p4303_p0 }
 0x107   :  { %4311 = shalt.err (!%p4308_p4)
}
 0x108   :  { %344 = dma.hbm_to_vmem [thread:$0]  %s4815_s24, 128, %s339_s19, [#allocation24], %s4438_s22, %s4438_s22, %s4439_s23  }
 0x109   :  { %s4454_s15 = smov [#allocation26]   ;;  %s4324_s12 = sshra.s32 %s4825_s1, 4  ;;  %s4325_s12 = int_to_ptr.hbm [resolvable:$true] %s4324_s12 }
 0x10a   :  { %s357_s16 = sshll.u32 %s4454_s15, 4  ;;  %s4326_s7 = scalar_lea.hbm %s4325_s12, 112  ;;  %s358_s16 = int_to_ptr.vmem [resolvable:$true] %s357_s16 }
 0x10b   :  { %p4327_p5 = scmp.ne.s32.totalorder %s4325_s12, %s4326_s7  ;;  %s4328_s6 = scalar_lea.hbm %s5632_s10, 112 }
 0x10c   :  { %p4329_p6 = scmp.lt.s32.totalorder %s4325_s12, %s5632_s10  ;;  %p4330_p7 = scmp.lt.s32.totalorder %s4328_s6, %s4326_s7 }
 0x10e   :  { %p4331_p8 = por %p4330_p7, %p4329_p6 }
 0x110   :  { %p4332_p9 = pnand %p4331_p8, %p4327_p5 }
 0x112   :  { %4335 = shalt.err (!%p4332_p9)
}
 0x113   :  { %s4455_s18 = smov 128   ;;  %s4456_s8 = smov 8  }
 0x114   :  { %363 = dma.hbm_to_vmem [thread:$0]  %s4825_s1, 1792, %s358_s16, [#allocation27], %s4455_s18, %s4455_s18, %s4456_s8  }
 0x115   :  { %4372 = dma.done.wait [#allocation3], 128  }
 0x116   :  { %4373 = vsyncadd [#allocation3], 4294967168 }
 0x117   :  { %4374 = dma.done.wait [#allocation6], 256  }
 0x118   :  { %4375 = vsyncadd [#allocation6], 4294967040 }
 0x119   :  { %4376 = dma.done.wait [#allocation9], 192  }
 0x11a   :  { %4377 = vsyncadd [#allocation9], 4294967104 }
 0x11b   :  { %4378 = dma.done.wait [#allocation12], 256  }
 0x11c   :  { %4379 = vsyncadd [#allocation12], 4294967040 }
 0x11d   :  { %4380 = dma.done.wait [#allocation15], 256  }
 0x11e   :  { %4381 = vsyncadd [#allocation15], 4294967040 }
 0x11f   :  { %4382 = dma.done.wait [#allocation18], 256  }
 0x120   :  { %4383 = vsyncadd [#allocation18], 4294967040 }
 0x121   :  { %4384 = dma.done.wait [#allocation21], 256  }
 0x122   :  { %4385 = vsyncadd [#allocation21], 4294967040 }
 0x123   :  { %4386 = dma.done.wait [#allocation24], 256  }
 0x124   :  { %4387 = vsyncadd [#allocation24], 4294967040 }
 0x125   :  { %4388 = dma.done.wait [#allocation27], 1792  }
 0x126   :  { %4389 = vsyncadd [#allocation27], 4294965504  ;;  %s5633_s22 = sld [smem:[#allocation39_spill]]  ;;  %vm519_vm0 = vcmask 130048   ;;  %vm577_vm1 = vcmask 1043456   ;;  %vm570_vm2 = vcmask 64512  }
 0x127   :  { %s5634_s23 = sld [smem:[#allocation40_spill]]  ;;  %v4457_v40 = vmov 2.0  }
 0x128   :  { %s5635_s3 = sld [smem:[#allocation42_spill]]  ;;  %3860 = vrcp.f32 %v4457_v40 }
 0x129   :  { %s5636_s27 = sld [smem:[#allocation44_spill]] }
 0x12a   :  { %s5637_s0 = sld [smem:[#allocation43_spill]] }
 0x12b   :  { %s5638_s26 = sld [smem:[#allocation45_spill]] }
 0x12c   :  { %v492_v0 = vld [vmem:[%s5633_s22] sm:$0xff]  ;;  %v493_v1 = vld [vmem:[%s5633_s22 + $0x8] sm:$0xff]  ;;  %v494_v4 = vld [vmem:[%s5633_s22 + $0x10] sm:$0xff]  ;;  %s5639_s28 = sld [smem:[#allocation46_spill]] }
 0x12d   :  { %v504_v2 = vpack.c.bf16 %v492_v0, %v492_v0  ;;  %v505_v3 = vpack.c.bf16 %v493_v1, %v493_v1  ;;  %v495_v5 = vld [vmem:[%s5633_s22 + $0x18] sm:$0xff]  ;;  %v506_v6 = vpack.c.bf16 %v494_v4, %v494_v4  ;;  %v4843_v10 = vld [vmem:[%s5634_s23] sm:$0xff]  ;;  %v4846_v14 = vld [vmem:[%s5634_s23 + $0x8] sm:$0xff]  ;;  %s5640_s4 = sld [smem:[#allocation50_spill]]  ;;  %s3512_s22 = sshll.u32 %s4694_s9, 4  ;;  %s3513_s22 = int_to_ptr.hbm [resolvable:$true] %s3512_s22 }
 0x12e   :  { %v507_v7 = vpack.c.bf16 %v495_v5, %v495_v5  ;;  %v435_v16 = vld [vmem:[%s5635_s3] sm:$0xf]  ;;  %v3861_v41 = vpop.eup %3860  ;;  %s5641_s14 = sld [smem:[#allocation47_spill]]  ;;  %s4364_s3 = scalar_lea.hbm %s4694_s9, 2 }
 0x12f   :  { %v515_v8 = vunpack.c.l.b16 %v504_v2  ;;  %v516_v9 = vunpack.c.l.b16 %v505_v3  ;;  %v544_v11 = vunpack.c.l.b16 %v506_v6  ;;  %v579_v17 = vsel %vm577_vm1, %v435_v16, 0  ;;  %v3746_v24 = vld [vmem:[%s5636_s27] sm:$0xff]  ;;  %s5642_s24 = sld [smem:[#allocation51_spill]] }
 0x130   :  { %v545_v12 = vunpack.c.l.b16 %v507_v7  ;;  %588 = vmatpush.bf16.msra.mxu2 %v579_v17  ;;  %628 = vmatpush.bf16.msra.mxu3 %v3746_v24  ;;  %v3839_v26 = vld [vmem:[%s5637_s0] ss:$0 sm:$0xff]  ;;  %v647_v43 = vmul.f32 2.0, %v3861_v41  ;;  %vm651_vm3 = vweird.f32 %v3861_v41  ;;  %s5643_s21 = sld [smem:[#allocation48_spill]] }
 0x131   :  { %v517_v13 = vpack.c.b16 %v516_v9, %v515_v8  ;;  %v3840_v46 = vld [vmem:[%s5638_s26] ss:$0 sm:$0xff]  ;;  %s5644_s29 = sld [smem:[#allocation49_spill]] }
 0x132   :  { %v546_v15 = vpack.c.b16 %v545_v12, %v544_v11  ;;  %v648_v44 = vsub.f32 1.0, %v647_v43  ;;  %s5645_s2 = sld [smem:[#allocation52_spill]] }
 0x133   :  { %530 = vmatpush.bf16.msra.mxu0 %v517_v13  ;;  %s5646_s10 = sld [smem:[#allocation53_spill]] }
 0x134   :  { %558 = vmatpush.bf16.msra.mxu1 %v546_v15  ;;  %v649_v47 = vmul.f32 %v3861_v41, %v648_v44  ;;  %s5647_s1 = sld [smem:[#allocation41_spill]] }
 0x135   :  { %s5648_s11 = sld [smem:[#allocation64_spill]] }
 0x136   :  { %3579 = vmatmul.msk.bf16.vlgmr.msra.gmra.mxu0 %vm519_vm0, %v4843_v10  ;;  %v650_v49 = vadd.f32 %v3861_v41, %v649_v47  ;;  %s5649_s19 = sld [smem:[#allocation54_spill]] }
 0x137   :  { %3584 = vmatmul.msk.bf16.vlgmr.msra.gmra.mxu1 %vm519_vm0, %v4846_v14  ;;  %s5650_s25 = sld [smem:[#allocation55_spill]] }
 0x138   :  { %v4869_v54 = vsel %vm651_vm3, %v3861_v41, %v650_v49  ;;  %s5651_s20 = sld [smem:[#allocation65_spill]] }
 0x139   :  { %s5652_s17 = sld [smem:[#allocation56_spill]] }
 0x13a   :  { %s5653_s15 = sld [smem:[#allocation57_spill]] }
 0x13b   :  { %s5654_s16 = sld [smem:[#allocation58_spill]] }
 0x13c   :  { %s5655_s12 = sld [smem:[#allocation59_spill]] }
 0x13d   :  { %s5656_s7 = sld [smem:[#allocation60_spill]] }
 0x13e   :  { %s5657_s6 = sld [smem:[#allocation61_spill]] }
 0x13f   :  { %s5658_s18 = sld [smem:[#allocation63_spill]] }
 0x1b3   :  { %v532_v18 = vpop.f32.mrf.mxu0 }
 0x1b4   :  { %v560_v21 = vpop.f32.mrf.mxu1 }
 0x1bb   :  { %v534_v19 = vpop.f32.mrf.mxu0 }
 0x1bc   :  { %v4854_v20 = vpack.c.bf16 %v534_v19, %v532_v18  ;;  %v562_v22 = vpop.f32.mrf.mxu1 }
 0x1bd   :  { %v4858_v23 = vpack.c.bf16 %v562_v22, %v560_v21 }
 0x1be   :  { %3585 = vmatmul.msk.bf16.vlgmr.msra.gmra.mxu2 %vm570_vm2, %v4854_v20 }
 0x1ce   :  { %3586 = vmatmul.msk.bf16.gmra.mxu2 %vm570_vm2, %v4858_v23 }
 0x241   :  { %v590_v25 = vpop.f32.mrf.mxu2 }
 0x242   :  { %v591_v27 = vadd.f32 %v3839_v26, %v590_v25 }
 0x244   :  { %v600_v30 = vmax.f32 %v591_v27, 0.0 }
 0x249   :  { %v592_v28 = vpop.f32.mrf.mxu2 }
 0x24a   :  { %v593_v29 = vadd.f32 %v3839_v26, %v592_v28 }
 0x24c   :  { %v601_v31 = vmax.f32 %v593_v29, 0.0 }
 0x24e   :  { %v604_v32 = vpack.c.bf16 %v601_v31, %v600_v30 }
 0x250   :  { %3591 = vmatmul.msk.bf16.vlgmr.msra.gmra.mxu3 %vm519_vm0, %v604_v32 }
 0x251   :  { %v595_v33 = vpop.f32.mrf.mxu2 }
 0x252   :  { %v596_v34 = vadd.f32 %v3839_v26, %v595_v33 }
 0x254   :  { %v602_v37 = vmax.f32 %v596_v34, 0.0 }
 0x259   :  { %v597_v35 = vpop.f32.mrf.mxu2 }
 0x25a   :  { %v598_v36 = vadd.f32 %v3839_v26, %v597_v35 }
 0x25c   :  { %v603_v38 = vmax.f32 %v598_v36, 0.0 }
 0x25e   :  { %v605_v39 = vpack.c.bf16 %v603_v38, %v602_v37 }
 0x260   :  { %3592 = vmatmul.msk.bf16.gmra.mxu3 %vm519_vm0, %v605_v39 }
 0x2d3   :  { %v630_v42 = vpop.f32.mrf.mxu3 }
 0x2d4   :  { %v631_v48 = vadd.f32 %v3840_v46, %v630_v42 }
 0x2d6   :  { %v640_v52 = vsel %vm519_vm0, %v631_v48, 0.0 }
 0x2db   :  { %v632_v45 = vpop.f32.mrf.mxu3 }
 0x2dc   :  { %v633_v57 = vadd.f32 %v3840_v46, %v632_v45 }
 0x2de   :  { %v643_v0 = vsel %vm519_vm0, %v633_v57, 0.0 }
 0x2e3   :  { %v635_v50 = vpop.f32.mrf.mxu3 }
 0x2e4   :  { %v636_v51 = vadd.f32 %v3840_v46, %v635_v50 }
 0x2e6   :  { %v641_v53 = vsel %vm519_vm0, %v636_v51, 0.0 }
 0x2e7   :  { %v642_v55 = vadd.f32 %v641_v53, %v640_v52 }
 0x2e9   :  { %v653_v56 = vmul.f32 %v4869_v54, %v642_v55 }
 0x2eb   :  { %v4872_v58 = vsub.f32 %v636_v51, %v653_v56  ;;  %v637_v59 = vpop.f32.mrf.mxu3  ;;  %v655_v60 = vsub.f32 %v631_v48, %v653_v56 }
 0x2ec   :  { %v638_v61 = vadd.f32 %v3840_v46, %v637_v59 }
 0x2ed   :  { %v661_v62 = vmul.f32 %v4872_v58, %v4872_v58  ;;  %v659_v63 = vmul.f32 %v655_v60, %v655_v60 }
 0x2ee   :  { %v644_v1 = vsel %vm519_vm0, %v638_v61, 0.0 }
 0x2ef   :  { %v664_v2 = vsel %vm519_vm0, %v661_v62, 0.0  ;;  %v645_v3 = vadd.f32 %v644_v1, %v643_v0  ;;  %v663_v4 = vsel %vm519_vm0, %v659_v63, 0.0 }
 0x2f0   :  { %v665_v5 = vadd.f32 %v664_v2, %v663_v4 }
 0x2f1   :  { %v654_v6 = vmul.f32 %v4869_v54, %v645_v3 }
 0x2f2   :  { %3862 = vrsqrt.f32 %v665_v5  ;;  %vm676_vm4 = vcmp.eq.f32.partialorder %v665_v5, inf  ;;  %v679_v28 = vand.u32 2147483648, %v665_v5  ;;  %vm678_vm5 = vcmp.eq.f32.partialorder %v665_v5, 0.0 }
 0x2f3   :  { %v4881_v7 = vsub.f32 %v638_v61, %v654_v6  ;;  %v4883_v8 = vsub.f32 %v633_v57, %v654_v6 }
 0x2f5   :  { %v662_v9 = vmul.f32 %v4881_v7, %v4881_v7  ;;  %v660_v11 = vmul.f32 %v4883_v8, %v4883_v8 }
 0x2f7   :  { %v667_v12 = vsel %vm519_vm0, %v662_v9, 0.0  ;;  %v666_v13 = vsel %vm519_vm0, %v660_v11, 0.0 }
 0x2f8   :  { %v3863_v15 = vpop.eup %3862  ;;  %v668_v16 = vadd.f32 %v667_v12, %v666_v13  ;;  %v4458_v12 = vmov 32.0  }
 0x2f9   :  { %v670_v17 = vmul.f32 %v3863_v15, %v665_v5 }
 0x2fa   :  { %3864 = vrsqrt.f32 %v668_v16  ;;  %vm688_vm6 = vcmp.eq.f32.partialorder %v668_v16, inf  ;;  %v691_v36 = vand.u32 2147483648, %v668_v16  ;;  %vm690_vm7 = vcmp.eq.f32.partialorder %v668_v16, 0.0 }
 0x2fb   :  { %v671_v18 = vmul.f32 %v3863_v15, %v670_v17 }
 0x2fd   :  { %v672_v19 = vmul.f32 0.5, %v671_v18 }
 0x2ff   :  { %v673_v21 = vsub.f32 1.5, %v672_v19 }
 0x300   :  { %v3865_v22 = vpop.eup %3864 }
 0x301   :  { %v674_v24 = vmul.f32 %v3863_v15, %v673_v21  ;;  %v682_v25 = vmul.f32 %v3865_v22, %v668_v16 }
 0x303   :  { %v675_v26 = vmul.f32 %v674_v24, %v665_v5  ;;  %v683_v27 = vmul.f32 %v3865_v22, %v682_v25 }
 0x305   :  { %v677_v29 = vsel %vm676_vm4, %v665_v5, %v675_v26  ;;  %v684_v30 = vmul.f32 0.5, %v683_v27 }
 0x306   :  { %v680_v31 = vsel %vm678_vm5, %v679_v28, %v677_v29 }
 0x307   :  { %3866 = vrcp.f32 %v680_v31  ;;  %v685_v32 = vsub.f32 1.5, %v684_v30  ;;  %v704_v41 = vand.u32 2147483648, %v680_v31  ;;  %v702_v43 = vand.u32 2147483647, %v680_v31 }
 0x308   :  { %vm698_vm9 = vweird.f32 %v680_v31 }
 0x309   :  { %v686_v33 = vmul.f32 %v3865_v22, %v685_v32  ;;  %v705_v45 = vor.u32 1.1754944e-38, %v704_v41  ;;  %vm703_vm11 = vcmp.eq.f32.partialorder %v702_v43, 8.507059e+37 }
 0x30b   :  { %v687_v34 = vmul.f32 %v686_v33, %v668_v16 }
 0x30d   :  { %v3867_v35 = vpop.eup %3866  ;;  %v689_v38 = vsel %vm688_vm6, %v668_v16, %v687_v34 }
 0x30e   :  { %v694_v37 = vmul.f32 %v3867_v35, %v680_v31  ;;  %v692_v39 = vsel %vm690_vm7, %v691_v36, %v689_v38  ;;  %vm699_vm8 = vweird.f32 %v3867_v35 }
 0x30f   :  { %3868 = vrcp.f32 %v692_v39  ;;  %vm700_vm10 = vmor %vm698_vm9, %vm699_vm8  ;;  %v719_v56 = vand.u32 2147483648, %v692_v39  ;;  %v717_v59 = vand.u32 2147483647, %v692_v39  ;;  %vm713_vm13 = vweird.f32 %v692_v39 }
 0x310   :  { %v695_v40 = vsub.f32 1.0, %v694_v37  ;;  %3870 = vrcp.f32 %v4458_v12  ;;  %v3747_v12 = vld [vmem:[#allocation2] sm:$0xff] }
 0x311   :  { %v720_v1 = vor.u32 1.1754944e-38, %v719_v56  ;;  %vm718_vm15 = vcmp.eq.f32.partialorder %v717_v59, 8.507059e+37 }
 0x312   :  { %v696_v42 = vmul.f32 %v3867_v35, %v695_v40 }
 0x314   :  { %v697_v44 = vadd.f32 %v3867_v35, %v696_v42 }
 0x315   :  { %v3869_v46 = vpop.eup %3868 }
 0x316   :  { %v701_v47 = vsel %vm700_vm10, %v3867_v35, %v697_v44  ;;  %v709_v49 = vmul.f32 %v3869_v46, %v692_v39  ;;  %vm714_vm12 = vweird.f32 %v3869_v46  ;;  %v3871_v13 = vpop.eup %3870 }
 0x317   :  { %v706_v48 = vsel %vm703_vm11, %v705_v45, %v701_v47  ;;  %vm715_vm14 = vmor %vm713_vm13, %vm714_vm12  ;;  %v740_v15 = vmul.f32 32.0, %v3871_v13  ;;  %vm744_vm3 = vweird.f32 %v3871_v13 }
 0x318   :  { %v707_v50 = vmul.f32 %v706_v48, %v655_v60  ;;  %v723_v51 = vmul.f32 %v706_v48, %v4872_v58  ;;  %v710_v52 = vsub.f32 1.0, %v709_v49 }
 0x319   :  { %v741_v16 = vsub.f32 1.0, %v740_v15 }
 0x31a   :  { %v725_v53 = vmax.f32 %v707_v50, 0.0  ;;  %v727_v55 = vmax.f32 %v723_v51, 0.0  ;;  %v711_v57 = vmul.f32 %v3869_v46, %v710_v52 }
 0x31b   :  { %v742_v17 = vmul.f32 %v3871_v13, %v741_v16 }
 0x31c   :  { %v729_v61 = vsel %vm519_vm0, %v725_v53, 0.0  ;;  %v730_v62 = vsel %vm519_vm0, %v727_v55, 0.0  ;;  %v712_v0 = vadd.f32 %v3869_v46, %v711_v57 }
 0x31d   :  { %v731_v63 = vadd.f32 %v730_v62, %v729_v61  ;;  %v743_v18 = vadd.f32 %v3871_v13, %v742_v17 }
 0x31e   :  { %v716_v60 = vsel %vm715_vm14, %v3869_v46, %v712_v0 }
 0x31f   :  { %732 = vadd.xlane.f32.xlu0 %v731_v63  ;;  %v721_v58 = vsel %vm718_vm15, %v720_v1, %v716_v60  ;;  %v4898_v19 = vsel %vm744_vm3, %v3871_v13, %v743_v18  ;;  %v452_v13 = vld [vmem:[#allocation10] sm:$0xf] }
 0x320   :  { %v722_v2 = vmul.f32 %v721_v58, %v4883_v8  ;;  %v724_v3 = vmul.f32 %v721_v58, %v4881_v7  ;;  %v1289_v15 = vsel %vm577_vm1, %v452_v13, 0 }
 0x322   :  { %v726_v4 = vmax.f32 %v722_v2, 0.0  ;;  %v728_v5 = vmax.f32 %v724_v3, 0.0 }
 0x324   :  { %v734_v6 = vsel %vm519_vm0, %v726_v4, 0.0  ;;  %v735_v9 = vsel %vm519_vm0, %v728_v5, 0.0 }
 0x325   :  { %v736_v11 = vadd.f32 %v735_v9, %v734_v6 }
 0x327   :  { %737 = vadd.xlane.f32.xlu0 %v736_v11 }
 0x392   :  { %v733_v8 = vpop.xlane.xlu0 %732 }
 0x393   :  { %v746_v7 = vmul.f32 %v4898_v19, %v733_v8 }
 0x395   :  { %v748_v21 = vsub.f32 %v725_v53, %v746_v7  ;;  %v750_v22 = vsub.f32 %v727_v55, %v746_v7 }
 0x397   :  { %v752_v24 = vmul.f32 %v748_v21, %v748_v21  ;;  %v754_v25 = vmul.f32 %v750_v22, %v750_v22 }
 0x399   :  { %v756_v26 = vsel %vm519_vm0, %v752_v24, 0.0  ;;  %v757_v27 = vsel %vm519_vm0, %v754_v25, 0.0 }
 0x39a   :  { %v758_v28 = vadd.f32 %v757_v27, %v756_v26  ;;  %v738_v29 = vpop.xlane.xlu0 %737 }
 0x39b   :  { %v747_v30 = vmul.f32 %v4898_v19, %v738_v29  ;;  %v3751_v29 = vld [vmem:[#allocation11] sm:$0xff] }
 0x39c   :  { %759 = vadd.xlane.f32.xlu1 %v758_v28 }
 0x39d   :  { %v749_v31 = vsub.f32 %v726_v4, %v747_v30  ;;  %v751_v32 = vsub.f32 %v728_v5, %v747_v30 }
 0x39f   :  { %v753_v33 = vmul.f32 %v749_v31, %v749_v31  ;;  %v755_v34 = vmul.f32 %v751_v32, %v751_v32 }
 0x3a1   :  { %v761_v35 = vsel %vm519_vm0, %v753_v33, 0.0  ;;  %v762_v36 = vsel %vm519_vm0, %v755_v34, 0.0 }
 0x3a2   :  { %v763_v37 = vadd.f32 %v762_v36, %v761_v35 }
 0x3a4   :  { %764 = vadd.xlane.f32.xlu1 %v763_v37  ;;  %v3842_v37 = vld [vmem:[%s5640_s4] ss:$0 sm:$0xff] }
 0x40f   :  { %v760_v38 = vpop.xlane.xlu1 %759 }
 0x410   :  { %v766_v39 = vmul.f32 %v760_v38, %v4898_v19 }
 0x412   :  { %v768_v40 = vadd.f32 1e-05, %v766_v39 }
 0x414   :  { %3872 = vrsqrt.f32 %v768_v40  ;;  %vm776_vm5 = vweird.f32 %v768_v40 }
 0x417   :  { %v765_v41 = vpop.xlane.xlu1 %764 }
 0x418   :  { %v767_v42 = vmul.f32 %v765_v41, %v4898_v19 }
 0x41a   :  { %v3873_v43 = vpop.eup %3872  ;;  %v769_v45 = vadd.f32 1e-05, %v767_v42 }
 0x41b   :  { %v771_v44 = vmul.f32 %v3873_v43, %v768_v40  ;;  %vm777_vm4 = vweird.f32 %v3873_v43 }
 0x41c   :  { %3874 = vrsqrt.f32 %v769_v45  ;;  %vm778_vm6 = vmor %vm776_vm5, %vm777_vm4  ;;  %vm786_vm8 = vweird.f32 %v769_v45 }
 0x41d   :  { %v772_v46 = vmul.f32 %v3873_v43, %v771_v44 }
 0x41f   :  { %v773_v47 = vmul.f32 0.5, %v772_v46 }
 0x421   :  { %v774_v48 = vsub.f32 1.5, %v773_v47 }
 0x422   :  { %v3875_v49 = vpop.eup %3874 }
 0x423   :  { %v775_v50 = vmul.f32 %v3873_v43, %v774_v48  ;;  %v781_v51 = vmul.f32 %v3875_v49, %v769_v45  ;;  %vm787_vm7 = vweird.f32 %v3875_v49 }
 0x424   :  { %vm788_vm9 = vmor %vm786_vm8, %vm787_vm7 }
 0x425   :  { %v782_v52 = vmul.f32 %v3875_v49, %v781_v51  ;;  %v779_v55 = vsel %vm778_vm6, %v3873_v43, %v775_v50 }
 0x426   :  { %v4908_v57 = vmul.f32 %v779_v55, %v748_v21  ;;  %v4910_v59 = vmul.f32 %v779_v55, %v750_v22  ;;  %v3841_v22 = vld [vmem:[%s5639_s28] ss:$0 sm:$0xff] }
 0x427   :  { %v783_v53 = vmul.f32 0.5, %v782_v52 }
 0x428   :  { %v794_v0 = vpack.c.bf16 %v4908_v57, %v4908_v57  ;;  %v796_v60 = vpack.c.bf16 %v4910_v59, %v4910_v59 }
 0x429   :  { %v784_v56 = vsub.f32 1.5, %v783_v53  ;;  %v3843_v53 = vld [vmem:[%s5641_s14] ss:$0 sm:$0xff] }
 0x42a   :  { %v800_v3 = vunpack.c.l.b16 %v794_v0  ;;  %v820_v5 = vunpack.c.l.b16 %v796_v60 }
 0x42b   :  { %v785_v61 = vmul.f32 %v3875_v49, %v784_v56 }
 0x42d   :  { %v789_v62 = vsel %vm788_vm9, %v3875_v49, %v785_v61 }
 0x42e   :  { %v4912_v63 = vmul.f32 %v789_v62, %v749_v31  ;;  %v4916_v1 = vmul.f32 %v789_v62, %v751_v32 }
 0x430   :  { %v795_v58 = vpack.c.bf16 %v4912_v63, %v4912_v63  ;;  %v797_v2 = vpack.c.bf16 %v4916_v1, %v4916_v1 }
 0x432   :  { %v801_v4 = vunpack.c.l.b16 %v795_v58  ;;  %v821_v6 = vunpack.c.l.b16 %v797_v2 }
 0x434   :  { %v802_v9 = vpack.c.b16 %v801_v4, %v800_v3  ;;  %v822_v11 = vpack.c.b16 %v821_v6, %v820_v5 }
 0x436   :  { %811 = vmatpush.bf16.msrb.mxu0 %v802_v9  ;;  %831 = vmatpush.bf16.msrb.mxu1 %v822_v11 }
 0x439   :  { %3593 = vmatmul.msk.bf16.vlgmr.msrb.gmra.mxu0 %vm519_vm0, %v4843_v10  ;;  %3594 = vmatmul.msk.bf16.vlgmr.msrb.gmra.mxu1 %vm519_vm0, %v4846_v14  ;;  %v3748_v10 = vld [vmem:[#allocation5] sm:$0xff] }
 0x43a   :  { %862 = vmatpush.bf16.msra.mxu0 %v3747_v12  ;;  %902 = vmatpush.bf16.msra.mxu1 %v3748_v10 }
 0x43e   :  { %1298 = vmatpush.bf16.msrb.mxu0 %v1289_v15  ;;  %1338 = vmatpush.bf16.msrb.mxu1 %v3751_v29 }
 0x4b6   :  { %v813_v16 = vpop.f32.mrf.mxu0  ;;  %v833_v8 = vpop.f32.mrf.mxu1 }
 0x4be   :  { %v815_v17 = vpop.f32.mrf.mxu0  ;;  %v835_v7 = vpop.f32.mrf.mxu1 }
 0x4bf   :  { %v838_v18 = vpack.c.bf16 %v815_v17, %v813_v16  ;;  %v839_v21 = vpack.c.bf16 %v835_v7, %v833_v8 }
 0x4c1   :  { %3599 = vmatmul.msk.bf16.vlgmr.msra.gmra.mxu0 %vm519_vm0, %v838_v18 }
 0x4d1   :  { %3600 = vmatmul.msk.bf16.gmra.mxu0 %vm519_vm0, %v839_v21 }
 0x4e1   :  { %3621 = vmatmul.msk.bf16.vlgmr.msrb.gmra.mxu0 %vm570_vm2, %v4854_v20 }
 0x4f1   :  { %3622 = vmatmul.msk.bf16.gmra.mxu0 %vm570_vm2, %v4858_v23 }
 0x53e   :  { %v864_v14 = vpop.f32.mrf.mxu0 }
 0x53f   :  { %v865_v24 = vadd.f32 %v3841_v22, %v864_v14 }
 0x541   :  { %v874_v27 = vmax.f32 %v865_v24, 0.0 }
 0x546   :  { %v866_v25 = vpop.f32.mrf.mxu0 }
 0x547   :  { %v867_v26 = vadd.f32 %v3841_v22, %v866_v25 }
 0x549   :  { %v875_v28 = vmax.f32 %v867_v26, 0.0 }
 0x54b   :  { %v878_v30 = vpack.c.bf16 %v875_v28, %v874_v27 }
 0x54d   :  { %3605 = vmatmul.msk.bf16.vlgmr.msra.gmra.mxu1 %vm519_vm0, %v878_v30 }
 0x54e   :  { %v869_v31 = vpop.f32.mrf.mxu0 }
 0x54f   :  { %v870_v20 = vadd.f32 %v3841_v22, %v869_v31 }
 0x551   :  { %v876_v23 = vmax.f32 %v870_v20, 0.0  ;;  %v4971_v20 = vld [vmem:[%s5642_s24] ss:$0 sm:$0xff] }
 0x556   :  { %v871_v32 = vpop.f32.mrf.mxu0 }
 0x557   :  { %v872_v33 = vadd.f32 %v3841_v22, %v871_v32 }
 0x559   :  { %v877_v34 = vmax.f32 %v872_v33, 0.0 }
 0x55b   :  { %v879_v35 = vpack.c.bf16 %v877_v34, %v876_v23 }
 0x55d   :  { %3606 = vmatmul.msk.bf16.gmra.mxu1 %vm519_vm0, %v879_v35 }
 0x55e   :  { %v1300_v36 = vpop.f32.mrf.mxu0 }
 0x55f   :  { %v1301_v38 = vadd.f32 %v3842_v37, %v1300_v36 }
 0x561   :  { %v1310_v41 = vmax.f32 %v1301_v38, 0.0 }
 0x566   :  { %v1302_v39 = vpop.f32.mrf.mxu0 }
 0x567   :  { %v1303_v40 = vadd.f32 %v3842_v37, %v1302_v39 }
 0x569   :  { %v1311_v42 = vmax.f32 %v1303_v40, 0.0 }
 0x56b   :  { %v1314_v43 = vpack.c.bf16 %v1311_v42, %v1310_v41 }
 0x56d   :  { %3627 = vmatmul.msk.bf16.vlgmr.msrb.gmra.mxu1 %vm519_vm0, %v1314_v43 }
 0x56e   :  { %v1305_v44 = vpop.f32.mrf.mxu0 }
 0x56f   :  { %v1306_v45 = vadd.f32 %v3842_v37, %v1305_v44 }
 0x571   :  { %v1312_v48 = vmax.f32 %v1306_v45, 0.0 }
 0x576   :  { %v1307_v46 = vpop.f32.mrf.mxu0 }
 0x577   :  { %v1308_v47 = vadd.f32 %v3842_v37, %v1307_v46 }
 0x579   :  { %v1313_v49 = vmax.f32 %v1308_v47, 0.0 }
 0x57b   :  { %v1315_v50 = vpack.c.bf16 %v1313_v49, %v1312_v48 }
 0x57d   :  { %3628 = vmatmul.msk.bf16.gmra.mxu1 %vm519_vm0, %v1315_v50 }
 0x5ca   :  { %v904_v51 = vpop.f32.mrf.mxu1 }
 0x5cb   :  { %v905_v55 = vadd.f32 %v3843_v53, %v904_v51 }
 0x5cd   :  { %v914_v62 = vsel %vm519_vm0, %v905_v55, 0.0 }
 0x5d2   :  { %v906_v52 = vpop.f32.mrf.mxu1 }
 0x5d3   :  { %v907_v2 = vadd.f32 %v3843_v53, %v906_v52 }
 0x5d5   :  { %v917_v12 = vsel %vm519_vm0, %v907_v2, 0.0 }
 0x5da   :  { %v909_v56 = vpop.f32.mrf.mxu1 }
 0x5db   :  { %v910_v61 = vadd.f32 %v3843_v53, %v909_v56 }
 0x5dd   :  { %v915_v0 = vsel %vm519_vm0, %v910_v61, 0.0 }
 0x5de   :  { %v916_v60 = vadd.f32 %v915_v0, %v914_v62 }
 0x5e0   :  { %v920_v58 = vmul.f32 %v916_v60, %v4869_v54 }
 0x5e2   :  { %v4945_v3 = vsub.f32 %v910_v61, %v920_v58  ;;  %v911_v4 = vpop.f32.mrf.mxu1  ;;  %v4947_v5 = vsub.f32 %v905_v55, %v920_v58 }
 0x5e3   :  { %v912_v6 = vadd.f32 %v3843_v53, %v911_v4 }
 0x5e4   :  { %v928_v9 = vmul.f32 %v4945_v3, %v4945_v3  ;;  %v926_v11 = vmul.f32 %v4947_v5, %v4947_v5 }
 0x5e5   :  { %v918_v13 = vsel %vm519_vm0, %v912_v6, 0.0 }
 0x5e6   :  { %v931_v15 = vsel %vm519_vm0, %v928_v9, 0.0  ;;  %v919_v16 = vadd.f32 %v918_v13, %v917_v12  ;;  %v930_v17 = vsel %vm519_vm0, %v926_v11, 0.0 }
 0x5e7   :  { %v932_v18 = vadd.f32 %v931_v15, %v930_v17 }
 0x5e8   :  { %v921_v8 = vmul.f32 %v919_v16, %v4869_v54 }
 0x5e9   :  { %3876 = vrsqrt.f32 %v932_v18  ;;  %vm943_vm2 = vcmp.eq.f32.partialorder %v932_v18, inf  ;;  %v946_v40 = vand.u32 2147483648, %v932_v18  ;;  %vm945_vm10 = vcmp.eq.f32.partialorder %v932_v18, 0.0 }
 0x5ea   :  { %v4958_v7 = vsub.f32 %v912_v6, %v921_v8  ;;  %v1340_v21 = vpop.f32.mrf.mxu1  ;;  %v4960_v10 = vsub.f32 %v907_v2, %v921_v8 }
 0x5eb   :  { %v1341_v35 = vadd.f32 %v4971_v20, %v1340_v21 }
 0x5ec   :  { %v929_v14 = vmul.f32 %v4958_v7, %v4958_v7  ;;  %v927_v22 = vmul.f32 %v4960_v10, %v4960_v10 }
 0x5ed   :  { %v1350_v43 = vsel %vm519_vm0, %v1341_v35, 0.0 }
 0x5ee   :  { %v934_v24 = vsel %vm519_vm0, %v929_v14, 0.0  ;;  %v933_v25 = vsel %vm519_vm0, %v927_v22, 0.0 }
 0x5ef   :  { %v3877_v26 = vpop.eup %3876  ;;  %v935_v27 = vadd.f32 %v934_v24, %v933_v25 }
 0x5f0   :  { %v937_v28 = vmul.f32 %v3877_v26, %v932_v18 }
 0x5f1   :  { %3878 = vrsqrt.f32 %v935_v27  ;;  %vm955_vm11 = vcmp.eq.f32.partialorder %v935_v27, inf  ;;  %v958_v61 = vand.u32 2147483648, %v935_v27  ;;  %vm957_vm12 = vcmp.eq.f32.partialorder %v935_v27, 0.0 }
 0x5f2   :  { %v4968_v29 = vpop.f32.mrf.mxu1  ;;  %v938_v30 = vmul.f32 %v3877_v26, %v937_v28 }
 0x5f4   :  { %v939_v31 = vmul.f32 0.5, %v938_v30 }
 0x5f6   :  { %v940_v32 = vsub.f32 1.5, %v939_v31 }
 0x5f7   :  { %v3879_v33 = vpop.eup %3878 }
 0x5f8   :  { %v941_v23 = vmul.f32 %v3877_v26, %v940_v32  ;;  %v949_v34 = vmul.f32 %v3879_v33, %v935_v27 }
 0x5fa   :  { %v1345_v36 = vpop.f32.mrf.mxu1  ;;  %v942_v37 = vmul.f32 %v941_v23, %v932_v18  ;;  %v950_v38 = vmul.f32 %v3879_v33, %v949_v34 }
 0x5fb   :  { %v1346_v39 = vadd.f32 %v4971_v20, %v1345_v36 }
 0x5fc   :  { %v944_v41 = vsel %vm943_vm2, %v932_v18, %v942_v37  ;;  %v951_v42 = vmul.f32 0.5, %v950_v38 }
 0x5fd   :  { %v1351_v44 = vsel %vm519_vm0, %v1346_v39, 0.0  ;;  %v947_v45 = vsel %vm945_vm10, %v946_v40, %v944_v41 }
 0x5fe   :  { %v1352_v46 = vadd.f32 %v1351_v44, %v1350_v43  ;;  %3880 = vrcp.f32 %v947_v45  ;;  %v952_v47 = vsub.f32 1.5, %v951_v42  ;;  %v971_v9 = vand.u32 2147483648, %v947_v45 }
 0x5ff   :  { %v969_v12 = vand.u32 2147483647, %v947_v45  ;;  %vm965_vm14 = vweird.f32 %v947_v45 }
 0x600   :  { %v1356_v48 = vmul.f32 %v1352_v46, %v4869_v54  ;;  %v953_v49 = vmul.f32 %v3879_v33, %v952_v47  ;;  %v972_v16 = vor.u32 1.1754944e-38, %v971_v9 }
 0x601   :  { %vm970_vm3 = vcmp.eq.f32.partialorder %v969_v12, 8.507059e+37 }
 0x602   :  { %v4978_v50 = vsub.f32 %v1341_v35, %v1356_v48  ;;  %v4980_v51 = vsub.f32 %v1346_v39, %v1356_v48  ;;  %v954_v52 = vmul.f32 %v953_v49, %v935_v27 }
 0x604   :  { %v3881_v53 = vpop.eup %3880  ;;  %v1362_v55 = vmul.f32 %v4978_v50, %v4978_v50  ;;  %v1364_v56 = vmul.f32 %v4980_v51, %v4980_v51  ;;  %v956_v0 = vsel %vm955_vm11, %v935_v27, %v954_v52 }
 0x605   :  { %v961_v62 = vmul.f32 %v3881_v53, %v947_v45  ;;  %v959_v2 = vsel %vm957_vm12, %v958_v61, %v956_v0  ;;  %vm966_vm13 = vweird.f32 %v3881_v53 }
 0x606   :  { %v1366_v60 = vsel %vm519_vm0, %v1362_v55, 0.0  ;;  %v1367_v58 = vsel %vm519_vm0, %v1364_v56, 0.0  ;;  %3882 = vrcp.f32 %v959_v2  ;;  %vm967_vm15 = vmor %vm965_vm14, %vm966_vm13  ;;  %v984_v26 = vand.u32 2147483647, %v959_v2  ;;  %v1347_v56 = vpop.f32.mrf.mxu1 }
 0x607   :  { %v1368_v4 = vadd.f32 %v1367_v58, %v1366_v60  ;;  %v962_v6 = vsub.f32 1.0, %v961_v62  ;;  %v986_v27 = vand.u32 2147483648, %v959_v2  ;;  %vm980_vm5 = vweird.f32 %v959_v2 }
 0x608   :  { %vm985_vm7 = vcmp.eq.f32.partialorder %v984_v26, 8.507059e+37  ;;  %v1348_v60 = vadd.f32 %v4971_v20, %v1347_v56 }
 0x609   :  { %3884 = vrsqrt.f32 %v1368_v4  ;;  %v963_v11 = vmul.f32 %v3881_v53, %v962_v6  ;;  %v987_v35 = vor.u32 1.1754944e-38, %v986_v27  ;;  %vm1379_vm8 = vcmp.eq.f32.partialorder %v1368_v4, inf }
 0x60a   :  { %v1382_v45 = vand.u32 2147483648, %v1368_v4  ;;  %vm1381_vm9 = vcmp.eq.f32.partialorder %v1368_v4, 0.0 }
 0x60b   :  { %v964_v13 = vadd.f32 %v3881_v53, %v963_v11  ;;  %v1354_v11 = vsel %vm519_vm0, %v1348_v60, 0.0 }
 0x60c   :  { %v3883_v15 = vpop.eup %3882 }
 0x60d   :  { %v968_v17 = vsel %vm967_vm15, %v3881_v53, %v964_v13  ;;  %v976_v18 = vmul.f32 %v3883_v15, %v959_v2  ;;  %vm981_vm4 = vweird.f32 %v3883_v15  ;;  %v1343_v2 = vadd.f32 %v4971_v20, %v4968_v29 }
 0x60e   :  { %v973_v21 = vsel %vm970_vm3, %v972_v16, %v968_v17  ;;  %vm982_vm6 = vmor %vm980_vm5, %vm981_vm4 }
 0x60f   :  { %v3885_v8 = vpop.eup %3884  ;;  %v4989_v22 = vmul.f32 %v973_v21, %v4947_v5  ;;  %v4992_v24 = vmul.f32 %v973_v21, %v4945_v3  ;;  %v977_v25 = vsub.f32 1.0, %v976_v18  ;;  %v1353_v13 = vsel %vm519_vm0, %v1343_v2, 0.0 }
 0x610   :  { %v1373_v14 = vmul.f32 %v3885_v8, %v1368_v4  ;;  %v1355_v17 = vadd.f32 %v1354_v11, %v1353_v13 }
 0x611   :  { %v992_v30 = vmax.f32 %v4989_v22, 0.0  ;;  %v994_v31 = vmax.f32 %v4992_v24, 0.0  ;;  %v978_v32 = vmul.f32 %v3883_v15, %v977_v25 }
 0x612   :  { %v1374_v28 = vmul.f32 %v3885_v8, %v1373_v14  ;;  %v1357_v18 = vmul.f32 %v1355_v17, %v4869_v54 }
 0x613   :  { %v996_v5 = vsel %vm519_vm0, %v992_v30, 0.0  ;;  %v997_v3 = vsel %vm519_vm0, %v994_v31, 0.0  ;;  %v979_v23 = vadd.f32 %v3883_v15, %v978_v32 }
 0x614   :  { %v1375_v33 = vmul.f32 0.5, %v1374_v28  ;;  %v998_v34 = vadd.f32 %v997_v3, %v996_v5 }
 0x615   :  { %v983_v37 = vsel %vm982_vm6, %v3883_v15, %v979_v23 }
 0x616   :  { %v1376_v36 = vsub.f32 1.5, %v1375_v33  ;;  %999 = vadd.xlane.f32.xlu2 %v998_v34  ;;  %v988_v38 = vsel %vm985_vm7, %v987_v35, %v983_v37 }
 0x617   :  { %v5003_v40 = vmul.f32 %v988_v38, %v4960_v10  ;;  %v5006_v41 = vmul.f32 %v988_v38, %v4958_v7 }
 0x618   :  { %v1377_v39 = vmul.f32 %v3885_v8, %v1376_v36  ;;  %v1359_v8 = vsub.f32 %v1343_v2, %v1357_v18 }
 0x619   :  { %v993_v43 = vmax.f32 %v5003_v40, 0.0  ;;  %v995_v44 = vmax.f32 %v5006_v41, 0.0 }
 0x61a   :  { %v1378_v42 = vmul.f32 %v1377_v39, %v1368_v4  ;;  %v1363_v14 = vmul.f32 %v1359_v8, %v1359_v8 }
 0x61b   :  { %v1001_v47 = vsel %vm519_vm0, %v993_v43, 0.0  ;;  %v1002_v10 = vsel %vm519_vm0, %v995_v44, 0.0 }
 0x61c   :  { %v1380_v46 = vsel %vm1379_vm8, %v1368_v4, %v1378_v42  ;;  %v1003_v7 = vadd.f32 %v1002_v10, %v1001_v47  ;;  %v1369_v26 = vsel %vm519_vm0, %v1363_v14, 0.0 }
 0x61d   :  { %v1383_v48 = vsel %vm1381_vm9, %v1382_v45, %v1380_v46 }
 0x61e   :  { %3886 = vrcp.f32 %v1383_v48  ;;  %1004 = vadd.xlane.f32.xlu2 %v1003_v7  ;;  %v1407_v55 = vand.u32 2147483648, %v1383_v48  ;;  %v1405_v62 = vand.u32 2147483647, %v1383_v48  ;;  %vm1401_vm10 = vweird.f32 %v1383_v48 }
 0x620   :  { %v1408_v58 = vor.u32 1.1754944e-38, %v1407_v55  ;;  %vm1406_vm12 = vcmp.eq.f32.partialorder %v1405_v62, 8.507059e+37 }
 0x624   :  { %v3887_v49 = vpop.eup %3886 }
 0x625   :  { %v1397_v52 = vmul.f32 %v3887_v49, %v1383_v48  ;;  %vm1402_vm2 = vweird.f32 %v3887_v49 }
 0x626   :  { %vm1403_vm11 = vmor %vm1401_vm10, %vm1402_vm2 }
 0x627   :  { %v1398_v53 = vsub.f32 1.0, %v1397_v52 }
 0x629   :  { %v1399_v61 = vmul.f32 %v3887_v49, %v1398_v53 }
 0x62b   :  { %v1400_v0 = vadd.f32 %v3887_v49, %v1399_v61 }
 0x62d   :  { %v1404_v4 = vsel %vm1403_vm11, %v3887_v49, %v1400_v0 }
 0x62e   :  { %v1409_v6 = vsel %vm1406_vm12, %v1408_v58, %v1404_v4 }
 0x62f   :  { %v5020_v9 = vmul.f32 %v1409_v6, %v4980_v51  ;;  %v5024_v12 = vmul.f32 %v1409_v6, %v4978_v50  ;;  %v1361_v50 = vsub.f32 %v1348_v60, %v1357_v18 }
 0x631   :  { %v1428_v15 = vmax.f32 %v5024_v12, 0.0  ;;  %v1430_v16 = vmax.f32 %v5020_v9, 0.0  ;;  %v1365_v21 = vmul.f32 %v1361_v50, %v1361_v50 }
 0x633   :  { %v1432_v29 = vsel %vm519_vm0, %v1428_v15, 0.0  ;;  %v1433_v20 = vsel %vm519_vm0, %v1430_v16, 0.0  ;;  %v1370_v25 = vsel %vm519_vm0, %v1365_v21, 0.0 }
 0x634   :  { %v1434_v51 = vadd.f32 %v1433_v20, %v1432_v29  ;;  %v1371_v27 = vadd.f32 %v1370_v25, %v1369_v26 }
 0x636   :  { %1435 = vadd.xlane.f32.xlu2 %v1434_v51  ;;  %3888 = vrsqrt.f32 %v1371_v27  ;;  %vm1391_vm13 = vcmp.eq.f32.partialorder %v1371_v27, inf  ;;  %v1394_v36 = vand.u32 2147483648, %v1371_v27  ;;  %vm1393_vm14 = vcmp.eq.f32.partialorder %v1371_v27, 0.0 }
 0x63c   :  { %v3889_v28 = vpop.eup %3888 }
 0x63d   :  { %v1385_v32 = vmul.f32 %v3889_v28, %v1371_v27 }
 0x63f   :  { %v1386_v33 = vmul.f32 %v3889_v28, %v1385_v32 }
 0x641   :  { %v1387_v5 = vmul.f32 0.5, %v1386_v33 }
 0x643   :  { %v1388_v3 = vsub.f32 1.5, %v1387_v5 }
 0x645   :  { %v1389_v23 = vmul.f32 %v3889_v28, %v1388_v3 }
 0x647   :  { %v1390_v34 = vmul.f32 %v1389_v23, %v1371_v27 }
 0x649   :  { %v1392_v35 = vsel %vm1391_vm13, %v1371_v27, %v1390_v34 }
 0x64a   :  { %v1395_v37 = vsel %vm1393_vm14, %v1394_v36, %v1392_v35 }
 0x64b   :  { %3890 = vrcp.f32 %v1395_v37  ;;  %v1422_v47 = vand.u32 2147483648, %v1395_v37  ;;  %vm1416_vm3 = vweird.f32 %v1395_v37  ;;  %v1420_v10 = vand.u32 2147483647, %v1395_v37 }
 0x64d   :  { %v1423_v49 = vor.u32 1.1754944e-38, %v1422_v47  ;;  %vm1421_vm5 = vcmp.eq.f32.partialorder %v1420_v10, 8.507059e+37 }
 0x651   :  { %v3891_v38 = vpop.eup %3890 }
 0x652   :  { %v1412_v39 = vmul.f32 %v3891_v38, %v1395_v37  ;;  %vm1417_vm15 = vweird.f32 %v3891_v38 }
 0x653   :  { %vm1418_vm4 = vmor %vm1416_vm3, %vm1417_vm15 }
 0x654   :  { %v1413_v42 = vsub.f32 1.0, %v1412_v39 }
 0x656   :  { %v1414_v45 = vmul.f32 %v3891_v38, %v1413_v42 }
 0x658   :  { %v1415_v46 = vadd.f32 %v3891_v38, %v1414_v45 }
 0x65a   :  { %v1419_v48 = vsel %vm1418_vm4, %v3891_v38, %v1415_v46  ;;  %vm1174_vm4 = vcmask 195584  }
 0x65b   :  { %v1424_v53 = vsel %vm1421_vm5, %v1423_v49, %v1419_v48 }
 0x65c   :  { %v1425_v0 = vmul.f32 %v1424_v53, %v1359_v8  ;;  %v1427_v60 = vmul.f32 %v1424_v53, %v1361_v50 }
 0x65e   :  { %v1429_v6 = vmax.f32 %v1425_v0, 0.0  ;;  %v1431_v24 = vmax.f32 %v1427_v60, 0.0 }
 0x660   :  { %v1437_v13 = vsel %vm519_vm0, %v1429_v6, 0.0  ;;  %v1438_v17 = vsel %vm519_vm0, %v1431_v24, 0.0 }
 0x689   :  { %v1000_v7 = vpop.xlane.xlu2 %999 }
 0x68a   :  { %v1006_v52 = vmul.f32 %v1000_v7, %v4898_v19 }
 0x68c   :  { %v5041_v55 = vsub.f32 %v992_v30, %v1006_v52  ;;  %v5045_v56 = vsub.f32 %v994_v31, %v1006_v52 }
 0x68e   :  { %v1012_v61 = vmul.f32 %v5041_v55, %v5041_v55  ;;  %v1014_v62 = vmul.f32 %v5045_v56, %v5045_v56 }
 0x690   :  { %v1016_v58 = vsel %vm519_vm0, %v1012_v61, 0.0  ;;  %v1017_v2 = vsel %vm519_vm0, %v1014_v62, 0.0 }
 0x691   :  { %v1005_v4 = vpop.xlane.xlu2 %1004  ;;  %v1018_v22 = vadd.f32 %v1017_v2, %v1016_v58 }
 0x692   :  { %v1007_v30 = vmul.f32 %v1005_v4, %v4898_v19 }
 0x693   :  { %1019 = vadd.xlane.f32.xlu0 %v1018_v22 }
 0x694   :  { %v5056_v31 = vsub.f32 %v993_v43, %v1007_v30  ;;  %v5060_v11 = vsub.f32 %v995_v44, %v1007_v30  ;;  %v1439_v43 = vadd.f32 %v1438_v17, %v1437_v13 }
 0x696   :  { %v1013_v29 = vmul.f32 %v5056_v31, %v5056_v31  ;;  %v1015_v20 = vmul.f32 %v5060_v11, %v5060_v11 }
 0x698   :  { %v1021_v51 = vsel %vm519_vm0, %v1013_v29, 0.0  ;;  %v1022_v40 = vsel %vm519_vm0, %v1015_v20, 0.0  ;;  %v5119_v20 = vld [vmem:[%s5634_s23] sm:$0xff] }
 0x699   :  { %v1023_v18 = vadd.f32 %v1022_v40, %v1021_v51 }
 0x69b   :  { %1440 = vadd.xlane.f32.xlu0 %v1439_v43  ;;  %1024 = vadd.xlane.f32.xlu1 %v1023_v18  ;;  %v3749_v18 = vld [vmem:[#allocation7] sm:$0xff] }
 0x6a9   :  { %v1436_v41 = vpop.xlane.xlu2 %1435 }
 0x6aa   :  { %v1442_v44 = vmul.f32 %v1436_v41, %v4898_v19  ;;  %v3750_v41 = vld [vmem:[#allocation8] sm:$0xff] }
 0x6ac   :  { %v5073_v50 = vsub.f32 %v1428_v15, %v1442_v44  ;;  %v5077_v8 = vsub.f32 %v1430_v16, %v1442_v44 }
 0x6ae   :  { %v1448_v21 = vmul.f32 %v5073_v50, %v5073_v50  ;;  %v1450_v14 = vmul.f32 %v5077_v8, %v5077_v8 }
 0x6b0   :  { %v1452_v25 = vsel %vm519_vm0, %v1448_v21, 0.0  ;;  %v1453_v26 = vsel %vm519_vm0, %v1450_v14, 0.0 }
 0x6b1   :  { %v1454_v27 = vadd.f32 %v1453_v26, %v1452_v25 }
 0x6b3   :  { %1455 = vadd.xlane.f32.xlu1 %v1454_v27 }
 0x706   :  { %v1020_v28 = vpop.xlane.xlu0 %1019 }
 0x707   :  { %v1026_v12 = vmul.f32 %v1020_v28, %v4898_v19 }
 0x709   :  { %v1028_v15 = vadd.f32 1e-05, %v1026_v12 }
 0x70b   :  { %3892 = vrsqrt.f32 %v1028_v15  ;;  %vm1036_vm7 = vweird.f32 %v1028_v15 }
 0x70e   :  { %v1441_v9 = vpop.xlane.xlu0 %1440  ;;  %v1025_v16 = vpop.xlane.xlu1 %1024 }
 0x70f   :  { %v1443_v32 = vmul.f32 %v1441_v9, %v4898_v19  ;;  %v1027_v33 = vmul.f32 %v1025_v16, %v4898_v19 }
 0x711   :  { %v3893_v5 = vpop.eup %3892  ;;  %v5088_v3 = vsub.f32 %v1429_v6, %v1443_v32  ;;  %v5090_v23 = vsub.f32 %v1431_v24, %v1443_v32  ;;  %v1029_v34 = vadd.f32 1e-05, %v1027_v33 }
 0x712   :  { %v1031_v35 = vmul.f32 %v3893_v5, %v1028_v15  ;;  %vm1037_vm6 = vweird.f32 %v3893_v5 }
 0x713   :  { %3894 = vrsqrt.f32 %v1029_v34  ;;  %v1449_v36 = vmul.f32 %v5088_v3, %v5088_v3  ;;  %v1451_v37 = vmul.f32 %v5090_v23, %v5090_v23  ;;  %vm1038_vm8 = vmor %vm1036_vm7, %vm1037_vm6  ;;  %vm1046_vm2 = vweird.f32 %v1029_v34 }
 0x714   :  { %v1032_v38 = vmul.f32 %v3893_v5, %v1031_v35 }
 0x715   :  { %v1457_v39 = vsel %vm519_vm0, %v1449_v36, 0.0  ;;  %v1458_v42 = vsel %vm519_vm0, %v1451_v37, 0.0 }
 0x716   :  { %v1033_v45 = vmul.f32 0.5, %v1032_v38  ;;  %v1459_v46 = vadd.f32 %v1458_v42, %v1457_v39 }
 0x718   :  { %v1034_v47 = vsub.f32 1.5, %v1033_v45  ;;  %1460 = vadd.xlane.f32.xlu2 %v1459_v46 }
 0x719   :  { %v3895_v10 = vpop.eup %3894 }
 0x71a   :  { %v1035_v48 = vmul.f32 %v3893_v5, %v1034_v47  ;;  %v1041_v7 = vmul.f32 %v3895_v10, %v1029_v34  ;;  %vm1047_vm9 = vweird.f32 %v3895_v10 }
 0x71b   :  { %vm1048_vm10 = vmor %vm1046_vm2, %vm1047_vm9 }
 0x71c   :  { %v1042_v49 = vmul.f32 %v3895_v10, %v1041_v7  ;;  %v1039_v53 = vsel %vm1038_vm8, %v3893_v5, %v1035_v48 }
 0x71d   :  { %v5099_v62 = vmul.f32 %v1039_v53, %v5041_v55  ;;  %v5102_v0 = vmul.f32 %v1039_v53, %v5045_v56 }
 0x71e   :  { %v1043_v52 = vmul.f32 0.5, %v1042_v49 }
 0x71f   :  { %v1054_v4 = vpack.c.bf16 %v5099_v62, %v5099_v62  ;;  %v1056_v55 = vpack.c.bf16 %v5102_v0, %v5102_v0 }
 0x720   :  { %v1044_v61 = vsub.f32 1.5, %v1043_v52 }
 0x721   :  { %v1060_v6 = vunpack.c.l.b16 %v1054_v4 }
 0x722   :  { %v1045_v60 = vmul.f32 %v3895_v10, %v1044_v61 }
 0x724   :  { %v1049_v58 = vsel %vm1048_vm10, %v3895_v10, %v1045_v60 }
 0x725   :  { %v5105_v2 = vmul.f32 %v1049_v58, %v5056_v31  ;;  %v5110_v22 = vmul.f32 %v1049_v58, %v5060_v11  ;;  %v1080_v31 = vunpack.c.l.b16 %v1056_v55  ;;  %v5124_v11 = vld [vmem:[%s5634_s23 + $0x8] sm:$0xff]  ;;  %v3845_v55 = vld [vmem:[%s5643_s21] ss:$0 sm:$0xff] }
 0x726   :  { %v1456_v51 = vpop.xlane.xlu1 %1455 }
 0x727   :  { %v1055_v56 = vpack.c.bf16 %v5105_v2, %v5105_v2  ;;  %v1057_v30 = vpack.c.bf16 %v5110_v22, %v5110_v22  ;;  %v1462_v40 = vmul.f32 %v1456_v51, %v4898_v19 }
 0x729   :  { %v1061_v24 = vunpack.c.l.b16 %v1055_v56  ;;  %v1081_v13 = vunpack.c.l.b16 %v1057_v30  ;;  %v1464_v43 = vadd.f32 1e-05, %v1462_v40 }
 0x72b   :  { %v1062_v17 = vpack.c.b16 %v1061_v24, %v1060_v6  ;;  %v1082_v29 = vpack.c.b16 %v1081_v13, %v1080_v31  ;;  %3896 = vrsqrt.f32 %v1464_v43  ;;  %vm1472_vm12 = vweird.f32 %v1464_v43 }
 0x72d   :  { %1071 = vmatpush.bf16.msrb.mxu2 %v1062_v17  ;;  %1091 = vmatpush.bf16.msrb.mxu3 %v1082_v29 }
 0x730   :  { %3607 = vmatmul.msk.bf16.vlgmr.msrb.gmra.mxu2 %vm519_vm0, %v5119_v20  ;;  %3608 = vmatmul.msk.bf16.vlgmr.msrb.gmra.mxu3 %vm519_vm0, %v5124_v11 }
 0x731   :  { %v3897_v44 = vpop.eup %3896  ;;  %1122 = vmatpush.bf16.msra.mxu2 %v3749_v18  ;;  %1162 = vmatpush.bf16.msra.mxu3 %v3750_v41 }
 0x732   :  { %v1467_v21 = vmul.f32 %v3897_v44, %v1464_v43  ;;  %vm1473_vm11 = vweird.f32 %v3897_v44 }
 0x733   :  { %vm1474_vm13 = vmor %vm1472_vm12, %vm1473_vm11 }
 0x734   :  { %v1468_v14 = vmul.f32 %v3897_v44, %v1467_v21  ;;  %v3752_v21 = vld [vmem:[#allocation13] sm:$0xff] }
 0x735   :  { %1558 = vmatpush.bf16.msra.mxu0 %v3752_v21  ;;  %v3847_v21 = vld [vmem:[%s5645_s2] ss:$0 sm:$0xff] }
 0x736   :  { %v1469_v28 = vmul.f32 0.5, %v1468_v14 }
 0x738   :  { %v1470_v12 = vsub.f32 1.5, %v1469_v28  ;;  %v5163_v28 = vld [vmem:[%s5644_s29] ss:$0 sm:$0xff] }
 0x73a   :  { %v1471_v9 = vmul.f32 %v3897_v44, %v1470_v12 }
 0x73c   :  { %v1475_v33 = vsel %vm1474_vm13, %v3897_v44, %v1471_v9 }
 0x73d   :  { %v5131_v35 = vmul.f32 %v1475_v33, %v5073_v50  ;;  %v5134_v36 = vmul.f32 %v1475_v33, %v5077_v8 }
 0x73f   :  { %v1490_v45 = vpack.c.bf16 %v5131_v35, %v5131_v35  ;;  %v1492_v50 = vpack.c.bf16 %v5134_v36, %v5134_v36 }
 0x741   :  { %v1496_v47 = vunpack.c.l.b16 %v1490_v45  ;;  %v1516_v48 = vunpack.c.l.b16 %v1492_v50 }
 0x78b   :  { %v1461_v25 = vpop.xlane.xlu2 %1460 }
 0x78c   :  { %v1463_v26 = vmul.f32 %v1461_v25, %v4898_v19 }
 0x78e   :  { %v1465_v27 = vadd.f32 1e-05, %v1463_v26 }
 0x790   :  { %3898 = vrsqrt.f32 %v1465_v27  ;;  %vm1482_vm15 = vweird.f32 %v1465_v27 }
 0x796   :  { %v3899_v15 = vpop.eup %3898 }
 0x797   :  { %v1477_v16 = vmul.f32 %v3899_v15, %v1465_v27  ;;  %vm1483_vm14 = vweird.f32 %v3899_v15 }
 0x798   :  { %vm1484_vm3 = vmor %vm1482_vm15, %vm1483_vm14 }
 0x799   :  { %v1478_v32 = vmul.f32 %v3899_v15, %v1477_v16 }
 0x79b   :  { %v1479_v5 = vmul.f32 0.5, %v1478_v32 }
 0x79d   :  { %v1480_v34 = vsub.f32 1.5, %v1479_v5 }
 0x79f   :  { %v1481_v37 = vmul.f32 %v3899_v15, %v1480_v34 }
 0x7a1   :  { %v1485_v38 = vsel %vm1484_vm3, %v3899_v15, %v1481_v37 }
 0x7a2   :  { %v5137_v39 = vmul.f32 %v1485_v38, %v5088_v3  ;;  %v5140_v42 = vmul.f32 %v1485_v38, %v5090_v23 }
 0x7a4   :  { %v1491_v8 = vpack.c.bf16 %v5137_v39, %v5137_v39  ;;  %v1493_v46 = vpack.c.bf16 %v5140_v42, %v5140_v42 }
 0x7a6   :  { %v1497_v10 = vunpack.c.l.b16 %v1491_v8  ;;  %v1517_v3 = vunpack.c.l.b16 %v1493_v46 }
 0x7a8   :  { %v1498_v7 = vpack.c.b16 %v1497_v10, %v1496_v47  ;;  %v1518_v23 = vpack.c.b16 %v1517_v3, %v1516_v48 }
 0x7aa   :  { %1507 = vmatpush.bf16.msrb.mxu2 %v1498_v7  ;;  %1527 = vmatpush.bf16.msrb.mxu3 %v1518_v23 }
 0x7b3   :  { %v1073_v49 = vpop.f32.mrf.mxu2  ;;  %v1093_v61 = vpop.f32.mrf.mxu3 }
 0x7bb   :  { %v1075_v52 = vpop.f32.mrf.mxu2  ;;  %v1095_v60 = vpop.f32.mrf.mxu3 }
 0x7bc   :  { %v1098_v53 = vpack.c.bf16 %v1075_v52, %v1073_v49  ;;  %v1099_v58 = vpack.c.bf16 %v1095_v60, %v1093_v61 }
 0x7be   :  { %3613 = vmatmul.msk.bf16.vlgmr.msra.gmra.mxu2 %vm519_vm0, %v1098_v53 }
 0x7ce   :  { %3614 = vmatmul.msk.bf16.gmra.mxu2 %vm519_vm0, %v1099_v58 }
 0x7de   :  { %3629 = vmatmul.msk.bf16.vlgmr.msrb.gmra.mxu2 %vm519_vm0, %v5119_v20 }
 0x841   :  { %v1124_v4 = vpop.f32.mrf.mxu2 }
 0x842   :  { %v1125_v56 = vadd.f32 %v3845_v55, %v1124_v4 }
 0x844   :  { %v1134_v24 = vmax.f32 %v1125_v56, 0.0 }
 0x849   :  { %v1126_v30 = vpop.f32.mrf.mxu2 }
 0x84a   :  { %v1127_v6 = vadd.f32 %v3845_v55, %v1126_v30 }
 0x84c   :  { %v1135_v31 = vmax.f32 %v1127_v6, 0.0 }
 0x84e   :  { %v1138_v13 = vpack.c.bf16 %v1135_v31, %v1134_v24 }
 0x850   :  { %3619 = vmatmul.msk.bf16.vlgmr.msra.gmra.mxu3 %vm519_vm0, %v1138_v13 }
 0x851   :  { %v1129_v17 = vpop.f32.mrf.mxu2 }
 0x852   :  { %v1130_v29 = vadd.f32 %v3845_v55, %v1129_v17 }
 0x854   :  { %v1136_v43 = vmax.f32 %v1130_v29, 0.0 }
 0x859   :  { %v1131_v51 = vpop.f32.mrf.mxu2 }
 0x85a   :  { %v1132_v40 = vadd.f32 %v3845_v55, %v1131_v51 }
 0x85c   :  { %v1137_v18 = vmax.f32 %v1132_v40, 0.0 }
 0x85e   :  { %v1139_v41 = vpack.c.bf16 %v1137_v18, %v1136_v43 }
 0x860   :  { %3620 = vmatmul.msk.bf16.gmra.mxu3 %vm519_vm0, %v1139_v41  ;;  %v3753_v41 = vld [vmem:[#allocation14] sm:$0xff] }
 0x861   :  { %v1509_v44 = vpop.f32.mrf.mxu2  ;;  %1598 = vmatpush.bf16.msra.mxu1 %v3753_v41 }
 0x869   :  { %v1511_v14 = vpop.f32.mrf.mxu2 }
 0x86a   :  { %v1534_v25 = vpack.c.bf16 %v1511_v14, %v1509_v44 }
 0x86c   :  { %3635 = vmatmul.msk.bf16.vlgmr.msra.gmra.mxu0 %vm519_vm0, %v1534_v25 }
 0x870   :  { %3630 = vmatmul.msk.bf16.vlgmr.msrb.gmra.mxu3 %vm519_vm0, %v5124_v11 }
 0x8d3   :  { %v1164_v26 = vpop.f32.mrf.mxu3 }
 0x8d4   :  { %v1165_v12 = vadd.f32 %v5163_v28, %v1164_v26 }
 0x8d6   :  { %v1175_v16 = vsel %vm1174_vm4, %v1165_v12, 0.0 }
 0x8db   :  { %v5160_v27 = vpop.f32.mrf.mxu3 }
 0x8e3   :  { %v1169_v15 = vpop.f32.mrf.mxu3 }
 0x8e4   :  { %v1170_v9 = vadd.f32 %v5163_v28, %v1169_v15 }
 0x8e6   :  { %v1176_v32 = vsel %vm1174_vm4, %v1170_v9, 0.0 }
 0x8e7   :  { %v1177_v33 = vadd.f32 %v1176_v32, %v1175_v16 }
 0x8e9   :  { %v1181_v5 = vmul.f32 %v1177_v33, %v4869_v54  ;;  %v1560_v44 = vpop.f32.mrf.mxu0 }
 0x8ea   :  { %v1561_v14 = vadd.f32 %v3847_v21, %v1560_v44 }
 0x8eb   :  { %v1183_v34 = vsub.f32 %v1165_v12, %v1181_v5  ;;  %v1185_v37 = vsub.f32 %v1170_v9, %v1181_v5  ;;  %v5170_v38 = vpop.f32.mrf.mxu3 }
 0x8ec   :  { %v1570_v26 = vmax.f32 %v1561_v14, 0.0 }
 0x8ed   :  { %v1187_v45 = vmul.f32 %v1183_v34, %v1183_v34  ;;  %v1189_v50 = vmul.f32 %v1185_v37, %v1185_v37 }
 0x8ef   :  { %v1191_v8 = vsel %vm1174_vm4, %v1187_v45, 0.0  ;;  %v1192_v46 = vsel %vm1174_vm4, %v1189_v50, 0.0 }
 0x8f0   :  { %v1193_v47 = vadd.f32 %v1192_v46, %v1191_v8  ;;  %v3848_v46 = vld [vmem:[%s5646_s10] ss:$0 sm:$0xff] }
 0x8f1   :  { %v1562_v25 = vpop.f32.mrf.mxu0 }
 0x8f2   :  { %3900 = vrsqrt.f32 %v1193_v47  ;;  %vm1204_vm5 = vcmp.eq.f32.partialorder %v1193_v47, inf  ;;  %v1207_v58 = vand.u32 2147483648, %v1193_v47  ;;  %vm1206_vm6 = vcmp.eq.f32.partialorder %v1193_v47, 0.0 }
 0x8f3   :  { %v1529_v10 = vpop.f32.mrf.mxu3  ;;  %v1563_v12 = vadd.f32 %v3847_v21, %v1562_v25 }
 0x8f5   :  { %v1571_v15 = vmax.f32 %v1563_v12, 0.0 }
 0x8f7   :  { %v1574_v9 = vpack.c.bf16 %v1571_v15, %v1570_v26 }
 0x8f8   :  { %v3901_v48 = vpop.eup %3900 }
 0x8f9   :  { %v1198_v3 = vmul.f32 %v3901_v48, %v1193_v47  ;;  %3641 = vmatmul.msk.bf16.vlgmr.msra.gmra.mxu1 %vm519_vm0, %v1574_v9 }
 0x8fb   :  { %v1199_v7 = vmul.f32 %v3901_v48, %v1198_v3  ;;  %v1531_v23 = vpop.f32.mrf.mxu3 }
 0x8fc   :  { %v1535_v49 = vpack.c.bf16 %v1531_v23, %v1529_v10 }
 0x8fd   :  { %v1200_v52 = vmul.f32 0.5, %v1199_v7 }
 0x8fe   :  { %3636 = vmatmul.msk.bf16.gmra.mxu0 %vm519_vm0, %v1535_v49 }
 0x8ff   :  { %v1201_v53 = vsub.f32 1.5, %v1200_v52 }
 0x901   :  { %v1202_v61 = vmul.f32 %v3901_v48, %v1201_v53 }
 0x903   :  { %v1203_v60 = vmul.f32 %v1202_v61, %v1193_v47 }
 0x905   :  { %v1205_v4 = vsel %vm1204_vm5, %v1193_v47, %v1203_v60 }
 0x906   :  { %v1208_v55 = vsel %vm1206_vm6, %v1207_v58, %v1205_v4 }
 0x907   :  { %3902 = vrcp.f32 %v1208_v55  ;;  %v1232_v24 = vand.u32 2147483648, %v1208_v55  ;;  %v1230_v13 = vand.u32 2147483647, %v1208_v55  ;;  %vm1226_vm8 = vweird.f32 %v1208_v55 }
 0x909   :  { %v1233_v29 = vor.u32 1.1754944e-38, %v1232_v24  ;;  %vm1231_vm2 = vcmp.eq.f32.partialorder %v1230_v13, 8.507059e+37 }
 0x90d   :  { %v3903_v56 = vpop.eup %3902 }
 0x90e   :  { %v1222_v30 = vmul.f32 %v3903_v56, %v1208_v55  ;;  %vm1227_vm7 = vweird.f32 %v3903_v56 }
 0x90f   :  { %vm1228_vm9 = vmor %vm1226_vm8, %vm1227_vm7 }
 0x910   :  { %v1223_v6 = vsub.f32 1.0, %v1222_v30 }
 0x912   :  { %v1224_v31 = vmul.f32 %v3903_v56, %v1223_v6 }
 0x914   :  { %v1225_v17 = vadd.f32 %v3903_v56, %v1224_v31 }
 0x916   :  { %v1229_v51 = vsel %vm1228_vm9, %v3903_v56, %v1225_v17 }
 0x917   :  { %v1234_v40 = vsel %vm1231_vm2, %v1233_v29, %v1229_v51 }
 0x918   :  { %v5175_v43 = vmul.f32 %v1234_v40, %v1183_v34  ;;  %v5177_v18 = vmul.f32 %v1234_v40, %v1185_v37 }
 0x976   :  { %v1600_v50 = vpop.f32.mrf.mxu1 }
 0x977   :  { %v1601_v47 = vadd.f32 %v3848_v46, %v1600_v50 }
 0x979   :  { %v1610_v3 = vsel %vm519_vm0, %v1601_v47, 0.0 }
 0x97b   :  { %v1565_v16 = vpop.f32.mrf.mxu0 }
 0x97c   :  { %v1566_v32 = vadd.f32 %v3847_v21, %v1565_v16 }
 0x97e   :  { %v1572_v34 = vmax.f32 %v1566_v32, 0.0  ;;  %v1602_v8 = vpop.f32.mrf.mxu1 }
 0x97f   :  { %v1603_v52 = vadd.f32 %v3848_v46, %v1602_v8 }
 0x981   :  { %v1613_v56 = vsel %vm519_vm0, %v1603_v52, 0.0 }
 0x983   :  { %v1567_v33 = vpop.f32.mrf.mxu0 }
 0x984   :  { %v1568_v5 = vadd.f32 %v3847_v21, %v1567_v33 }
 0x986   :  { %v1573_v37 = vmax.f32 %v1568_v5, 0.0 }
 0x988   :  { %v1575_v45 = vpack.c.bf16 %v1573_v37, %v1572_v34 }
 0x98a   :  { %3642 = vmatmul.msk.bf16.gmra.mxu1 %vm519_vm0, %v1575_v45 }
 0xa07   :  { %v1605_v10 = vpop.f32.mrf.mxu1 }
 0xa08   :  { %v1606_v48 = vadd.f32 %v3848_v46, %v1605_v10 }
 0xa0a   :  { %v1611_v7 = vsel %vm519_vm0, %v1606_v48, 0.0 }
 0xa0b   :  { %v1612_v23 = vadd.f32 %v1611_v7, %v1610_v3 }
 0xa0d   :  { %v1616_v49 = vmul.f32 %v1612_v23, %v4869_v54 }
 0xa0f   :  { %v5186_v53 = vsub.f32 %v1606_v48, %v1616_v49  ;;  %v1607_v61 = vpop.f32.mrf.mxu1  ;;  %v5188_v60 = vsub.f32 %v1601_v47, %v1616_v49  ;;  %v4459_v47 = vmov 0  }
 0xa10   :  { %v1608_v58 = vadd.f32 %v3848_v46, %v1607_v61  ;;  %3836 = vset.pattern.permute.xlu1 %v4459_v47  ;;  %3838 = vset.pattern.permute.xlu0 %v4459_v47 }
 0xa11   :  { %v1624_v4 = vmul.f32 %v5186_v53, %v5186_v53  ;;  %v1622_v55 = vmul.f32 %v5188_v60, %v5188_v60  ;;  %3837 = vset.pattern.permute.xlu2 %v4459_v47  ;;  %v2016_v47 = vld [vmem:[%s5648_s11 + $0x8] sm:$0xff] }
 0xa12   :  { %v1614_v30 = vsel %vm519_vm0, %v1608_v58, 0.0  ;;  %2086 = vmatpush.msrb.mxu1 %v2016_v47 }
 0xa13   :  { %v1627_v6 = vsel %vm519_vm0, %v1624_v4, 0.0  ;;  %v1615_v24 = vadd.f32 %v1614_v30, %v1613_v56  ;;  %v1626_v31 = vsel %vm519_vm0, %v1622_v55, 0.0 }
 0xa14   :  { %v1628_v13 = vadd.f32 %v1627_v6, %v1626_v31 }
 0xa15   :  { %v1617_v17 = vmul.f32 %v1615_v24, %v4869_v54 }
 0xa16   :  { %3904 = vrsqrt.f32 %v1628_v13  ;;  %vm1639_vm10 = vcmp.eq.f32.partialorder %v1628_v13, inf  ;;  %v1642_v37 = vand.u32 2147483648, %v1628_v13  ;;  %vm1641_vm11 = vcmp.eq.f32.partialorder %v1628_v13, 0.0 }
 0xa17   :  { %v5199_v29 = vsub.f32 %v1608_v58, %v1617_v17  ;;  %v5201_v51 = vsub.f32 %v1603_v52, %v1617_v17 }
 0xa19   :  { %v1625_v40 = vmul.f32 %v5199_v29, %v5199_v29  ;;  %v1623_v41 = vmul.f32 %v5201_v51, %v5201_v51 }
 0xa1b   :  { %v1630_v44 = vsel %vm519_vm0, %v1625_v40, 0.0  ;;  %v1629_v21 = vsel %vm519_vm0, %v1623_v41, 0.0 }
 0xa1c   :  { %v3905_v14 = vpop.eup %3904  ;;  %v1631_v25 = vadd.f32 %v1630_v44, %v1629_v21 }
 0xa1d   :  { %v1633_v26 = vmul.f32 %v3905_v14, %v1628_v13 }
 0xa1e   :  { %3906 = vrsqrt.f32 %v1631_v25  ;;  %vm1651_vm12 = vcmp.eq.f32.partialorder %v1631_v25, inf  ;;  %v1654_v7 = vand.u32 2147483648, %v1631_v25  ;;  %vm1653_vm13 = vcmp.eq.f32.partialorder %v1631_v25, 0.0 }
 0xa1f   :  { %v1634_v12 = vmul.f32 %v3905_v14, %v1633_v26 }
 0xa21   :  { %v1635_v15 = vmul.f32 0.5, %v1634_v12 }
 0xa23   :  { %v1636_v9 = vsub.f32 1.5, %v1635_v15 }
 0xa24   :  { %v3907_v16 = vpop.eup %3906 }
 0xa25   :  { %v1637_v32 = vmul.f32 %v3905_v14, %v1636_v9  ;;  %v1645_v33 = vmul.f32 %v3907_v16, %v1631_v25 }
 0xa27   :  { %v1638_v5 = vmul.f32 %v1637_v32, %v1628_v13  ;;  %v1646_v34 = vmul.f32 %v3907_v16, %v1645_v33 }
 0xa29   :  { %v1640_v45 = vsel %vm1639_vm10, %v1628_v13, %v1638_v5  ;;  %v1647_v50 = vmul.f32 0.5, %v1646_v34 }
 0xa2a   :  { %v1643_v8 = vsel %vm1641_vm11, %v1642_v37, %v1640_v45 }
 0xa2b   :  { %3908 = vrcp.f32 %v1643_v8  ;;  %v1648_v46 = vsub.f32 1.5, %v1647_v50  ;;  %v1667_v58 = vand.u32 2147483648, %v1643_v8  ;;  %v1665_v55 = vand.u32 2147483647, %v1643_v8 }
 0xa2c   :  { %vm1661_vm15 = vweird.f32 %v1643_v8 }
 0xa2d   :  { %v1649_v10 = vmul.f32 %v3907_v16, %v1648_v46  ;;  %v1668_v30 = vor.u32 1.1754944e-38, %v1667_v58  ;;  %vm1666_vm5 = vcmp.eq.f32.partialorder %v1665_v55, 8.507059e+37  ;;  %v500_v46 = vld [vmem:[%s5647_s1] sm:$0xff] }
 0xa2f   :  { %v1650_v48 = vmul.f32 %v1649_v10, %v1631_v25 }
 0xa31   :  { %v3909_v3 = vpop.eup %3908  ;;  %v1652_v49 = vsel %vm1651_vm12, %v1631_v25, %v1650_v48 }
 0xa32   :  { %v1657_v23 = vmul.f32 %v3909_v3, %v1643_v8  ;;  %v1655_v52 = vsel %vm1653_vm13, %v1654_v7, %v1652_v49  ;;  %vm1662_vm14 = vweird.f32 %v3909_v3 }
 0xa33   :  { %3910 = vrcp.f32 %v1655_v52  ;;  %vm1663_vm3 = vmor %vm1661_vm15, %vm1662_vm14  ;;  %v1682_v14 = vand.u32 2147483648, %v1655_v52  ;;  %v1680_v26 = vand.u32 2147483647, %v1655_v52  ;;  %vm1676_vm7 = vweird.f32 %v1655_v52 }
 0xa34   :  { %v1658_v61 = vsub.f32 1.0, %v1657_v23 }
 0xa35   :  { %vm1681_vm9 = vcmp.eq.f32.partialorder %v1680_v26, 8.507059e+37 }
 0xa36   :  { %v1659_v4 = vmul.f32 %v3909_v3, %v1658_v61 }
 0xa38   :  { %v1660_v56 = vadd.f32 %v3909_v3, %v1659_v4 }
 0xa39   :  { %v3911_v6 = vpop.eup %3910 }
 0xa3a   :  { %v1664_v24 = vsel %vm1663_vm3, %v3909_v3, %v1660_v56  ;;  %v1672_v13 = vmul.f32 %v3911_v6, %v1655_v52  ;;  %vm1677_vm6 = vweird.f32 %v3911_v6  ;;  %v2015_v3 = vld [vmem:[%s5648_s11] sm:$0xff] }
 0xa3b   :  { %v1669_v31 = vsel %vm1666_vm5, %v1668_v30, %v1664_v24  ;;  %vm1678_vm8 = vmor %vm1676_vm7, %vm1677_vm6  ;;  %2087 = vmatpush.msrb.mxu1 %v2015_v3 }
 0xa3c   :  { %v1670_v17 = vmul.f32 %v1669_v31, %v5188_v60  ;;  %v1686_v40 = vmul.f32 %v1669_v31, %v5186_v53  ;;  %v1673_v41 = vsub.f32 1.0, %v1672_v13  ;;  %v1683_v60 = vor.u32 1.1754944e-38, %v1682_v14 }
 0xa3e   :  { %v1688_v44 = vmax.f32 %v1670_v17, 0.0  ;;  %v1690_v21 = vmax.f32 %v1686_v40, 0.0  ;;  %v1674_v25 = vmul.f32 %v3911_v6, %v1673_v41  ;;  %v501_v17 = vld [vmem:[%s5647_s1 + $0x8] sm:$0xff]  ;;  %v1172_v40 = vadd.f32 %v5163_v28, %v5170_v38 }
 0xa40   :  { %v1692_v12 = vsel %vm519_vm0, %v1688_v44, 0.0  ;;  %v1693_v15 = vsel %vm519_vm0, %v1690_v21, 0.0  ;;  %v1675_v16 = vadd.f32 %v3911_v6, %v1674_v25  ;;  %v1179_v14 = vsel %vm1174_vm4, %v1172_v40, 0.0  ;;  %v502_v25 = vld [vmem:[%s5647_s1 + $0x10] sm:$0xff] }
 0xa41   :  { %v1694_v9 = vadd.f32 %v1693_v15, %v1692_v12  ;;  %v503_v15 = vld [vmem:[%s5647_s1 + $0x18] sm:$0xff] }
 0xa42   :  { %v1679_v53 = vsel %vm1678_vm8, %v3911_v6, %v1675_v16 }
 0xa43   :  { %1695 = vadd.xlane.f32.xlu0 %v1694_v9  ;;  %v1684_v32 = vsel %vm1681_vm9, %v1683_v60, %v1679_v53  ;;  %vm3296_vm9 = vcmask 1041409  }
 0xa44   :  { %v1685_v33 = vmul.f32 %v1684_v32, %v5201_v51  ;;  %v1687_v5 = vmul.f32 %v1684_v32, %v5199_v29 }
 0xa46   :  { %v1689_v34 = vmax.f32 %v1685_v33, 0.0  ;;  %v1691_v37 = vmax.f32 %v1687_v5, 0.0 }
 0xa48   :  { %v1697_v45 = vsel %vm519_vm0, %v1689_v34, 0.0  ;;  %v1698_v50 = vsel %vm519_vm0, %v1691_v37, 0.0 }
 0xa49   :  { %v1699_v8 = vadd.f32 %v1698_v50, %v1697_v45 }
 0xa4b   :  { %1700 = vadd.xlane.f32.xlu1 %v1699_v8 }
 0xa64   :  { %1255 = vperm.xlu1 %3836, %v500_v46  }
 0xab6   :  { %v1696_v10 = vpop.xlane.xlu0 %1695 }
 0xab7   :  { %v1702_v48 = vmul.f32 %v1696_v10, %v4898_v19 }
 0xab9   :  { %v5221_v51 = vsub.f32 %v1688_v44, %v1702_v48  ;;  %v5223_v29 = vsub.f32 %v1690_v21, %v1702_v48  ;;  %v1167_v44 = vadd.f32 %v5163_v28, %v5160_v27 }
 0xabb   :  { %v1708_v7 = vmul.f32 %v5221_v51, %v5221_v51  ;;  %v1710_v23 = vmul.f32 %v5223_v29, %v5223_v29  ;;  %v1178_v26 = vsel %vm1174_vm4, %v1167_v44, 0.0 }
 0xabc   :  { %v1180_v12 = vadd.f32 %v1179_v14, %v1178_v26 }
 0xabd   :  { %v1712_v49 = vsel %vm519_vm0, %v1708_v7, 0.0  ;;  %v1713_v52 = vsel %vm519_vm0, %v1710_v23, 0.0  ;;  %v2018_v23 = vld [vmem:[%s5648_s11 + $0x18] sm:$0xff] }
 0xabe   :  { %v1714_v61 = vadd.f32 %v1713_v52, %v1712_v49  ;;  %v1701_v58 = vpop.xlane.xlu1 %1700  ;;  %v1182_v38 = vmul.f32 %v1180_v12, %v4869_v54  ;;  %2045 = vmatpush.msrb.mxu0 %v2018_v23  ;;  %v2017_v49 = vld [vmem:[%s5648_s11 + $0x10] sm:$0xff] }
 0xabf   :  { %v1703_v4 = vmul.f32 %v1701_v58, %v4898_v19 }
 0xac0   :  { %1715 = vadd.xlane.f32.xlu2 %v1714_v61  ;;  %v1184_v9 = vsub.f32 %v1167_v44, %v1182_v38  ;;  %v5257_v16 = vsub.f32 %v1172_v40, %v1182_v38  ;;  %2046 = vmatpush.msrb.mxu0 %v2017_v49 }
 0xac1   :  { %v5232_v55 = vsub.f32 %v1689_v34, %v1703_v4  ;;  %v5234_v56 = vsub.f32 %v1691_v37, %v1703_v4 }
 0xac2   :  { %v1188_v27 = vmul.f32 %v1184_v9, %v1184_v9 }
 0xac3   :  { %v1709_v30 = vmul.f32 %v5232_v55, %v5232_v55  ;;  %v1711_v6 = vmul.f32 %v5234_v56, %v5234_v56 }
 0xac4   :  { %v1194_v28 = vsel %vm1174_vm4, %v1188_v27, 0.0 }
 0xac5   :  { %v1717_v24 = vsel %vm519_vm0, %v1709_v30, 0.0  ;;  %v1718_v31 = vsel %vm519_vm0, %v1711_v6, 0.0 }
 0xac6   :  { %v1719_v13 = vadd.f32 %v1718_v31, %v1717_v24 }
 0xac8   :  { %1720 = vadd.xlane.f32.xlu0 %v1719_v13 }
 0xad6   :  { %v5245_v41 = vpop.permute.xlu1 %1255 }
 0xad7   :  { %v1949_v21 = vmul.f32 %v5131_v35, %v5245_v41  ;;  %v1190_v35 = vmul.f32 %v5257_v16, %v5257_v16  ;;  %v1281_v14 = vmul.f32 %v5245_v41, %v5175_v43 }
 0xad8   :  { %1260 = vperm.xlu2 %3837, %v501_v17   ;;  %v1277_v17 = vmul.f32 %v5245_v41, %v5099_v62 }
 0xad9   :  { %3661 = vmatmul.msk.f32.vlgmr.msrb.gmra.mxu1 %vm519_vm0, %v1949_v21  ;;  %v1195_v60 = vsel %vm1174_vm4, %v1190_v35, 0.0 }
 0xada   :  { %v1196_v53 = vadd.f32 %v1195_v60, %v1194_v28  ;;  %v2372_v21 = vpack.c.bf16 %v1277_v17, %v1277_v17 }
 0xadc   :  { %1265 = vperm.xlu0 %3838, %v502_v25   ;;  %3912 = vrsqrt.f32 %v1196_v53  ;;  %vm1216_vm2 = vcmp.eq.f32.partialorder %v1196_v53, inf  ;;  %v1219_v46 = vand.u32 2147483648, %v1196_v53  ;;  %vm1218_vm10 = vcmp.eq.f32.partialorder %v1196_v53, 0.0 }
 0xae0   :  { %1270 = vperm.xlu2 %3837, %v503_v15  }
 0xae2   :  { %v3913_v32 = vpop.eup %3912 }
 0xae3   :  { %v1210_v33 = vmul.f32 %v3913_v32, %v1196_v53 }
 0xae5   :  { %v1211_v5 = vmul.f32 %v3913_v32, %v1210_v33 }
 0xae7   :  { %v1212_v34 = vmul.f32 0.5, %v1211_v5 }
 0xae9   :  { %v1213_v37 = vsub.f32 1.5, %v1212_v34 }
 0xaeb   :  { %v1214_v45 = vmul.f32 %v3913_v32, %v1213_v37  ;;  %v2378_v32 = vunpack.c.l.b16 %v2372_v21 }
 0xaed   :  { %v1215_v50 = vmul.f32 %v1214_v45, %v1196_v53 }
 0xaef   :  { %v1217_v8 = vsel %vm1216_vm2, %v1196_v53, %v1215_v50  ;;  %v1997_v53 = vsel %vm1174_vm4, %v1281_v14, -inf  ;;  %vm1870_vm2 = vcmask 31744  }
 0xaf0   :  { %v1220_v47 = vsel %vm1218_vm10, %v1219_v46, %v1217_v8 }
 0xaf1   :  { %3914 = vrcp.f32 %v1220_v47  ;;  %v1247_v61 = vand.u32 2147483648, %v1220_v47  ;;  %vm1241_vm12 = vweird.f32 %v1220_v47  ;;  %v1245_v58 = vand.u32 2147483647, %v1220_v47 }
 0xaf3   :  { %v1248_v24 = vor.u32 1.1754944e-38, %v1247_v61  ;;  %vm1246_vm14 = vcmp.eq.f32.partialorder %v1245_v58, 8.507059e+37 }
 0xaf7   :  { %v3915_v10 = vpop.eup %3914 }
 0xaf8   :  { %v1237_v48 = vmul.f32 %v3915_v10, %v1220_v47  ;;  %vm1242_vm11 = vweird.f32 %v3915_v10 }
 0xaf9   :  { %vm1243_vm13 = vmor %vm1241_vm12, %vm1242_vm11 }
 0xafa   :  { %v1238_v3 = vsub.f32 1.0, %v1237_v48 }
 0xafc   :  { %v1239_v7 = vmul.f32 %v3915_v10, %v1238_v3  ;;  %v2414_v3 = vpack.c.bf16 %v1281_v14, %v1281_v14 }
 0xafe   :  { %v1240_v52 = vadd.f32 %v3915_v10, %v1239_v7  ;;  %v5308_v21 = vunpack.c.l.b16 %v2414_v3 }
 0xb00   :  { %v1244_v30 = vsel %vm1243_vm13, %v3915_v10, %v1240_v52 }
 0xb01   :  { %v1249_v13 = vsel %vm1246_vm14, %v1248_v24, %v1244_v30 }
 0xb02   :  { %v1250_v40 = vmul.f32 %v1249_v13, %v1184_v9  ;;  %v5284_v9 = vmul.f32 %v5245_v41, %v4908_v57  ;;  %v1252_v52 = vmul.f32 %v1249_v13, %v5257_v16 }
 0xb04   :  { %v1961_v37 = vsel %vm519_vm0, %v5284_v9, -inf }
 0xb33   :  { %v1716_v4 = vpop.xlane.xlu2 %1715 }
 0xb34   :  { %v1722_v6 = vmul.f32 %v1716_v4, %v4898_v19 }
 0xb36   :  { %v1724_v31 = vadd.f32 1e-05, %v1722_v6  ;;  %v2324_v6 = vpack.c.bf16 %v5284_v9, %v5284_v9 }
 0xb38   :  { %3916 = vrsqrt.f32 %v1724_v31  ;;  %vm1732_vm3 = vweird.f32 %v1724_v31 }
 0xb3b   :  { %v5268_v44 = vpop.permute.xlu2 %1260  ;;  %v1721_v25 = vpop.xlane.xlu0 %1720 }
 0xb3c   :  { %v1950_v26 = vmul.f32 %v5137_v39, %v5268_v44  ;;  %v1278_v12 = vmul.f32 %v5268_v44, %v5105_v2  ;;  %v1282_v15 = vmul.f32 %v5268_v44, %v1250_v40  ;;  %v5279_v62 = vmul.f32 %v5268_v44, %v4912_v63 }
 0xb3d   :  { %v1723_v38 = vmul.f32 %v1721_v25, %v4898_v19  ;;  %v1979_v39 = vsel %vm519_vm0, %v1277_v17, -inf }
 0xb3e   :  { %v3917_v43 = vpop.eup %3916  ;;  %3662 = vmatmul.msk.f32.gmra.mxu1 %vm519_vm0, %v1950_v26  ;;  %v1980_v27 = vsel %vm519_vm0, %v1278_v12, -inf  ;;  %v2373_v2 = vpack.c.bf16 %v1278_v12, %v1278_v12  ;;  %v1998_v35 = vsel %vm1174_vm4, %v1282_v15, -inf  ;;  %v1962_v57 = vsel %vm519_vm0, %v5279_v62, -inf }
 0xb3f   :  { %v1727_v28 = vmul.f32 %v3917_v43, %v1724_v31  ;;  %v1725_v60 = vadd.f32 1e-05, %v1723_v38  ;;  %v1981_v63 = vmax.f32 %v1979_v39, %v1980_v27  ;;  %v1999_v5 = vmax.f32 %v1997_v53, %v1998_v35 }
 0xb40   :  { %v2379_v33 = vunpack.c.l.b16 %v2373_v2  ;;  %v1963_v50 = vmax.f32 %v1961_v37, %v1962_v57  ;;  %v2415_v47 = vpack.c.bf16 %v1282_v15, %v1282_v15  ;;  %vm1733_vm15 = vweird.f32 %v3917_v43 }
 0xb41   :  { %v1728_v34 = vmul.f32 %v3917_v43, %v1727_v28  ;;  %3918 = vrsqrt.f32 %v1725_v60  ;;  %v1982_v48 = vrot.slane %v1981_v63, 4  ;;  %vm1734_vm5 = vmor %vm1732_vm3, %vm1733_vm15  ;;  %vm1742_vm6 = vweird.f32 %v1725_v60 }
 0xb42   :  { %v2380_v45 = vpack.c.b16 %v2379_v33, %v2378_v32  ;;  %v5300_v58 = vunpack.c.l.b16 %v2415_v47  ;;  %v1964_v30 = vrot.slane %v1963_v50, 4  ;;  %v2000_v16 = vrot.slane %v1999_v5, 4 }
 0xb43   :  { %v1729_v8 = vmul.f32 0.5, %v1728_v34  ;;  %v5295_v46 = vpop.permute.xlu2 %1270  ;;  %v5304_v24 = vmax.f32 %v1981_v63, %v1982_v48 }
 0xb44   :  { %2389 = vmatpush.bf16.msra.mxu1 %v2380_v45  ;;  %v1276_v49 = vmul.f32 %v5295_v46, %v4916_v1  ;;  %v1284_v31 = vmul.f32 %v5295_v46, %v1252_v52  ;;  %v5312_v13 = vmul.f32 %v5295_v46, %v5110_v22  ;;  %v2422_v26 = vpack.c.b16 %v5300_v58, %v5308_v21 }
 0xb45   :  { %v1730_v10 = vsub.f32 1.5, %v1729_v8  ;;  %v5324_v15 = vmul.f32 %v5140_v42, %v5295_v46  ;;  %v1984_v38 = vrot.slane %v5304_v24, 2  ;;  %v1965_v22 = vmax.f32 %v1963_v50, %v1964_v30 }
 0xb46   :  { %v2327_v1 = vpack.c.bf16 %v1276_v49, %v1276_v49  ;;  %v1971_v39 = vsel %vm519_vm0, %v1276_v49, -inf  ;;  %v2007_v27 = vsel %vm1174_vm4, %v1284_v31, -inf  ;;  %v1989_v28 = vsel %vm519_vm0, %v5312_v13, -inf }
 0xb47   :  { %v3919_v7 = vpop.eup %3918  ;;  %v1731_v23 = vmul.f32 %v3917_v43, %v1730_v10  ;;  %v2001_v42 = vmax.f32 %v1999_v5, %v2000_v16  ;;  %v1966_v5 = vrot.slane %v1965_v22, 2 }
 0xb48   :  { %v1737_v61 = vmul.f32 %v3919_v7, %v1725_v60  ;;  %vm1743_vm7 = vweird.f32 %v3919_v7  ;;  %v2353_v35 = vunpack.c.l.b16 %v2327_v1 }
 0xb49   :  { %v1735_v4 = vsel %vm1734_vm5, %v3917_v43, %v1731_v23  ;;  %vm1744_vm8 = vmor %vm1742_vm6, %vm1743_vm7  ;;  %v2002_v3 = vrot.slane %v2001_v42, 2  ;;  %v1967_v1 = vmax.f32 %v1965_v22, %v1966_v5 }
 0xb4a   :  { %v1746_v17 = vmul.f32 %v1735_v4, %v5221_v51  ;;  %v1738_v40 = vmul.f32 %v3919_v7, %v1737_v61  ;;  %v2325_v51 = vpack.c.bf16 %v5279_v62, %v5279_v62  ;;  %v5320_v12 = vmul.f32 %v1735_v4, %v5223_v29 }
 0xb4b   :  { %v2417_v29 = vpack.c.bf16 %v1284_v31, %v1284_v31 }
 0xb4c   :  { %v1953_v14 = vmul.f32 %v1746_v17, %v5245_v41  ;;  %v1739_v25 = vmul.f32 0.5, %v1738_v40  ;;  %v1750_v57 = vpack.c.bf16 %v1746_v17, %v1746_v17  ;;  %v1752_v34 = vpack.c.bf16 %v5320_v12, %v5320_v12 }
 0xb4d   :  { %v2440_v4 = vunpack.c.l.b16 %v2417_v29  ;;  %v2331_v29 = vunpack.c.l.b16 %v2325_v51 }
 0xb4e   :  { %v1740_v43 = vsub.f32 1.5, %v1739_v25  ;;  %3657 = vmatmul.msk.f32.vlgmr.msrb.gmra.mxu0 %vm519_vm0, %v1953_v14  ;;  %v5330_v2 = vpop.permute.xlu0 %1265  ;;  %v1756_v30 = vunpack.c.l.b16 %v1750_v57  ;;  %v1776_v17 = vunpack.c.l.b16 %v1752_v34  ;;  %v3755_v25 = vld [vmem:[#allocation17] sm:$0xff] }
 0xb4f   :  { %v1951_v53 = vmul.f32 %v5134_v36, %v5330_v2  ;;  %v1275_v32 = vmul.f32 %v5330_v2, %v4910_v59  ;;  %v1283_v33 = vmul.f32 %v5330_v2, %v5177_v18  ;;  %v5345_v37 = vmul.f32 %v5330_v2, %v5102_v0 }
 0xb50   :  { %v1741_v63 = vmul.f32 %v3919_v7, %v1740_v43  ;;  %v1955_v62 = vmul.f32 %v5320_v12, %v5330_v2 }
 0xb51   :  { %3663 = vmatmul.msk.f32.gmra.mxu1 %vm519_vm0, %v1951_v53  ;;  %v1970_v45 = vsel %vm519_vm0, %v1275_v32, -inf  ;;  %v2326_v59 = vpack.c.bf16 %v1275_v32, %v1275_v32  ;;  %v2006_v50 = vsel %vm1174_vm4, %v1283_v33, -inf  ;;  %v2416_v48 = vpack.c.bf16 %v1283_v33, %v1283_v33 }
 0xb52   :  { %v1745_v36 = vsel %vm1744_vm8, %v3919_v7, %v1741_v63  ;;  %v1972_v8 = vmax.f32 %v1970_v45, %v1971_v39  ;;  %v2008_v47 = vmax.f32 %v2006_v50, %v2007_v27  ;;  %v1988_v0 = vsel %vm519_vm0, %v5345_v37, -inf }
 0xb53   :  { %v1747_v18 = vmul.f32 %v1745_v36, %v5232_v55  ;;  %v5352_v60 = vmul.f32 %v1745_v36, %v5234_v56  ;;  %v2352_v10 = vunpack.c.l.b16 %v2326_v59  ;;  %v2439_v58 = vunpack.c.l.b16 %v2416_v48 }
 0xb54   :  { %v1973_v49 = vrot.slane %v1972_v8, 4  ;;  %v2009_v52 = vrot.slane %v2008_v47, 4  ;;  %v1990_v40 = vmax.f32 %v1988_v0, %v1989_v28  ;;  %v2003_v39 = vmax.f32 %v2001_v42, %v2002_v3 }
 0xb55   :  { %v1751_v23 = vpack.c.bf16 %v1747_v18, %v1747_v18  ;;  %v1954_v7 = vmul.f32 %v1747_v18, %v5268_v44  ;;  %v2354_v61 = vpack.c.b16 %v2353_v35, %v2352_v10  ;;  %v1753_v55 = vpack.c.bf16 %v5352_v60, %v5352_v60 }
 0xb56   :  { %v2441_v31 = vpack.c.b16 %v2440_v4, %v2439_v58  ;;  %v1974_v16 = vmax.f32 %v1972_v8, %v1973_v49  ;;  %v1991_v43 = vrot.slane %v1990_v40, 4  ;;  %v2010_v27 = vmax.f32 %v2008_v47, %v2009_v52  ;;  %v3754_v47 = vld [vmem:[#allocation16] sm:$0xff] }
 0xb57   :  { %v1757_v56 = vunpack.c.l.b16 %v1751_v23  ;;  %3658 = vmatmul.msk.f32.gmra.mxu0 %vm519_vm0, %v1954_v7  ;;  %v1777_v21 = vunpack.c.l.b16 %v1753_v55  ;;  %v2330_v42 = vunpack.c.l.b16 %v2324_v6  ;;  %v1968_v53 = vrot.slane %v1967_v1, 1  ;;  %v3849_v52 = vld [vmem:[%s5649_s19] ss:$0 sm:$0xff] }
 0xb58   :  { %2366 = vmatpush.bf16.msra.mxu0 %v2354_v61  ;;  %2450 = vmatpush.bf16.msrb.mxu1 %v2441_v31  ;;  %v1975_v63 = vrot.slane %v1974_v16, 2  ;;  %v1992_v22 = vmax.f32 %v1990_v40, %v1991_v43  ;;  %v2011_v28 = vrot.slane %v2010_v27, 2  ;;  %v1956_v18 = vmul.f32 %v5352_v60, %v5295_v46 }
 0xb59   :  { %v1758_v14 = vpack.c.b16 %v1757_v56, %v1756_v30  ;;  %v1778_v35 = vpack.c.b16 %v1777_v21, %v1776_v17  ;;  %3664 = vmatmul.msk.f32.gmra.mxu1 %vm519_vm0, %v5324_v15  ;;  %v2004_v15 = vrot.slane %v2003_v39, 1  ;;  %v1969_v34 = vmax.f32 %v1967_v1, %v1968_v53 }
 0xb5a   :  { %v1976_v32 = vmax.f32 %v1974_v16, %v1975_v63  ;;  %v1993_v51 = vrot.slane %v1992_v22, 2  ;;  %v2012_v33 = vmax.f32 %v2010_v27, %v2011_v28  ;;  %v2374_v60 = vpack.c.bf16 %v5345_v37, %v5345_v37 }
 0xb5b   :  { %1767 = vmatpush.bf16.msra.mxu2 %v1758_v14  ;;  %1787 = vmatpush.bf16.msra.mxu3 %v1778_v35  ;;  %v2005_v36 = vmax.f32 %v2003_v39, %v2004_v15  ;;  %v2375_v4 = vpack.c.bf16 %v5312_v13, %v5312_v13  ;;  %v3850_v35 = vld [vmem:[%s5650_s25] ss:$0 sm:$0xff] }
 0xb5c   :  { %2431 = vmatpush.bf16.msrb.mxu0 %v2422_v26  ;;  %v1985_v26 = vmax.f32 %v5304_v24, %v1984_v38  ;;  %v2332_v24 = vpack.c.b16 %v2331_v29, %v2330_v42  ;;  %v1977_v38 = vrot.slane %v1976_v32, 1  ;;  %v1994_v6 = vmax.f32 %v1992_v22, %v1993_v51 }
 0xb5d   :  { %v2013_v57 = vrot.slane %v2012_v33, 1  ;;  %v2397_v56 = vunpack.c.l.b16 %v2374_v60  ;;  %v2398_v40 = vunpack.c.l.b16 %v2375_v4 }
 0xb5e   :  { %3643 = vmatmul.msk.bf16.vlgmr.msra.gmra.mxu2 %vm519_vm0, %v5119_v20  ;;  %3644 = vmatmul.msk.bf16.vlgmr.msra.gmra.mxu3 %vm519_vm0, %v5124_v11  ;;  %v1986_v9 = vrot.slane %v1985_v26, 1  ;;  %v1978_v12 = vmax.f32 %v1976_v32, %v1977_v38  ;;  %v1995_v5 = vrot.slane %v1994_v6, 1 }
 0xb5f   :  { %1858 = vmatpush.bf16.msrb.mxu3 %v3755_v25  ;;  %3659 = vmatmul.msk.f32.gmra.mxu0 %vm519_vm0, %v1955_v62  ;;  %v2014_v45 = vmax.f32 %v2012_v33, %v2013_v57  ;;  %v2399_v21 = vpack.c.b16 %v2398_v40, %v2397_v56 }
 0xb60   :  { %v5379_v59 = vsel %vm3296_vm9, %v1978_v12, %v1969_v34  ;;  %v1987_v20 = vmax.f32 %v1985_v26, %v1986_v9  ;;  %v1996_v50 = vmax.f32 %v1994_v6, %v1995_v5  ;;  %1818 = vmatpush.bf16.msrb.mxu2 %v3754_v47 }
 0xb61   :  { %v5382_v11 = vsel %vm3296_vm9, %v2014_v45, %v2005_v36 }
 0xb62   :  { %v5387_v8 = vsel %vm3296_vm9, %v1996_v50, %v1987_v20 }
 0xb63   :  { %2344 = vmatpush.bf16.msra.mxu3 %v2332_v24 }
 0xb67   :  { %3660 = vmatmul.msk.f32.gmra.mxu0 %vm519_vm0, %v1956_v18 }
 0xbe1   :  { %v1769_v10 = vpop.f32.mrf.mxu2  ;;  %v1789_v3 = vpop.f32.mrf.mxu3 }
 0xbe9   :  { %v1771_v48 = vpop.f32.mrf.mxu2  ;;  %v1791_v23 = vpop.f32.mrf.mxu3 }
 0xbea   :  { %v1794_v0 = vpack.c.bf16 %v1771_v48, %v1769_v10  ;;  %v1795_v7 = vpack.c.bf16 %v1791_v23, %v1789_v3 }
 0xbec   :  { %3649 = vmatmul.msk.bf16.vlgmr.msrb.gmra.mxu2 %vm519_vm0, %v1794_v0 }
 0xbfc   :  { %3650 = vmatmul.msk.bf16.gmra.mxu2 %vm519_vm0, %v1795_v7 }
 0xc6f   :  { %v1820_v49 = vpop.f32.mrf.mxu2 }
 0xc70   :  { %v1821_v61 = vadd.f32 %v3849_v52, %v1820_v49  ;;  %v2101_v49 = vld [vmem:[%s5648_s11 + $0x20] sm:$0xf] }
 0xc71   :  { %3665 = vmatpush.msk.msra.mxu2 %vm577_vm1, %v2101_v49 }
 0xc72   :  { %v1830_v30 = vmax.f32 %v1821_v61, 0.0  ;;  %v3962_v61 = vld [vmem:[%s5634_s23] sm:$0xff] }
 0xc73   :  { %2464 = vmatpush.bf16.msrb.mxu2 %v3962_v61 }
 0xc77   :  { %v1822_v58 = vpop.f32.mrf.mxu2 }
 0xc78   :  { %v1823_v55 = vadd.f32 %v3849_v52, %v1822_v58 }
 0xc7a   :  { %v1831_v17 = vmax.f32 %v1823_v55, 0.0 }
 0xc7c   :  { %v1834_v31 = vpack.c.bf16 %v1831_v17, %v1830_v30 }
 0xc7e   :  { %3655 = vmatmul.msk.bf16.vlgmr.msrb.gmra.mxu3 %vm519_vm0, %v1834_v31 }
 0xc7f   :  { %2408 = vmatpush.bf16.msrb.mxu3 %v2399_v21  ;;  %v1825_v1 = vpop.f32.mrf.mxu2 }
 0xc80   :  { %v1826_v16 = vadd.f32 %v3849_v52, %v1825_v1 }
 0xc82   :  { %v1832_v25 = vmax.f32 %v1826_v16, 0.0 }
 0xc87   :  { %v1827_v14 = vpop.f32.mrf.mxu2 }
 0xc88   :  { %v1828_v37 = vadd.f32 %v3849_v52, %v1827_v14 }
 0xc8a   :  { %v1833_v43 = vmax.f32 %v1828_v37, 0.0 }
 0xc8c   :  { %v1835_v39 = vpack.c.bf16 %v1833_v43, %v1832_v25 }
 0xc8e   :  { %3656 = vmatmul.msk.bf16.gmra.mxu3 %vm519_vm0, %v1835_v39 }
 0xd01   :  { %v1860_v13 = vpop.f32.mrf.mxu3 }
 0xd02   :  { %v1861_v29 = vadd.f32 %v3850_v35, %v1860_v13 }
 0xd04   :  { %v1871_v22 = vsel %vm1870_vm2, %v1861_v29, 0.0 }
 0xd09   :  { %v1862_v27 = vpop.f32.mrf.mxu3 }
 0xd0a   :  { %v1863_v32 = vadd.f32 %v3850_v35, %v1862_v27 }
 0xd0c   :  { %v1874_v9 = vsel %vm1870_vm2, %v1863_v32, 0.0 }
 0xd11   :  { %v1865_v63 = vpop.f32.mrf.mxu3 }
 0xd12   :  { %v1866_v26 = vadd.f32 %v3850_v35, %v1865_v63 }
 0xd14   :  { %v1872_v28 = vsel %vm1870_vm2, %v1866_v26, 0.0 }
 0xd15   :  { %v1873_v42 = vadd.f32 %v1872_v28, %v1871_v22 }
 0xd17   :  { %v1877_v53 = vmul.f32 %v1873_v42, %v4869_v54 }
 0xd19   :  { %v5403_v62 = vsub.f32 %v1861_v29, %v1877_v53  ;;  %v5405_v51 = vsub.f32 %v1866_v26, %v1877_v53  ;;  %v1867_v15 = vpop.f32.mrf.mxu3 }
 0xd1a   :  { %v1868_v33 = vadd.f32 %v3850_v35, %v1867_v15 }
 0xd1b   :  { %v1883_v24 = vmul.f32 %v5403_v62, %v5403_v62  ;;  %v1885_v38 = vmul.f32 %v5405_v51, %v5405_v51 }
 0xd1c   :  { %v1875_v6 = vsel %vm1870_vm2, %v1868_v33, 0.0 }
 0xd1d   :  { %v1887_v57 = vsel %vm1870_vm2, %v1883_v24, 0.0  ;;  %v1888_v34 = vsel %vm1870_vm2, %v1885_v38, 0.0  ;;  %v1876_v12 = vadd.f32 %v1875_v6, %v1874_v9 }
 0xd1e   :  { %v1889_v5 = vadd.f32 %v1888_v34, %v1887_v57 }
 0xd1f   :  { %v1878_v36 = vmul.f32 %v1876_v12, %v4869_v54 }
 0xd20   :  { %3920 = vrsqrt.f32 %v1889_v5  ;;  %vm1900_vm10 = vcmp.eq.f32.partialorder %v1889_v5, inf  ;;  %v1903_v30 = vand.u32 2147483648, %v1889_v5  ;;  %vm1902_vm11 = vcmp.eq.f32.partialorder %v1889_v5, 0.0 }
 0xd21   :  { %v5416_v45 = vsub.f32 %v1863_v32, %v1878_v36  ;;  %v5418_v20 = vsub.f32 %v1868_v33, %v1878_v36 }
 0xd23   :  { %v1884_v50 = vmul.f32 %v5416_v45, %v5416_v45  ;;  %v1886_v18 = vmul.f32 %v5418_v20, %v5418_v20 }
 0xd25   :  { %v1890_v47 = vsel %vm1870_vm2, %v1884_v50, 0.0  ;;  %v1891_v10 = vsel %vm1870_vm2, %v1886_v18, 0.0 }
 0xd26   :  { %v3921_v48 = vpop.eup %3920  ;;  %v1892_v0 = vadd.f32 %v1891_v10, %v1890_v47  ;;  %v2048_v10 = vpop.f32.mrf.mxu0 }
 0xd27   :  { %v1894_v3 = vmul.f32 %v3921_v48, %v1889_v5 }
 0xd28   :  { %3922 = vrsqrt.f32 %v1892_v0  ;;  %vm1912_vm12 = vcmp.eq.f32.partialorder %v1892_v0, inf  ;;  %v1915_v37 = vand.u32 2147483648, %v1892_v0  ;;  %vm1914_vm13 = vcmp.eq.f32.partialorder %v1892_v0, 0.0 }
 0xd29   :  { %v1895_v23 = vmul.f32 %v3921_v48, %v1894_v3 }
 0xd2b   :  { %v1896_v7 = vmul.f32 0.5, %v1895_v23 }
 0xd2d   :  { %v1897_v52 = vsub.f32 1.5, %v1896_v7 }
 0xd2e   :  { %v3923_v60 = vpop.eup %3922  ;;  %v2051_v23 = vpop.f32.mrf.mxu0 }
 0xd2f   :  { %v1898_v58 = vmul.f32 %v3921_v48, %v1897_v52  ;;  %v1906_v4 = vmul.f32 %v3923_v60, %v1892_v0  ;;  %v2089_v48 = vpop.f32.mrf.mxu1 }
 0xd31   :  { %v1899_v55 = vmul.f32 %v1898_v58, %v1889_v5  ;;  %v1907_v56 = vmul.f32 %v3923_v60, %v1906_v4 }
 0xd33   :  { %v1901_v17 = vsel %vm1900_vm10, %v1889_v5, %v1899_v55  ;;  %v1908_v40 = vmul.f32 0.5, %v1907_v56 }
 0xd34   :  { %v1904_v31 = vsel %vm1902_vm11, %v1903_v30, %v1901_v17 }
 0xd35   :  { %3924 = vrcp.f32 %v1904_v31  ;;  %v1909_v21 = vsub.f32 1.5, %v1908_v40  ;;  %v1928_v27 = vand.u32 2147483648, %v1904_v31  ;;  %v1926_v29 = vand.u32 2147483647, %v1904_v31 }
 0xd36   :  { %vm1922_vm15 = vweird.f32 %v1904_v31 }
 0xd37   :  { %v1910_v1 = vmul.f32 %v3923_v60, %v1909_v21  ;;  %v1929_v26 = vor.u32 1.1754944e-38, %v1928_v27  ;;  %vm1927_vm5 = vcmp.eq.f32.partialorder %v1926_v29, 8.507059e+37  ;;  %v2092_v52 = vpop.f32.mrf.mxu1 }
 0xd38   :  { %v2093_v60 = vadd.f32 %v2092_v52, %v2051_v23 }
 0xd39   :  { %v1911_v16 = vmul.f32 %v1910_v1, %v1892_v0 }
 0xd3b   :  { %v3925_v14 = vpop.eup %3924  ;;  %v1913_v43 = vsel %vm1912_vm12, %v1892_v0, %v1911_v16  ;;  %v2090_v0 = vadd.f32 %v2089_v48, %v2048_v10 }
 0xd3c   :  { %v1918_v25 = vmul.f32 %v3925_v14, %v1904_v31  ;;  %v1916_v39 = vsel %vm1914_vm13, %v1915_v37, %v1913_v43  ;;  %vm1923_vm14 = vweird.f32 %v3925_v14 }
 0xd3d   :  { %3926 = vrcp.f32 %v1916_v39  ;;  %vm1924_vm3 = vmor %vm1922_vm15, %vm1923_vm14  ;;  %v1943_v24 = vand.u32 2147483648, %v1916_v39  ;;  %v1941_v9 = vand.u32 2147483647, %v1916_v39  ;;  %vm1937_vm7 = vweird.f32 %v1916_v39 }
 0xd3e   :  { %v1919_v13 = vsub.f32 1.0, %v1918_v25 }
 0xd3f   :  { %v1944_v57 = vor.u32 1.1754944e-38, %v1943_v24  ;;  %vm1942_vm10 = vcmp.eq.f32.partialorder %v1941_v9, 8.507059e+37  ;;  %v2095_v55 = vpop.f32.mrf.mxu1 }
 0xd40   :  { %v1920_v35 = vmul.f32 %v3925_v14, %v1919_v13 }
 0xd42   :  { %v1921_v63 = vadd.f32 %v3925_v14, %v1920_v35 }
 0xd43   :  { %v3927_v22 = vpop.eup %3926 }
 0xd44   :  { %v1925_v28 = vsel %vm1924_vm3, %v3925_v14, %v1921_v63  ;;  %v1933_v53 = vmul.f32 %v3927_v22, %v1916_v39  ;;  %vm1938_vm6 = vweird.f32 %v3927_v22 }
 0xd45   :  { %v1930_v42 = vsel %vm1927_vm5, %v1929_v26, %v1925_v28  ;;  %vm1939_vm8 = vmor %vm1937_vm7, %vm1938_vm6 }
 0xd46   :  { %v1931_v32 = vmul.f32 %v1930_v42, %v5403_v62  ;;  %v1934_v15 = vsub.f32 1.0, %v1933_v53  ;;  %v1947_v36 = vmul.f32 %v1930_v42, %v5405_v51 }
 0xd47   :  { %v2098_v16 = vpop.f32.mrf.mxu1 }
 0xd48   :  { %v1957_v33 = vmul.f32 %v1931_v32, %v5245_v41  ;;  %v1935_v38 = vmul.f32 %v3927_v22, %v1934_v15  ;;  %v1959_v50 = vmul.f32 %v1947_v36, %v5330_v2 }
 0xd4a   :  { %3666 = vmatmul.msk.f32.vlgmr.msra.gmra.mxu2 %vm1870_vm2, %v1957_v33  ;;  %v1936_v6 = vadd.f32 %v3927_v22, %v1935_v38 }
 0xd4c   :  { %v1940_v34 = vsel %vm1939_vm8, %v3927_v22, %v1936_v6 }
 0xd4d   :  { %v1945_v12 = vsel %vm1942_vm10, %v1944_v57, %v1940_v34 }
 0xd4e   :  { %v1946_v5 = vmul.f32 %v1945_v12, %v5416_v45  ;;  %v1948_v18 = vmul.f32 %v1945_v12, %v5418_v20  ;;  %v3851_v45 = vld [vmem:[%s5651_s20] ss:$0 sm:$0xff]  ;;  %v2054_v20 = vpop.f32.mrf.mxu0 }
 0xd4f   :  { %v2096_v30 = vadd.f32 %v2095_v55, %v2054_v20 }
 0xd50   :  { %v1958_v62 = vmul.f32 %v1946_v5, %v5268_v44  ;;  %v1960_v47 = vmul.f32 %v1948_v18, %v5295_v46 }
 0xd52   :  { %3667 = vmatmul.msk.f32.gmra.mxu2 %vm1870_vm2, %v1958_v62 }
 0xd56   :  { %v2057_v21 = vpop.f32.mrf.mxu0 }
 0xd57   :  { %v2099_v14 = vadd.f32 %v2098_v16, %v2057_v21 }
 0xd5a   :  { %3668 = vmatmul.msk.f32.gmra.mxu2 %vm1870_vm2, %v1959_v50 }
 0xd62   :  { %3669 = vmatmul.msk.f32.gmra.mxu2 %vm1870_vm2, %v1960_v47 }
 0xdcd   :  { %v2134_v3 = vpop.f32.mrf.mxu2 }
 0xdce   :  { %v2146_v7 = vadd.f32 %v2134_v3, %v2090_v0 }
 0xdd0   :  { %v2154_v49 = vadd.f32 %v3851_v45, %v2146_v7 }
 0xdd2   :  { %v2158_v51 = vsel %vm1870_vm2, %v2154_v49, -inf }
 0xdd3   :  { %2159 = vmax.xlane.f32.xlu1 %v2158_v51 }
 0xdd5   :  { %v2137_v61 = vpop.f32.mrf.mxu2 }
 0xdd6   :  { %v2147_v58 = vadd.f32 %v2137_v61, %v2093_v60 }
 0xdd8   :  { %v2155_v4 = vadd.f32 %v3851_v45, %v2147_v58 }
 0xdda   :  { %v2161_v56 = vsel %vm1870_vm2, %v2155_v4, -inf }
 0xddb   :  { %2162 = vmax.xlane.f32.xlu2 %v2161_v56 }
 0xddd   :  { %v2140_v17 = vpop.f32.mrf.mxu2 }
 0xdde   :  { %v2148_v40 = vadd.f32 %v2140_v17, %v2096_v30 }
 0xde0   :  { %v2156_v31 = vadd.f32 %v3851_v45, %v2148_v40 }
 0xde2   :  { %v2164_v1 = vsel %vm1870_vm2, %v2156_v31, -inf }
 0xde3   :  { %2165 = vmax.xlane.f32.xlu0 %v2164_v1 }
 0xde5   :  { %v2143_v37 = vpop.f32.mrf.mxu2 }
 0xde6   :  { %v2149_v25 = vadd.f32 %v2143_v37, %v2099_v14 }
 0xde8   :  { %v2157_v43 = vadd.f32 %v3851_v45, %v2149_v25 }
 0xdea   :  { %v2167_v39 = vsel %vm1870_vm2, %v2157_v43, -inf }
 0xdeb   :  { %2168 = vmax.xlane.f32.xlu1 %v2167_v39 }
 0xe46   :  { %v2160_v13 = vpop.xlane.xlu1 %2159 }
 0xe47   :  { %v2170_v27 = vsub.f32 %v2154_v49, %v2160_v13 }
 0xe49   :  { %v2174_v35 = vmul.f32 1.442695, %v2170_v27 }
 0xe4b   :  { %3928 = vpow2.f32 %v2174_v35 }
 0xe4e   :  { %v2163_v29 = vpop.xlane.xlu2 %2162 }
 0xe4f   :  { %v2171_v63 = vsub.f32 %v2155_v4, %v2163_v29 }
 0xe51   :  { %v3929_v26 = vpop.eup %3928  ;;  %v2176_v22 = vmul.f32 1.442695, %v2171_v63 }
 0xe52   :  { %v2182_v28 = vsel %vm1870_vm2, %v3929_v26, 0.0 }
 0xe53   :  { %2183 = vadd.xlane.f32.xlu2 %v2182_v28  ;;  %3930 = vpow2.f32 %v2176_v22 }
 0xe56   :  { %v2166_v42 = vpop.xlane.xlu0 %2165 }
 0xe57   :  { %v2172_v53 = vsub.f32 %v2156_v31, %v2166_v42 }
 0xe59   :  { %v3931_v32 = vpop.eup %3930  ;;  %v2178_v15 = vmul.f32 1.442695, %v2172_v53 }
 0xe5a   :  { %v2185_v33 = vsel %vm1870_vm2, %v3931_v32, 0.0 }
 0xe5b   :  { %3932 = vpow2.f32 %v2178_v15  ;;  %2186 = vadd.xlane.f32.xlu1 %v2185_v33 }
 0xe5e   :  { %v2169_v24 = vpop.xlane.xlu1 %2168 }
 0xe5f   :  { %v2173_v38 = vsub.f32 %v2157_v43, %v2169_v24 }
 0xe61   :  { %v5448_v9 = vpop.eup %3932  ;;  %v2180_v6 = vmul.f32 1.442695, %v2173_v38 }
 0xe62   :  { %v2188_v57 = vsel %vm1870_vm2, %v5448_v9, 0.0 }
 0xe63   :  { %3934 = vpow2.f32 %v2180_v6  ;;  %2189 = vadd.xlane.f32.xlu2 %v2188_v57 }
 0xe69   :  { %v5452_v34 = vpop.eup %3934 }
 0xe6a   :  { %v2191_v12 = vsel %vm1870_vm2, %v5452_v34, 0.0 }
 0xe6b   :  { %2192 = vadd.xlane.f32.xlu1 %v2191_v12 }
 0xec6   :  { %v2184_v5 = vpop.xlane.xlu2 %2183 }
 0xec7   :  { %3936 = vrcp.f32 %v2184_v5  ;;  %v2205_v47 = vand.u32 2147483648, %v2184_v5  ;;  %v2203_v48 = vand.u32 2147483647, %v2184_v5  ;;  %vm2199_vm12 = vweird.f32 %v2184_v5 }
 0xec9   :  { %v2206_v45 = vor.u32 1.1754944e-38, %v2205_v47  ;;  %vm2204_vm14 = vcmp.eq.f32.partialorder %v2203_v48, 8.507059e+37  ;;  %v3963_v48 = vld [vmem:[%s5634_s23 + $0x8] sm:$0xff]  ;;  %s4360_s23 = sshra.s32 %s3513_s22, 4  ;;  %s4361_s23 = int_to_ptr.hbm [resolvable:$true] %s4360_s23 }
 0xeca   :  { %p4365_p11 = scmp.lt.s32.totalorder %s4361_s23, %s4694_s9 }
 0xecd   :  { %v3937_v62 = vpop.eup %3936 }
 0xece   :  { %v2195_v36 = vmul.f32 %v3937_v62, %v2184_v5  ;;  %v2187_v50 = vpop.xlane.xlu1 %2186  ;;  %vm2200_vm11 = vweird.f32 %v3937_v62 }
 0xecf   :  { %3938 = vrcp.f32 %v2187_v50  ;;  %vm2201_vm13 = vmor %vm2199_vm12, %vm2200_vm11  ;;  %v2220_v58 = vand.u32 2147483648, %v2187_v50  ;;  %v2218_v4 = vand.u32 2147483647, %v2187_v50  ;;  %vm2214_vm3 = vweird.f32 %v2187_v50 }
 0xed0   :  { %v2196_v18 = vsub.f32 1.0, %v2195_v36 }
 0xed1   :  { %v2221_v17 = vor.u32 1.1754944e-38, %v2220_v58  ;;  %vm2219_vm6 = vcmp.eq.f32.partialorder %v2218_v4, 8.507059e+37 }
 0xed2   :  { %v2197_v10 = vmul.f32 %v3937_v62, %v2196_v18 }
 0xed4   :  { %v2198_v0 = vadd.f32 %v3937_v62, %v2197_v10 }
 0xed5   :  { %v3939_v3 = vpop.eup %3938 }
 0xed6   :  { %v2202_v23 = vsel %vm2201_vm13, %v3937_v62, %v2198_v0  ;;  %v2210_v7 = vmul.f32 %v3939_v3, %v2187_v50  ;;  %v2190_v49 = vpop.xlane.xlu2 %2189  ;;  %vm2215_vm15 = vweird.f32 %v3939_v3 }
 0xed7   :  { %v2207_v52 = vsel %vm2204_vm14, %v2206_v45, %v2202_v23  ;;  %3940 = vrcp.f32 %v2190_v49  ;;  %vm2216_vm5 = vmor %vm2214_vm3, %vm2215_vm15  ;;  %v2235_v16 = vand.u32 2147483648, %v2190_v49  ;;  %v2233_v25 = vand.u32 2147483647, %v2190_v49 }
 0xed8   :  { %v2211_v51 = vsub.f32 1.0, %v2210_v7  ;;  %v2208_v60 = vmul.f32 %v3929_v26, %v2207_v52  ;;  %vm2229_vm8 = vweird.f32 %v2190_v49  ;;  %vm2541_vm3 = vcmask 1041408  }
 0xed9   :  { %v2236_v27 = vor.u32 1.1754944e-38, %v2235_v16  ;;  %vm2234_vm11 = vcmp.eq.f32.partialorder %v2233_v25, 8.507059e+37 }
 0xeda   :  { %v2212_v61 = vmul.f32 %v3939_v3, %v2211_v51  ;;  %v2254_v20 = vmul.f32 %v2208_v60, %v5245_v41 }
 0xedc   :  { %v2213_v55 = vadd.f32 %v3939_v3, %v2212_v61  ;;  %2258 = vxpose.xlu2.b32.start [1/2] (short) (narrow) %v2254_v20, 8  ;;  %v2486_v41 = vpack.c.bf16 %v2254_v20, %v2254_v20 }
 0xedd   :  { %v3941_v56 = vpop.eup %3940 }
 0xede   :  { %v2217_v30 = vsel %vm2216_vm5, %v3939_v3, %v2213_v55  ;;  %v2225_v40 = vmul.f32 %v3941_v56, %v2190_v49  ;;  %v2193_v31 = vpop.xlane.xlu1 %2192  ;;  %vm2230_vm7 = vweird.f32 %v3941_v56  ;;  %v2492_v26 = vunpack.c.l.b16 %v2486_v41 }
 0xedf   :  { %3942 = vrcp.f32 %v2193_v31  ;;  %v2222_v1 = vsel %vm2219_vm6, %v2221_v17, %v2217_v30  ;;  %vm2231_vm10 = vmor %vm2229_vm8, %vm2230_vm7  ;;  %vm2244_vm13 = vweird.f32 %v2193_v31 }
 0xee0   :  { %v2226_v21 = vsub.f32 1.0, %v2225_v40  ;;  %v2223_v14 = vmul.f32 %v3931_v32, %v2222_v1  ;;  %v2250_v32 = vand.u32 2147483648, %v2193_v31 }
 0xee2   :  { %v2227_v37 = vmul.f32 %v3941_v56, %v2226_v21  ;;  %v2255_v43 = vmul.f32 %v2223_v14, %v5268_v44  ;;  %v2248_v44 = vand.u32 2147483647, %v2193_v31  ;;  %v2251_v6 = vor.u32 1.1754944e-38, %v2250_v32 }
 0xee4   :  { %v2228_v39 = vadd.f32 %v3941_v56, %v2227_v37  ;;  %v2487_v35 = vpack.c.bf16 %v2255_v43, %v2255_v43  ;;  %2259 = vxpose.xlu2.b32.end [2/2] (short) (narrow) %v2255_v43, 8  ;;  %vm2249_vm15 = vcmp.eq.f32.partialorder %v2248_v44, 8.507059e+37  ;;  %v3757_v43 = vld [vmem:[%s5652_s17 + $0x8] sm:$0xff] }
 0xee5   :  { %v3943_v13 = vpop.eup %3942 }
 0xee6   :  { %v2240_v29 = vmul.f32 %v3943_v13, %v2193_v31  ;;  %v2232_v63 = vsel %vm2231_vm10, %v3941_v56, %v2228_v39  ;;  %v2493_v28 = vunpack.c.l.b16 %v2487_v35  ;;  %vm2245_vm12 = vweird.f32 %v3943_v13 }
 0xee7   :  { %v2237_v22 = vsel %vm2234_vm11, %v2236_v27, %v2232_v63  ;;  %vm2246_vm14 = vmor %vm2244_vm13, %vm2245_vm12 }
 0xee8   :  { %v2241_v42 = vsub.f32 1.0, %v2240_v29  ;;  %v2238_v53 = vmul.f32 %v5448_v9, %v2237_v22  ;;  %v2494_v15 = vpack.c.b16 %v2493_v28, %v2492_v26 }
 0xeea   :  { %v2242_v33 = vmul.f32 %v3943_v13, %v2241_v42  ;;  %v2256_v24 = vmul.f32 %v2238_v53, %v5330_v2  ;;  %v3756_v53 = vld [vmem:[%s5652_s17] sm:$0xff] }
 0xeec   :  { %v2243_v38 = vadd.f32 %v3943_v13, %v2242_v33  ;;  %2290 = vxpose.xlu0.b32.start [1/2] (short) (narrow) %v2256_v24, 8  ;;  %v2488_v62 = vpack.c.bf16 %v2256_v24, %v2256_v24 }
 0xeee   :  { %v2247_v57 = vsel %vm2246_vm14, %v3943_v13, %v2243_v38  ;;  %v2514_v50 = vunpack.c.l.b16 %v2488_v62 }
 0xeef   :  { %v2252_v12 = vsel %vm2249_vm15, %v2251_v6, %v2247_v57 }
 0xef0   :  { %v2253_v5 = vmul.f32 %v5452_v34, %v2252_v12 }
 0xef2   :  { %v2257_v9 = vmul.f32 %v2253_v5, %v5295_v46 }
 0xef4   :  { %v2489_v36 = vpack.c.bf16 %v2257_v9, %v2257_v9  ;;  %2291 = vxpose.xlu0.b32.end [2/2] (short) (narrow) %v2257_v9, 8 }
 0xef6   :  { %v2515_v18 = vunpack.c.l.b16 %v2489_v36  ;;  %v475_v36 = vld [vmem:[%s5652_s17 + $0x18] sm:$0xf] }
 0xef8   :  { %v2516_v47 = vpack.c.b16 %v2515_v18, %v2514_v50  ;;  %v2732_v50 = vunpack.c.l.b16 %v475_v36 }
 0xefa   :  { %v2734_v18 = vpack.c.b16 %v2732_v50, %v2732_v50 }
 0xf75   :  { %v2274_v2 = vpop.trf.xlu2 }
 0xf76   :  { %v2322_v10 = vpack.c.bf16 %v2274_v2, %v2274_v2  ;;  %v3758_v2 = vld [vmem:[%s5652_s17 + $0x10] sm:$0xff] }
 0xf78   :  { %3672 = vmatmul.msk.bf16.vlgmr.msra.gmra.mxu1 %vm519_vm0, %v2322_v10  ;;  %3676 = vmatmul.msk.bf16.vlgmr.msrb.gmra.mxu2 %vm519_vm0, %v2322_v10 }
 0xf79   :  { %2528 = vmatpush.bf16.msra.mxu1 %v2516_v47  ;;  %3670 = vmatmul.msk.bf16.vlgmr.msra.gmra.mxu3 %vm519_vm0, %v2322_v10  ;;  %v2740_v47 = vsel %vm577_vm1, %v2734_v18, 0  ;;  %vm2823_vm1 = vcmask 125952  }
 0xf7a   :  { %2478 = vmatpush.bf16.msra.mxu3 %v3963_v48 }
 0xf90   :  { %v2306_v34 = vpop.trf.xlu0 }
 0xf91   :  { %v2323_v0 = vpack.c.bf16 %v2306_v34, %v2306_v34 }
 0xf93   :  { %3671 = vmatmul.msk.bf16.vlgmr.msra.gmra.mxu0 %vm519_vm0, %v2323_v0  ;;  %3673 = vmatmul.msk.bf16.vlgmr.msrb.gmra.mxu3 %vm519_vm0, %v2323_v0 }
 0xf94   :  { %2506 = vmatpush.bf16.msra.mxu0 %v2494_v15  ;;  %3675 = vmatmul.msk.bf16.vlgmr.msrb.gmra.mxu1 %vm519_vm0, %v2323_v0 }
 0xfa3   :  { %3674 = vmatmul.msk.bf16.vlgmr.msrb.gmra.mxu0 %vm519_vm0, %v2322_v10  ;;  %3677 = vmatmul.msk.bf16.vlgmr.msra.gmra.mxu3 %vm519_vm0, %v2323_v0 }
 0xff5   :  { %v2391_v46 = vpop.f32.mrf.mxu1 }
 0xff6   :  { %v2579_v45 = vpack.c.bf16 %v2391_v46, %v2391_v46 }
 0xff8   :  { %v2582_v3 = vsel %vm2541_vm3, %v2579_v45, 0 }
 0xff9   :  { %2591 = vmatpush.bf16.msrb.mxu0 %v2582_v3 }
 0xffb   :  { %v2466_v23 = vpop.f32.mrf.mxu2 }
 0xffc   :  { %v2484_v7 = vpack.c.bf16 %v2466_v23, %v2466_v23  ;;  %v2346_v49 = vpop.f32.mrf.mxu3 }
 0xffd   :  { %v2536_v52 = vpack.c.bf16 %v2346_v49, %v2346_v49  ;;  %v2393_v51 = vpop.f32.mrf.mxu1 }
 0xffe   :  { %3678 = vmatmul.msk.bf16.vlgmr.msra.gmra.mxu0 %vm519_vm0, %v2484_v7 }
 0xfff   :  { %v2543_v60 = vsel %vm2541_vm3, %v2536_v52, 0  ;;  %2669 = vmatpush.bf16.msra.mxu0 %v3756_v53 }
0x1000   :  { %2552 = vmatpush.bf16.msra.mxu2 %v2543_v60 }
0x1003   :  { %v2468_v61 = vpop.f32.mrf.mxu2 }
0x1004   :  { %v2348_v58 = vpop.f32.mrf.mxu3  ;;  %2631 = vmatpush.bf16.msrb.mxu2 %v3757_v43 }
0x1010   :  { %v2368_v20 = vpop.f32.mrf.mxu0 }
0x1011   :  { %v2537_v4 = vpack.c.bf16 %v2368_v20, %v2368_v20  ;;  %v2452_v55 = vpop.f32.mrf.mxu1 }
0x1012   :  { %v2692_v63 = vpack.c.bf16 %v2452_v55, %v2452_v55  ;;  %v3852_v55 = vld [vmem:[%s5653_s15] ss:$0 sm:$0xff] }
0x1013   :  { %v2562_v56 = vsel %vm2541_vm3, %v2537_v4, 0  ;;  %v3759_v4 = vld [vmem:[#allocation19] sm:$0xff] }
0x1014   :  { %2571 = vmatpush.bf16.msrb.mxu3 %v2562_v56  ;;  %v2710_v28 = vsel %vm2541_vm3, %v2692_v63, 0 }
0x1016   :  { %v2410_v30 = vpop.f32.mrf.mxu3 }
0x1017   :  { %v2580_v17 = vpack.c.bf16 %v2410_v30, %v2410_v30 }
0x1018   :  { %v2370_v40 = vpop.f32.mrf.mxu0  ;;  %2647 = vmatpush.bf16.msra.mxu3 %v3757_v43 }
0x1019   :  { %v2598_v31 = vsel %vm2541_vm3, %v2580_v17, 0  ;;  %v2454_v21 = vpop.f32.mrf.mxu1 }
0x101a   :  { %2607 = vmatpush.bf16.msrb.mxu1 %v2598_v31 }
0x101e   :  { %v2412_v1 = vpop.f32.mrf.mxu3 }
0x1020   :  { %v2433_v16 = vpop.f32.mrf.mxu0 }
0x1021   :  { %v2691_v39 = vpack.c.bf16 %v2433_v16, %v2433_v16 }
0x1023   :  { %v2694_v35 = vsel %vm2541_vm3, %v2691_v39, 0 }
0x1026   :  { %v2480_v14 = vpop.f32.mrf.mxu3 }
0x1027   :  { %v2485_v37 = vpack.c.bf16 %v2480_v14, %v2480_v14 }
0x1028   :  { %v2435_v25 = vpop.f32.mrf.mxu0 }
0x1029   :  { %3679 = vmatmul.msk.bf16.vlgmr.msra.gmra.mxu1 %vm519_vm0, %v2485_v37 }
0x102a   :  { %2685 = vmatpush.bf16.msra.mxu1 %v3756_v53 }
0x102e   :  { %v2482_v41 = vpop.f32.mrf.mxu3 }
0x107b   :  { %v2508_v13 = vpop.f32.mrf.mxu0 }
0x107c   :  { %v5478_v27 = vpack.c.bf16 %v2508_v13, %v2508_v13  ;;  %v3853_v13 = vld [vmem:[%s5654_s16] ss:$0 sm:$0xff] }
0x107e   :  { %3680 = vmatmul.msk.bf16.vlgmr.msra.gmra.mxu2 %vm1870_vm2, %v5478_v27  ;;  %3682 = vmatmul.msk.bf16.vlgmr.msrb.gmra.mxu0 %vm1870_vm2, %v5478_v27 }
0x107f   :  { %2703 = vmatpush.bf16.msra.mxu2 %v2694_v35  ;;  %2748 = vmatpush.bf16.msrb.mxu0 %v2740_v47 }
0x1083   :  { %v2510_v29 = vpop.f32.mrf.mxu0  ;;  %2749 = vmatpush.bf16.msrb.mxu0 %v3758_v2 }
0x10a6   :  { %v2530_v26 = vpop.f32.mrf.mxu1 }
0x10a7   :  { %v5485_v22 = vpack.c.bf16 %v2530_v26, %v2530_v26 }
0x10a9   :  { %3681 = vmatmul.msk.bf16.vlgmr.msrb.gmra.mxu3 %vm1870_vm2, %v5485_v22  ;;  %3683 = vmatmul.msk.bf16.vlgmr.msrb.gmra.mxu1 %vm1870_vm2, %v5485_v22 }
0x10aa   :  { %2719 = vmatpush.bf16.msrb.mxu3 %v2710_v28  ;;  %2764 = vmatpush.bf16.msrb.mxu1 %v2740_v47 }
0x10ae   :  { %v2532_v42 = vpop.f32.mrf.mxu1  ;;  %2765 = vmatpush.bf16.msrb.mxu1 %v3758_v2 }
0x10fb   :  { %v2593_v32 = vpop.f32.mrf.mxu0 }
0x10fc   :  { %v2613_v15 = vpack.c.bf16 %v2593_v32, %v2593_v32 }
0x10fe   :  { %3688 = vmatmul.msk.bf16.vlgmr.msrb.gmra.mxu2 %vm519_vm0, %v2613_v15 }
0x10ff   :  { %2801 = vmatpush.bf16.msrb.mxu2 %v3759_v4 }
0x1101   :  { %v2554_v33 = vpop.f32.mrf.mxu2 }
0x1102   :  { %v2577_v44 = vpack.c.bf16 %v2554_v33, %v2554_v33 }
0x1103   :  { %v2595_v24 = vpop.f32.mrf.mxu0 }
0x1104   :  { %3694 = vmatmul.msk.bf16.vlgmr.msra.gmra.mxu0 %vm519_vm0, %v2577_v44 }
0x1109   :  { %v2556_v38 = vpop.f32.mrf.mxu2 }
0x110e   :  { %3696 = vmatmul.msk.bf16.vlgmr.msra.gmra.mxu2 %vm1870_vm2, %v5478_v27 }
0x1126   :  { %v2609_v6 = vpop.f32.mrf.mxu1 }
0x1127   :  { %v2614_v57 = vpack.c.bf16 %v2609_v6, %v2609_v6 }
0x1129   :  { %3689 = vmatmul.msk.bf16.vlgmr.msra.gmra.mxu3 %vm519_vm0, %v2614_v57 }
0x112a   :  { %2817 = vmatpush.bf16.msra.mxu3 %v3759_v4 }
0x112c   :  { %v2573_v12 = vpop.f32.mrf.mxu3 }
0x112d   :  { %v2578_v5 = vpack.c.bf16 %v2573_v12, %v2573_v12 }
0x112e   :  { %v2611_v62 = vpop.f32.mrf.mxu1 }
0x112f   :  { %3695 = vmatmul.msk.bf16.vlgmr.msra.gmra.mxu1 %vm519_vm0, %v2578_v5 }
0x1134   :  { %v2575_v9 = vpop.f32.mrf.mxu3 }
0x1139   :  { %3697 = vmatmul.msk.bf16.vlgmr.msrb.gmra.mxu3 %vm1870_vm2, %v5485_v22 }
0x1181   :  { %v2633_v10 = vpop.f32.mrf.mxu2  ;;  %v2671_v48 = vpop.f32.mrf.mxu0 }
0x1182   :  { %v2672_v34 = vadd.f32 %v2671_v48, %v2633_v10 }
0x1189   :  { %v2635_v0 = vpop.f32.mrf.mxu2  ;;  %v2673_v46 = vpop.f32.mrf.mxu0 }
0x1191   :  { %v2705_v45 = vpop.f32.mrf.mxu2 }
0x1192   :  { %v2725_v3 = vpack.c.bf16 %v2705_v45, %v2705_v45 }
0x1194   :  { %3702 = vmatmul.msk.bf16.vlgmr.msrb.gmra.mxu0 %vm1174_vm4, %v2725_v3 }
0x1199   :  { %v2707_v23 = vpop.f32.mrf.mxu2 }
0x11ac   :  { %v2649_v7 = vpop.f32.mrf.mxu3  ;;  %v2687_v49 = vpop.f32.mrf.mxu1 }
0x11ad   :  { %v2688_v52 = vadd.f32 %v2687_v49, %v2649_v7 }
0x11b4   :  { %v2651_v51 = vpop.f32.mrf.mxu3  ;;  %v2689_v60 = vpop.f32.mrf.mxu1 }
0x11bc   :  { %v2721_v61 = vpop.f32.mrf.mxu3 }
0x11bd   :  { %v2726_v58 = vpack.c.bf16 %v2721_v61, %v2721_v61 }
0x11bf   :  { %3703 = vmatmul.msk.bf16.vlgmr.msrb.gmra.mxu1 %vm1174_vm4, %v2726_v58 }
0x11c4   :  { %v2723_v20 = vpop.f32.mrf.mxu3 }
0x1211   :  { %v2751_v56 = vpop.f32.mrf.mxu0 }
0x1212   :  { %v2771_v30 = vadd.f32 %v2751_v56, %v2672_v34 }
0x1214   :  { %v2776_v17 = vadd.f32 %v3852_v55, %v2771_v30 }
0x1216   :  { %v2778_v40 = vmax.f32 %v2776_v17, 0.0 }
0x1218   :  { %v2780_v31 = vpack.c.bf16 %v2778_v40, %v2778_v40 }
0x1219   :  { %v2753_v21 = vpop.f32.mrf.mxu0 }
0x121a   :  { %3708 = vmatmul.msk.bf16.vlgmr.msrb.gmra.mxu2 %vm519_vm0, %v2780_v31 }
0x123c   :  { %v2767_v1 = vpop.f32.mrf.mxu1 }
0x123d   :  { %v2772_v16 = vadd.f32 %v2767_v1, %v2688_v52 }
0x123f   :  { %v2777_v14 = vadd.f32 %v3852_v55, %v2772_v16 }
0x1241   :  { %v2779_v37 = vmax.f32 %v2777_v14, 0.0 }
0x1243   :  { %v2781_v25 = vpack.c.bf16 %v2779_v37, %v2779_v37 }
0x1244   :  { %v2769_v41 = vpop.f32.mrf.mxu1 }
0x1245   :  { %3709 = vmatmul.msk.bf16.vlgmr.msra.gmra.mxu3 %vm519_vm0, %v2781_v25 }
0x129d   :  { %v2803_v43 = vpop.f32.mrf.mxu2 }
0x129e   :  { %v2804_v35 = vadd.f32 %v3853_v13, %v2803_v43 }
0x12a0   :  { %v2824_v26 = vsel %vm2823_vm1, %v2804_v35, 0.0 }
0x12a5   :  { %v2805_v39 = vpop.f32.mrf.mxu2 }
0x12c8   :  { %v2819_v29 = vpop.f32.mrf.mxu3 }
0x12c9   :  { %v2820_v63 = vadd.f32 %v3853_v13, %v2819_v29 }
0x12cb   :  { %v2825_v28 = vsel %vm2823_vm1, %v2820_v63, 0.0 }
0x12cc   :  { %v2826_v42 = vadd.f32 %v2825_v28, %v2824_v26 }
0x12ce   :  { %v2827_v53 = vmul.f32 %v2826_v42, %v4869_v54 }
0x12d0   :  { %v2828_v32 = vsub.f32 %v2804_v35, %v2827_v53  ;;  %v2829_v15 = vsub.f32 %v2820_v63, %v2827_v53  ;;  %v2821_v33 = vpop.f32.mrf.mxu3 }
0x12d2   :  { %v2830_v44 = vmul.f32 %v2828_v32, %v2828_v32  ;;  %v2831_v24 = vmul.f32 %v2829_v15, %v2829_v15 }
0x12d4   :  { %v2832_v38 = vsel %vm2823_vm1, %v2830_v44, 0.0  ;;  %v2833_v6 = vsel %vm2823_vm1, %v2831_v24, 0.0 }
0x12d5   :  { %v2834_v57 = vadd.f32 %v2833_v6, %v2832_v38 }
0x12d7   :  { %3944 = vrsqrt.f32 %v2834_v57  ;;  %vm2842_vm5 = vcmp.eq.f32.partialorder %v2834_v57, inf  ;;  %v2845_v47 = vand.u32 2147483648, %v2834_v57  ;;  %vm2844_vm6 = vcmp.eq.f32.partialorder %v2834_v57, 0.0 }
0x12dd   :  { %v3945_v12 = vpop.eup %3944 }
0x12de   :  { %v2836_v5 = vmul.f32 %v3945_v12, %v2834_v57 }
0x12e0   :  { %v2837_v62 = vmul.f32 %v3945_v12, %v2836_v5 }
0x12e2   :  { %v2838_v9 = vmul.f32 0.5, %v2837_v62 }
0x12e4   :  { %v2839_v36 = vsub.f32 1.5, %v2838_v9 }
0x12e6   :  { %v2840_v50 = vmul.f32 %v3945_v12, %v2839_v36 }
0x12e8   :  { %v2841_v18 = vmul.f32 %v2840_v50, %v2834_v57 }
0x12ea   :  { %v2843_v2 = vsel %vm2842_vm5, %v2834_v57, %v2841_v18 }
0x12eb   :  { %v2846_v10 = vsel %vm2844_vm6, %v2845_v47, %v2843_v2 }
0x12ec   :  { %3946 = vrcp.f32 %v2846_v10  ;;  %v2858_v46 = vand.u32 2147483648, %v2846_v10  ;;  %v2856_v3 = vand.u32 2147483647, %v2846_v10  ;;  %vm2852_vm8 = vweird.f32 %v2846_v10 }
0x12ee   :  { %v2859_v7 = vor.u32 1.1754944e-38, %v2858_v46  ;;  %vm2857_vm11 = vcmp.eq.f32.partialorder %v2856_v3, 8.507059e+37 }
0x12f2   :  { %v3947_v48 = vpop.eup %3946 }
0x12f3   :  { %v2848_v34 = vmul.f32 %v3947_v48, %v2846_v10  ;;  %vm2853_vm7 = vweird.f32 %v3947_v48 }
0x12f4   :  { %vm2854_vm10 = vmor %vm2852_vm8, %vm2853_vm7 }
0x12f5   :  { %v2849_v0 = vsub.f32 1.0, %v2848_v34 }
0x12f7   :  { %v2850_v45 = vmul.f32 %v3947_v48, %v2849_v0 }
0x12f9   :  { %v2851_v23 = vadd.f32 %v3947_v48, %v2850_v45 }
0x12fb   :  { %v2855_v49 = vsel %vm2854_vm10, %v3947_v48, %v2851_v23  ;;  %v3760_v48 = vld [vmem:[#allocation20] sm:$0xff] }
0x12fc   :  { %v2860_v52 = vsel %vm2857_vm11, %v2859_v7, %v2855_v49  ;;  %2949 = vmatpush.bf16.msra.mxu2 %v3760_v48  ;;  %2965 = vmatpush.bf16.msrb.mxu3 %v3760_v48  ;;  %v3761_v7 = vld [vmem:[#allocation22] sm:$0xff] }
0x12fd   :  { %v2862_v51 = vmul.f32 %v2860_v52, %v2829_v15  ;;  %v2861_v60 = vmul.f32 %v2860_v52, %v2828_v32  ;;  %v3854_v49 = vld [vmem:[%s5655_s12] ss:$0 sm:$0xff] }
0x12ff   :  { %v2863_v61 = vmax.f32 %v2861_v60, 0.0  ;;  %v2864_v58 = vmax.f32 %v2862_v51, 0.0 }
0x1301   :  { %v2865_v20 = vsel %vm2823_vm1, %v2863_v61, 0.0  ;;  %v2866_v4 = vsel %vm2823_vm1, %v2864_v58, 0.0 }
0x1302   :  { %v2867_v55 = vadd.f32 %v2866_v4, %v2865_v20 }
0x1304   :  { %2868 = vadd.xlane.f32.xlu1 %v2867_v55 }
0x1377   :  { %v2869_v56 = vpop.xlane.xlu1 %2868 }
0x1378   :  { %v2870_v30 = vmul.f32 %v2869_v56, %v4898_v19 }
0x137a   :  { %v2871_v17 = vsub.f32 %v2863_v61, %v2870_v30  ;;  %v2872_v40 = vsub.f32 %v2864_v58, %v2870_v30 }
0x137c   :  { %v2873_v31 = vmul.f32 %v2871_v17, %v2871_v17  ;;  %v2874_v21 = vmul.f32 %v2872_v40, %v2872_v40 }
0x137e   :  { %v2875_v1 = vsel %vm2823_vm1, %v2873_v31, 0.0  ;;  %v2876_v16 = vsel %vm2823_vm1, %v2874_v21, 0.0 }
0x137f   :  { %v2877_v14 = vadd.f32 %v2876_v16, %v2875_v1 }
0x1381   :  { %2878 = vadd.xlane.f32.xlu1 %v2877_v14 }
0x13f4   :  { %v2879_v37 = vpop.xlane.xlu1 %2878 }
0x13f5   :  { %v2880_v25 = vmul.f32 %v2879_v37, %v4898_v19 }
0x13f7   :  { %v2881_v41 = vadd.f32 1e-05, %v2880_v25 }
0x13f9   :  { %3948 = vrsqrt.f32 %v2881_v41  ;;  %vm2888_vm13 = vweird.f32 %v2881_v41 }
0x13ff   :  { %v3949_v43 = vpop.eup %3948 }
0x1400   :  { %v2883_v39 = vmul.f32 %v3949_v43, %v2881_v41  ;;  %vm2889_vm12 = vweird.f32 %v3949_v43 }
0x1401   :  { %vm2890_vm14 = vmor %vm2888_vm13, %vm2889_vm12 }
0x1402   :  { %v2884_v13 = vmul.f32 %v3949_v43, %v2883_v39 }
0x1404   :  { %v2885_v35 = vmul.f32 0.5, %v2884_v13 }
0x1406   :  { %v2886_v29 = vsub.f32 1.5, %v2885_v35 }
0x1408   :  { %v2887_v63 = vmul.f32 %v3949_v43, %v2886_v29 }
0x140a   :  { %v2891_v26 = vsel %vm2890_vm14, %v3949_v43, %v2887_v63 }
0x140b   :  { %v2892_v28 = vmul.f32 %v2891_v26, %v2871_v17  ;;  %v2893_v42 = vmul.f32 %v2891_v26, %v2872_v40  ;;  %v3855_v17 = vld [vmem:[%s5656_s7] ss:$0 sm:$0xff] }
0x140d   :  { %v2894_v53 = vpack.c.bf16 %v2892_v28, %v2892_v28  ;;  %v3248_v32 = vsel %vm2823_vm1, %v2892_v28, -inf  ;;  %v2895_v15 = vpack.c.bf16 %v2893_v42, %v2893_v42  ;;  %v3255_v33 = vsel %vm2823_vm1, %v2893_v42, -inf }
0x140e   :  { %v3249_v44 = vrot.slane %v3248_v32, 4  ;;  %v3256_v24 = vrot.slane %v3255_v33, 4 }
0x140f   :  { %v2897_v38 = vsel %vm2541_vm3, %v2894_v53, 0  ;;  %v2913_v6 = vsel %vm2541_vm3, %v2895_v15, 0 }
0x1410   :  { %2906 = vmatpush.bf16.msra.mxu0 %v2897_v38  ;;  %v3250_v57 = vmax.f32 %v3248_v32, %v3249_v44  ;;  %2922 = vmatpush.bf16.msra.mxu1 %v2913_v6  ;;  %v3257_v12 = vmax.f32 %v3255_v33, %v3256_v24 }
0x1412   :  { %v3251_v5 = vrot.slane %v3250_v57, 2  ;;  %v3258_v62 = vrot.slane %v3257_v12, 2 }
0x1413   :  { %3710 = vmatmul.msk.bf16.vlgmr.msra.gmra.mxu0 %vm1870_vm2, %v5478_v27  ;;  %3711 = vmatmul.msk.bf16.vlgmr.msra.gmra.mxu1 %vm1870_vm2, %v5485_v22 }
0x1414   :  { %v3252_v9 = vmax.f32 %v3250_v57, %v3251_v5  ;;  %v3259_v36 = vmax.f32 %v3257_v12, %v3258_v62  ;;  %2994 = vmatpush.bf16.msrb.mxu0 %v3761_v7  ;;  %3010 = vmatpush.bf16.msrb.mxu1 %v3761_v7 }
0x1416   :  { %v3253_v50 = vrot.slane %v3252_v9, 1  ;;  %v3260_v18 = vrot.slane %v3259_v36, 1 }
0x1418   :  { %v3254_v47 = vmax.f32 %v3252_v9, %v3253_v50  ;;  %v3261_v2 = vmax.f32 %v3259_v36, %v3260_v18 }
0x141a   :  { %v5530_v10 = vsel %vm3296_vm9, %v3261_v2, %v3254_v47 }
0x1490   :  { %v2908_v34 = vpop.f32.mrf.mxu0  ;;  %v2924_v0 = vpop.f32.mrf.mxu1 }
0x1491   :  { %v2928_v46 = vpack.c.bf16 %v2908_v34, %v2908_v34  ;;  %v2929_v45 = vpack.c.bf16 %v2924_v0, %v2924_v0 }
0x1493   :  { %3716 = vmatmul.msk.bf16.vlgmr.msra.gmra.mxu2 %vm519_vm0, %v2928_v46  ;;  %3717 = vmatmul.msk.bf16.vlgmr.msrb.gmra.mxu3 %vm519_vm0, %v2929_v45 }
0x1498   :  { %v2910_v3 = vpop.f32.mrf.mxu0  ;;  %v2926_v23 = vpop.f32.mrf.mxu1 }
0x1516   :  { %v2951_v52 = vpop.f32.mrf.mxu2  ;;  %v2967_v51 = vpop.f32.mrf.mxu3 }
0x1517   :  { %v2952_v60 = vadd.f32 %v3854_v49, %v2951_v52  ;;  %v2968_v61 = vadd.f32 %v3854_v49, %v2967_v51 }
0x1519   :  { %v2971_v58 = vmax.f32 %v2952_v60, 0.0  ;;  %v2972_v20 = vmax.f32 %v2968_v61, 0.0 }
0x151b   :  { %v2973_v4 = vpack.c.bf16 %v2971_v58, %v2971_v58  ;;  %v2974_v55 = vpack.c.bf16 %v2972_v20, %v2972_v20 }
0x151d   :  { %3722 = vmatmul.msk.bf16.vlgmr.msrb.gmra.mxu0 %vm519_vm0, %v2973_v4  ;;  %3723 = vmatmul.msk.bf16.vlgmr.msrb.gmra.mxu1 %vm519_vm0, %v2974_v55 }
0x151e   :  { %v2953_v56 = vpop.f32.mrf.mxu2  ;;  %v2969_v30 = vpop.f32.mrf.mxu3 }
0x159a   :  { %v2996_v40 = vpop.f32.mrf.mxu0  ;;  %v3012_v31 = vpop.f32.mrf.mxu1 }
0x159b   :  { %v2997_v21 = vadd.f32 %v3855_v17, %v2996_v40  ;;  %v3013_v1 = vadd.f32 %v3855_v17, %v3012_v31 }
0x159d   :  { %v3016_v16 = vsel %vm2823_vm1, %v2997_v21, 0.0  ;;  %v3017_v14 = vsel %vm2823_vm1, %v3013_v1, 0.0 }
0x159e   :  { %v3018_v37 = vadd.f32 %v3017_v14, %v3016_v16 }
0x15a0   :  { %v3019_v25 = vmul.f32 %v3018_v37, %v4869_v54 }
0x15a2   :  { %v3020_v41 = vsub.f32 %v2997_v21, %v3019_v25  ;;  %v3021_v43 = vsub.f32 %v3013_v1, %v3019_v25  ;;  %v2998_v39 = vpop.f32.mrf.mxu0  ;;  %v3014_v13 = vpop.f32.mrf.mxu1 }
0x15a4   :  { %v3022_v35 = vmul.f32 %v3020_v41, %v3020_v41  ;;  %v3023_v29 = vmul.f32 %v3021_v43, %v3021_v43 }
0x15a6   :  { %v3024_v63 = vsel %vm2823_vm1, %v3022_v35, 0.0  ;;  %v3025_v26 = vsel %vm2823_vm1, %v3023_v29, 0.0 }
0x15a7   :  { %v3026_v28 = vadd.f32 %v3025_v26, %v3024_v63 }
0x15a9   :  { %3950 = vrsqrt.f32 %v3026_v28  ;;  %vm3034_vm15 = vcmp.eq.f32.partialorder %v3026_v28, inf  ;;  %v3037_v38 = vand.u32 2147483648, %v3026_v28  ;;  %vm3036_vm5 = vcmp.eq.f32.partialorder %v3026_v28, 0.0 }
0x15af   :  { %v3951_v42 = vpop.eup %3950 }
0x15b0   :  { %v3028_v53 = vmul.f32 %v3951_v42, %v3026_v28 }
0x15b2   :  { %v3029_v32 = vmul.f32 %v3951_v42, %v3028_v53 }
0x15b4   :  { %v3030_v15 = vmul.f32 0.5, %v3029_v32 }
0x15b6   :  { %v3031_v33 = vsub.f32 1.5, %v3030_v15 }
0x15b8   :  { %v3032_v44 = vmul.f32 %v3951_v42, %v3031_v33 }
0x15ba   :  { %v3033_v24 = vmul.f32 %v3032_v44, %v3026_v28 }
0x15bc   :  { %v3035_v6 = vsel %vm3034_vm15, %v3026_v28, %v3033_v24 }
0x15bd   :  { %v3038_v57 = vsel %vm3036_vm5, %v3037_v38, %v3035_v6 }
0x15be   :  { %3952 = vrcp.f32 %v3038_v57  ;;  %v3050_v9 = vand.u32 2147483648, %v3038_v57  ;;  %v3048_v50 = vand.u32 2147483647, %v3038_v57  ;;  %vm3044_vm7 = vweird.f32 %v3038_v57 }
0x15c0   :  { %v3051_v47 = vor.u32 1.1754944e-38, %v3050_v9  ;;  %vm3049_vm10 = vcmp.eq.f32.partialorder %v3048_v50, 8.507059e+37  ;;  %v3292_v9 = vld [vmem:[#allocation26 + $0x10] sm:$0xff] }
0x15c4   :  { %v3953_v12 = vpop.eup %3952 }
0x15c5   :  { %v3040_v5 = vmul.f32 %v3953_v12, %v3038_v57  ;;  %vm3045_vm6 = vweird.f32 %v3953_v12 }
0x15c6   :  { %vm3046_vm8 = vmor %vm3044_vm7, %vm3045_vm6 }
0x15c7   :  { %v3041_v62 = vsub.f32 1.0, %v3040_v5  ;;  %v3293_v5 = vld [vmem:[#allocation26 + $0x18] sm:$0xff] }
0x15c9   :  { %v3042_v36 = vmul.f32 %v3953_v12, %v3041_v62  ;;  %v3291_v62 = vld [vmem:[#allocation26 + $0x8] sm:$0xff] }
0x15cb   :  { %v3043_v18 = vadd.f32 %v3953_v12, %v3042_v36 }
0x15cd   :  { %v3047_v2 = vsel %vm3046_vm8, %v3953_v12, %v3043_v18  ;;  %v3762_v12 = vld [vmem:[#allocation23] sm:$0xff] }
0x15ce   :  { %v3052_v48 = vsel %vm3049_vm10, %v3051_v47, %v3047_v2  ;;  %3141 = vmatpush.bf16.msra.mxu0 %v3762_v12  ;;  %3157 = vmatpush.bf16.msra.mxu1 %v3762_v12  ;;  %v3403_v47 = vld [vmem:[#allocation26 + $0x50] sm:$0xff]  ;;  %v3402_v2 = vld [vmem:[#allocation26 + $0x48] sm:$0xff] }
0x15cf   :  { %v3054_v34 = vmul.f32 %v3052_v48, %v3021_v43  ;;  %v3053_v0 = vmul.f32 %v3052_v48, %v3020_v41 }
0x15d1   :  { %v3055_v46 = vmax.f32 %v3053_v0, 0.0  ;;  %v3056_v45 = vmax.f32 %v3054_v34, 0.0  ;;  %v3763_v0 = vld [vmem:[#allocation25] sm:$0xff] }
0x15d2   :  { %3314 = vmatpush.msrb.mxu0 %v3293_v5  ;;  %3339 = vmatpush.msrb.mxu1 %v3291_v62 }
0x15d3   :  { %v3057_v3 = vsel %vm2823_vm1, %v3055_v46, 0.0  ;;  %v3058_v23 = vsel %vm2823_vm1, %v3056_v45, 0.0 }
0x15d4   :  { %v3059_v7 = vadd.f32 %v3058_v23, %v3057_v3  ;;  %3315 = vmatpush.msrb.mxu0 %v3292_v9  ;;  %v3345_v3 = vld [vmem:[#allocation26 + $0x20] sm:$0xff]  ;;  %v3856_v23 = vld [vmem:[%s5657_s6] ss:$0 sm:$0xff] }
0x15d6   :  { %3060 = vadd.xlane.f32.xlu1 %v3059_v7 }
0x1649   :  { %v3061_v49 = vpop.xlane.xlu1 %3060 }
0x164a   :  { %v3062_v52 = vmul.f32 %v3061_v49, %v4898_v19 }
0x164c   :  { %v3063_v51 = vsub.f32 %v3055_v46, %v3062_v52  ;;  %v3064_v60 = vsub.f32 %v3056_v45, %v3062_v52  ;;  %v3347_v46 = vld [vmem:[#allocation26 + $0x30] sm:$0xff]  ;;  %v3346_v45 = vld [vmem:[#allocation26 + $0x28] sm:$0xff] }
0x164e   :  { %v3065_v61 = vmul.f32 %v3063_v51, %v3063_v51  ;;  %v3066_v58 = vmul.f32 %v3064_v60, %v3064_v60 }
0x1650   :  { %v3067_v20 = vsel %vm2823_vm1, %v3065_v61, 0.0  ;;  %v3068_v4 = vsel %vm2823_vm1, %v3066_v58, 0.0  ;;  %v3375_v58 = vld [vmem:[#allocation26 + $0x40] sm:$0xff] }
0x1651   :  { %v3069_v55 = vadd.f32 %v3068_v4, %v3067_v20  ;;  %v3374_v20 = vld [vmem:[#allocation26 + $0x38] sm:$0xff] }
0x1653   :  { %3070 = vadd.xlane.f32.xlu1 %v3069_v55 }
0x16c6   :  { %v3071_v56 = vpop.xlane.xlu1 %3070 }
0x16c7   :  { %v3072_v30 = vmul.f32 %v3071_v56, %v4898_v19  ;;  %v3857_v56 = vld [vmem:[%s5658_s18] ss:$0 sm:$0xff] }
0x16c9   :  { %v3073_v17 = vadd.f32 1e-05, %v3072_v30 }
0x16cb   :  { %3954 = vrsqrt.f32 %v3073_v17  ;;  %vm3080_vm12 = vweird.f32 %v3073_v17 }
0x16d1   :  { %v3955_v40 = vpop.eup %3954 }
0x16d2   :  { %v3075_v31 = vmul.f32 %v3955_v40, %v3073_v17  ;;  %vm3081_vm11 = vweird.f32 %v3955_v40 }
0x16d3   :  { %vm3082_vm13 = vmor %vm3080_vm12, %vm3081_vm11 }
0x16d4   :  { %v3076_v21 = vmul.f32 %v3955_v40, %v3075_v31 }
0x16d6   :  { %v3077_v1 = vmul.f32 0.5, %v3076_v21 }
0x16d8   :  { %v3078_v16 = vsub.f32 1.5, %v3077_v1 }
0x16da   :  { %v3079_v14 = vmul.f32 %v3955_v40, %v3078_v16 }
0x16dc   :  { %v3083_v37 = vsel %vm3082_vm13, %v3955_v40, %v3079_v14 }
0x16dd   :  { %v3084_v25 = vmul.f32 %v3083_v37, %v3063_v51  ;;  %v3085_v41 = vmul.f32 %v3083_v37, %v3064_v60 }
0x16df   :  { %v3086_v43 = vpack.c.bf16 %v3084_v25, %v3084_v25  ;;  %v3262_v39 = vsel %vm2823_vm1, %v3084_v25, -inf  ;;  %v3087_v13 = vpack.c.bf16 %v3085_v41, %v3085_v41  ;;  %v3269_v19 = vsel %vm2823_vm1, %v3085_v41, -inf }
0x16e0   :  { %v3263_v35 = vrot.slane %v3262_v39, 4  ;;  %v3270_v29 = vrot.slane %v3269_v19, 4 }
0x16e1   :  { %v3089_v63 = vsel %vm2541_vm3, %v3086_v43, 0  ;;  %v3105_v26 = vsel %vm2541_vm3, %v3087_v13, 0 }
0x16e2   :  { %3098 = vmatpush.bf16.msrb.mxu2 %v3089_v63  ;;  %v3264_v28 = vmax.f32 %v3262_v39, %v3263_v35  ;;  %3114 = vmatpush.bf16.msra.mxu3 %v3105_v26  ;;  %v3271_v42 = vmax.f32 %v3269_v19, %v3270_v29 }
0x16e4   :  { %v3265_v53 = vrot.slane %v3264_v28, 2  ;;  %v3272_v32 = vrot.slane %v3271_v42, 2 }
0x16e5   :  { %3724 = vmatmul.msk.bf16.vlgmr.msrb.gmra.mxu2 %vm1870_vm2, %v5478_v27  ;;  %3725 = vmatmul.msk.bf16.vlgmr.msra.gmra.mxu3 %vm1870_vm2, %v5485_v22  ;;  %v3290_v27 = vld [vmem:[#allocation26] sm:$0xff]  ;;  %vm3208_vm2 = vcmask 191488  }
0x16e6   :  { %v3266_v15 = vmax.f32 %v3264_v28, %v3265_v53  ;;  %v3273_v33 = vmax.f32 %v3271_v42, %v3272_v32  ;;  %3340 = vmatpush.msrb.mxu1 %v3290_v27  ;;  %3186 = vmatpush.bf16.msra.mxu2 %v3763_v0 }
0x16e7   :  { %3202 = vmatpush.bf16.msrb.mxu3 %v3763_v0 }
0x16e8   :  { %v3267_v44 = vrot.slane %v3266_v15, 1  ;;  %v3274_v24 = vrot.slane %v3273_v33, 1 }
0x16ea   :  { %v3268_v38 = vmax.f32 %v3266_v15, %v3267_v44  ;;  %v3275_v6 = vmax.f32 %v3273_v33, %v3274_v24  ;;  %v3432_v15 = vld [vmem:[#allocation26 + $0x68] sm:$0xff]  ;;  %v3431_v33 = vld [vmem:[#allocation26 + $0x60] sm:$0xff]  ;;  %v3430_v24 = vld [vmem:[#allocation26 + $0x58] sm:$0xff] }
0x16eb   :  { %3366 = vmatpush.msra.mxu3 %v3347_v46 }
0x16ec   :  { %v3406_v57 = vsel %vm3296_vm9, %v3275_v6, %v3268_v38  ;;  %v3471_v38 = vld [vmem:[%s4684_s5 + $0x30] sm:$0x3]  ;;  %v3470_v6 = vld [vmem:[%s4684_s5 + $0x28] sm:$0xff] }
0x16ed   :  { %3367 = vmatpush.msra.mxu3 %v3346_v45  ;;  %3744 = vmatpush.msk.msrb.mxu2 %vm2541_vm3, %v3471_v38 }
0x16ef   :  { %3368 = vmatpush.msra.mxu3 %v3345_v3  ;;  %3493 = vmatpush.msrb.mxu2 %v3470_v6 }
0x1768   :  { %v3100_v22 = vpop.f32.mrf.mxu2  ;;  %v3116_v36 = vpop.f32.mrf.mxu3 }
0x1769   :  { %v3120_v50 = vpack.c.bf16 %v3100_v22, %v3100_v22  ;;  %v3121_v18 = vpack.c.bf16 %v3116_v36, %v3116_v36 }
0x176b   :  { %3730 = vmatmul.msk.bf16.vlgmr.msra.gmra.mxu0 %vm519_vm0, %v3120_v50  ;;  %3731 = vmatmul.msk.bf16.vlgmr.msra.gmra.mxu1 %vm519_vm0, %v3121_v18 }
0x176c   :  { %3423 = vmatpush.msra.mxu0 %v3403_v47  ;;  %3451 = vmatpush.msra.mxu1 %v3432_v15 }
0x176e   :  { %3424 = vmatpush.msra.mxu0 %v3402_v2  ;;  %3452 = vmatpush.msra.mxu1 %v3431_v33 }
0x1770   :  { %v3102_v48 = vpop.f32.mrf.mxu2  ;;  %v3118_v34 = vpop.f32.mrf.mxu3  ;;  %3453 = vmatpush.msra.mxu1 %v3430_v24 }
0x177b   :  { %3738 = vmatmul.msk.f32.vlgmr.msrb.gmra.mxu0 %vm519_vm0, %v5387_v8  ;;  %3739 = vmatmul.msk.f32.vlgmr.msrb.gmra.mxu1 %vm519_vm0, %v5379_v59 }
0x1783   :  { %3742 = vmatmul.msk.f32.vlgmr.msra.gmra.mxu0 %vm519_vm0, %v3406_v57  ;;  %v3469_v57 = vld [vmem:[%s4684_s5 + $0x20] sm:$0xff] }
0x1784   :  { %3494 = vmatpush.msrb.mxu2 %v3469_v57 }
0x17e8   :  { %v3143_v7 = vpop.f32.mrf.mxu0  ;;  %v3159_v49 = vpop.f32.mrf.mxu1 }
0x17e9   :  { %v3144_v52 = vadd.f32 %v3856_v23, %v3143_v7  ;;  %v3160_v8 = vadd.f32 %v3856_v23, %v3159_v49 }
0x17eb   :  { %v3163_v51 = vmax.f32 %v3144_v52, 0.0  ;;  %v3164_v60 = vmax.f32 %v3160_v8, 0.0 }
0x17ed   :  { %v3165_v59 = vpack.c.bf16 %v3163_v51, %v3163_v51  ;;  %v3166_v61 = vpack.c.bf16 %v3164_v60, %v3164_v60 }
0x17ef   :  { %3736 = vmatmul.msk.bf16.vlgmr.msra.gmra.mxu2 %vm519_vm0, %v3165_v59  ;;  %3737 = vmatmul.msk.bf16.vlgmr.msrb.gmra.mxu3 %vm519_vm0, %v3166_v61 }
0x17f0   :  { %v3145_v4 = vpop.f32.mrf.mxu0  ;;  %v3161_v55 = vpop.f32.mrf.mxu1  ;;  %3395 = vmatpush.msrb.mxu3 %v3375_v58 }
0x17f1   :  { %v3467_v4 = vld [vmem:[%s4684_s5 + $0x10] sm:$0xff]  ;;  %v3466_v55 = vld [vmem:[%s4684_s5 + $0x8] sm:$0xff] }
0x17f2   :  { %3396 = vmatpush.msrb.mxu3 %v3374_v20  ;;  %v3468_v20 = vld [vmem:[%s4684_s5 + $0x18] sm:$0xff] }
0x17f3   :  { %3495 = vmatpush.msrb.mxu2 %v3468_v20 }
0x17f5   :  { %3496 = vmatpush.msrb.mxu2 %v3467_v4 }
0x17f7   :  { %3497 = vmatpush.msrb.mxu2 %v3466_v55 }
0x17ff   :  { %3740 = vmatmul.msk.f32.vlgmr.msra.gmra.mxu3 %vm1174_vm4, %v5382_v11 }
0x1807   :  { %3741 = vmatmul.msk.f32.vlgmr.msrb.gmra.mxu3 %vm519_vm0, %v5530_v10 }
0x1872   :  { %v3188_v30 = vpop.f32.mrf.mxu2  ;;  %v3204_v17 = vpop.f32.mrf.mxu3 }
0x1873   :  { %v3189_v40 = vadd.f32 %v3857_v56, %v3188_v30  ;;  %v3205_v31 = vadd.f32 %v3857_v56, %v3204_v17  ;;  %v3465_v56 = vld [vmem:[%s4684_s5] sm:$0xff]  ;;  %v3317_v17 = vpop.f32.mrf.mxu0  ;;  %s4460_s5 = smov [#allocation28]  }
0x1874   :  { %3498 = vmatpush.msrb.mxu2 %v3465_v56  ;;  %s3510_s8 = sshll.u32 %s4460_s5, 4  ;;  %s3511_s8 = int_to_ptr.vmem [resolvable:$true] %s3510_s8 }
0x1875   :  { %v3209_v21 = vsel %vm3208_vm2, %v3189_v40, 0.0  ;;  %v3210_v1 = vsel %vm3208_vm2, %v3205_v31, 0.0 }
0x1876   :  { %v3211_v16 = vadd.f32 %v3210_v1, %v3209_v21 }
0x1878   :  { %v3212_v14 = vmul.f32 %v3211_v16, %v4869_v54 }
0x187a   :  { %v3213_v37 = vsub.f32 %v3189_v40, %v3212_v14  ;;  %v3214_v25 = vsub.f32 %v3205_v31, %v3212_v14  ;;  %v3190_v41 = vpop.f32.mrf.mxu2  ;;  %v3206_v11 = vpop.f32.mrf.mxu3 }
0x187b   :  { %v3342_v40 = vpop.f32.mrf.mxu1  ;;  %v3426_v14 = vpop.f32.mrf.mxu0 }
0x187c   :  { %v3215_v43 = vmul.f32 %v3213_v37, %v3213_v37  ;;  %v3216_v39 = vmul.f32 %v3214_v25, %v3214_v25  ;;  %v3343_v31 = vadd.f32 %v3342_v40, %v3317_v17 }
0x187e   :  { %v3217_v10 = vsel %vm3208_vm2, %v3215_v43, 0.0  ;;  %v3218_v13 = vsel %vm3208_vm2, %v3216_v39, 0.0 }
0x187f   :  { %v3219_v19 = vadd.f32 %v3218_v13, %v3217_v10  ;;  %v3859_v10 = vld [vmem:[%s4689_s30] ss:$0 sm:$0xff] }
0x1881   :  { %3956 = vrsqrt.f32 %v3219_v19  ;;  %vm3227_vm0 = vcmp.eq.f32.partialorder %v3219_v19, inf  ;;  %v3230_v53 = vand.u32 2147483648, %v3219_v19  ;;  %vm3229_vm1 = vcmp.eq.f32.partialorder %v3219_v19, 0.0 }
0x1882   :  { %v3370_v30 = vpop.f32.mrf.mxu3 }
0x1883   :  { %v3373_v1 = vadd.f32 %v3370_v30, %v3343_v31 }
0x1887   :  { %v3957_v35 = vpop.eup %3956 }
0x1888   :  { %v3221_v29 = vmul.f32 %v3957_v35, %v3219_v19 }
0x188a   :  { %v3222_v63 = vmul.f32 %v3957_v35, %v3221_v29  ;;  %v3398_v21 = vpop.f32.mrf.mxu3 }
0x188b   :  { %v3401_v16 = vadd.f32 %v3398_v21, %v3373_v1 }
0x188c   :  { %v3223_v26 = vmul.f32 0.5, %v3222_v63 }
0x188e   :  { %v3224_v28 = vsub.f32 1.5, %v3223_v26 }
0x1890   :  { %v3225_v54 = vmul.f32 %v3957_v35, %v3224_v28 }
0x1892   :  { %v3226_v42 = vmul.f32 %v3225_v54, %v3219_v19 }
0x1894   :  { %v3228_v32 = vsel %vm3227_vm0, %v3219_v19, %v3226_v42 }
0x1895   :  { %v3231_v44 = vsel %vm3229_vm1, %v3230_v53, %v3228_v32 }
0x1896   :  { %3958 = vrcp.f32 %v3231_v44  ;;  %v3243_v9 = vand.u32 2147483648, %v3231_v44  ;;  %v3241_v22 = vand.u32 2147483647, %v3231_v44  ;;  %vm3237_vm15 = vweird.f32 %v3231_v44 }
0x1898   :  { %v3244_v50 = vor.u32 1.1754944e-38, %v3243_v9  ;;  %vm3242_vm6 = vcmp.eq.f32.partialorder %v3241_v22, 8.507059e+37 }
0x189c   :  { %v3959_v12 = vpop.eup %3958 }
0x189d   :  { %v3233_v5 = vmul.f32 %v3959_v12, %v3231_v44  ;;  %vm3238_vm14 = vweird.f32 %v3959_v12 }
0x189e   :  { %vm3239_vm5 = vmor %vm3237_vm15, %vm3238_vm14 }
0x189f   :  { %v3234_v62 = vsub.f32 1.0, %v3233_v5 }
0x18a1   :  { %v3235_v27 = vmul.f32 %v3959_v12, %v3234_v62 }
0x18a3   :  { %v3236_v36 = vadd.f32 %v3959_v12, %v3235_v27 }
0x18a5   :  { %v3240_v18 = vsel %vm3239_vm5, %v3959_v12, %v3236_v36 }
0x18a6   :  { %v3245_v47 = vsel %vm3242_vm6, %v3244_v50, %v3240_v18 }
0x18a7   :  { %v3246_v2 = vmul.f32 %v3245_v47, %v3213_v37  ;;  %v3247_v48 = vmul.f32 %v3245_v47, %v3214_v25  ;;  %v3429_v37 = vadd.f32 %v3426_v14, %v3401_v16  ;;  %v3858_v25 = vld [vmem:[%s4679_s13] ss:$0 sm:$0xff]  ;;  %s4362_s13 = scalar_lea.hbm %s4361_s23, 2 }
0x18a8   :  { %p4363_p10 = scmp.ne.s32.totalorder %s4361_s23, %s4362_s13  ;;  %p4366_p12 = scmp.lt.s32.totalorder %s4364_s3, %s4362_s13 }
0x18a9   :  { %v3276_v34 = vsel %vm3208_vm2, %v3246_v2, -inf  ;;  %v3283_v0 = vsel %vm3208_vm2, %v3247_v48, -inf }
0x18aa   :  { %v3277_v46 = vrot.slane %v3276_v34, 4  ;;  %v3284_v45 = vrot.slane %v3283_v0, 4  ;;  %p4367_p13 = por %p4366_p12, %p4365_p11 }
0x18ac   :  { %v3278_v3 = vmax.f32 %v3276_v34, %v3277_v46  ;;  %v3285_v23 = vmax.f32 %v3283_v0, %v3284_v45  ;;  %p4368_p0 = pnand %p4367_p13, %p4363_p10 }
0x18ae   :  { %v3279_v7 = vrot.slane %v3278_v3, 2  ;;  %v3286_v49 = vrot.slane %v3285_v23, 2 }
0x18b0   :  { %v3280_v52 = vmax.f32 %v3278_v3, %v3279_v7  ;;  %v3287_v8 = vmax.f32 %v3285_v23, %v3286_v49 }
0x18b2   :  { %v3281_v51 = vrot.slane %v3280_v52, 1  ;;  %v3288_v60 = vrot.slane %v3287_v8, 1 }
0x18b4   :  { %v3289_v59 = vmax.f32 %v3287_v8, %v3288_v60  ;;  %v3282_v61 = vmax.f32 %v3280_v52, %v3281_v51 }
0x18b6   :  { %v3435_v58 = vsel %vm3296_vm9, %v3289_v59, %v3282_v61  ;;  %vm3503_vm9 = vcmask 25600  }
0x18b7   :  { %3743 = vmatmul.msk.f32.vlgmr.msra.gmra.mxu1 %vm1174_vm4, %v3435_v58  ;;  %vm3476_vm4 = vcmask 408576  }
0x1934   :  { %v3455_v41 = vpop.f32.mrf.mxu1 }
0x1935   :  { %v3458_v11 = vadd.f32 %v3455_v41, %v3429_v37 }
0x1937   :  { %v3463_v43 = vadd.f32 %v3858_v25, %v3458_v11 }
0x1939   :  { %v3464_v39 = vmax.f32 %v3463_v43, 0.0 }
0x193b   :  { %3745 = vmatmul.msk.f32.vlgmr.msrb.gmra.mxu2 %vm3476_vm4, %v3464_v39 }
0x19be   :  { %v3500_v13 = vpop.f32.mrf.mxu2 }
0x19bf   :  { %v3501_v19 = vadd.f32 %v3859_v10, %v3500_v13 }
0x19c1   :  { %3504 = vst.msk [vmem:[#allocation28] sm:$0x3] %vm3503_vm9, %v3501_v19 }
0x19c2   :  { %4371 = shalt.err (!%p4368_p0)
}
0x19c3   :  { %3515 = dma.vmem_to_hbm [thread:$0]  %s3511_s8, 32, %s3513_s22, [#allocation4]  }
0x19c4   :  { %4390 = dma.done.wait [#allocation4], 32  }
0x19c5   :  { %4391 = vsyncadd [#allocation4], 4294967264 }
0x19c6   :  { %3520 = vsyncpa [#allocation3], 1 }
0x19c7   :  { %3521 = vsyncpa [#allocation6], 1 }
0x19c8   :  { %3522 = vsyncpa [#allocation9], 1 }
0x19c9   :  { %3523 = vsyncpa [#allocation12], 1 }
0x19ca   :  { %3524 = vsyncpa [#allocation15], 1 }
0x19cb   :  { %3525 = vsyncpa [#allocation18], 1 }
0x19cc   :  { %3526 = vsyncpa [#allocation21], 1 }
0x19cd   :  { %3527 = vsyncpa [#allocation24], 1 }
0x19ce   :  { %3528 = vsyncpa [#allocation27], 1 }
0x19cf   :  { %3529 = vsyncpa [#allocation4], 1 }

</bundles_post_ra>
